<compile_context>
chip_gen: v5e
topology: v5e:2x2
jax: 0.10.0
libtpu: 0.0.40
codegen_flags: <defaults>
</compile_context>

<pallas_src>
import math

import jax
import jax.numpy as jnp
from jax import lax
from jax.experimental import pallas as pl
from jax.experimental.pallas import tpu as pltpu


def _activation(x, use_relu):
    return jnp.maximum(x, 0.0) if use_relu else jnp.tanh(x)


# ----------------------------------------------------------------------------
# Fully fused forward kernel factory
# ----------------------------------------------------------------------------
def build_forward(cfg, B, N, Bt):
    D = cfg['input_dim']
    E = cfg['embedding_size']
    NUM_EMB = cfg['num_embeddings']
    Hh = cfg['embed_hidden_size']
    H = cfg['num_heads']
    C = cfg['hidden_size']
    HC = H * C
    concat = cfg['concat_heads']
    use_relu = cfg['use_ReLU']
    embed_use_relu = cfg.get('embed_use_ReLU', True)
    n_embed_hidden = cfg['embed_layer_N']
    n_gnn2 = cfg['layer_N']
    n_layers = 1 + n_gnn2
    out_feat = HC if concat else C
    aggr = cfg['global_aggr_type']
    inv_sqrt_c = 1.0 / math.sqrt(C)

    G = -(-B // Bt)          # number of grid steps (>= 2 in the demo so both v7x TCs get work)
    Bp = G * Bt

    def kernel(*refs):
        (nobs_ref, adjT_ref, hmask_ref, table_ref,
         w1f_ref, w1emb_ref, w1edge_ref, b1_ref) = refs[:8]
        pos = 8
        embed_hidden = []
        for _ in range(n_embed_hidden):
            embed_hidden.append((refs[pos], refs[pos + 1]))
            pos += 2
        gnn_layers = []
        for _ in range(n_layers):
            gnn_layers.append((refs[pos], refs[pos + 1], refs[pos + 2]))
            pos += 3
        out_ref = refs[pos]

        nobs = nobs_ref[...].reshape(Bt * N, D)               # node ops flattened to (Bt*N, F)
        adjT = adjT_ref[...]                                  # (Bt, N, N)  adjT[b, target, source]
        maskf = (adjT != 0.0).astype(jnp.float32)

        feats = nobs[:, :D - 1]                               # (Bt*N, D-1)
        tcol = nobs[:, D - 1:D]                               # (Bt*N, 1) float entity type

        # entity-embedding lookup as a one-hot matmul
        cls = lax.broadcasted_iota(jnp.int32, (Bt * N, NUM_EMB), 1).astype(jnp.float32)
        onehot = (jnp.abs(tcol - cls) < 0.5).astype(jnp.float32)
        emb = jnp.dot(onehot, table_ref[...], preferred_element_type=jnp.float32)     # (Bt*N, E)

        # ---- EmbedConv:  x_t = sum_{s in N(t)}  MLP([feat_s, emb_s, e_ts]) ----
        # lin1 node part (split weight avoids a feature concat); edge part is a VPU broadcast.
        base = (jnp.dot(feats, w1f_ref[...], preferred_element_type=jnp.float32)
                + jnp.dot(emb, w1emb_ref[...], preferred_element_type=jnp.float32)
                + b1_ref[...])                                 # (Bt*N, Hh), indexed by source s
        base = base.reshape(Bt, N, Hh)
        msg = base[:, None, :, :] + adjT[:, :, :, None] * w1edge_ref[...]   # (Bt,N,N,Hh) [b,t,s,:]
        msg = _activation(msg, embed_use_relu)                 # lin1 + activation (no layerNorm)
        if n_embed_hidden:
            msg = msg.reshape(Bt * N * N, Hh)                  # hidden MLP batched over all edges
            for (w_ref, b_ref) in embed_hidden:
                msg = _activation(
                    jnp.dot(msg, w_ref[...], preferred_element_type=jnp.float32) + b_ref[...],
                    embed_use_relu)
            msg = msg.reshape(Bt, N, N, Hh)
        # 'add' aggregation over incoming edges only (vectorized mask-multiply + reduce)
        x = jnp.sum(maskf[:, :, :, None] * msg, axis=2)        # (Bt, N, Hh)

        # ---- gnn1 + gnn2 stack (TransformerConv + outer activation) ----
        for (wqkvs_ref, bqkvs_ref, wep_ref) in gnn_layers:
            fin = wqkvs_ref.shape[0]
            xf = x.reshape(Bt * N, fin)
            # fused Q/K/V/skip projection: one 128-lane matmul
            qkvs = jnp.dot(xf, wqkvs_ref[...], preferred_element_type=jnp.float32) + bqkvs_ref[...]
            q3 = qkvs[:, 0 * HC:1 * HC].reshape(Bt, N, HC)
            k3 = qkvs[:, 1 * HC:2 * HC].reshape(Bt, N, HC)
            v3 = qkvs[:, 2 * HC:3 * HC].reshape(Bt, N, HC)
            skip = qkvs[:, 3 * HC:].reshape(Bt, N, out_feat)

            acc = jnp.zeros((Bt, N, HC), jnp.float32)
            for h in range(H):                                 # tiny static unroll (H small)
                hm = hmask_ref[h:h + 1, :]                     # (1, HC) 1.0 on head-h lanes
                wrow = wep_ref[h:h + 1, :]                     # (1, HC) lin_edge row, head-h lanes
                km = k3 * hm
                vm = v3 * hm
                # scores[b,t,s] = <q_t, k_s + adjT[b,t,s]*we_h> / sqrt(C)
                qk = jnp.einsum('btf,bsf->bts', q3, km,
                                preferred_element_type=jnp.float32)        # (Bt, N, N)
                qe = jnp.sum(q3 * wrow, axis=-1)                           # (Bt, N)
                scores = (qk + adjT * qe[:, :, None]) * inv_sqrt_c
                # masked softmax over incoming edges (single maskf pass; shift cancels)
                m = jnp.max(scores, axis=-1, keepdims=True)
                p = jnp.exp(scores - m) * maskf
                denom = jnp.sum(p, axis=-1, keepdims=True)
                alpha = p * pl.reciprocal(jnp.maximum(denom, 1e-20), approx=True)
                # out_t = sum_s alpha[t,s] * (v_s + adjT[t,s]*we_h), placed on head-h lanes
                out_h = jnp.einsum('bts,bsf->btf', alpha, vm,
                                   preferred_element_type=jnp.float32)     # (Bt, N, HC)
                ea = jnp.sum(alpha * adjT, axis=-1)                        # (Bt, N)
                acc = acc + out_h + ea[:, :, None] * wrow
            if concat:
                out = acc
            else:
                out = jnp.sum(acc.reshape(Bt, N, H, C), axis=2) * (1.0 / H)
            # root weight (skip on target features, bias already fused) + outer activation
            x = _activation(out + skip, use_relu)              # (Bt, N, out_feat)

        # ---- global pool over each graph's nodes ----
        if aggr == 'mean':
            pooled = jnp.sum(x, axis=1) * (1.0 / N)
        elif aggr == 'add':
            pooled = jnp.sum(x, axis=1)
        elif aggr == 'max':
            pooled = jnp.max(x, axis=1)
        else:
            raise ValueError(f'Invalid global_aggr_type: {aggr}')
        out_ref[...] = pooled                                  # (Bt, out_feat), sublane-dense

    def _full_spec(arr):
        nd = arr.ndim
        return pl.BlockSpec(arr.shape, lambda g, _nd=nd: (0,) * _nd)

    def forward(node_obs, adj, flat_params):
        # pad batch to a multiple of Bt (padded graphs have no edges; rows discarded)
        if Bp != B:
            pad = Bp - B
            node_obs = jnp.concatenate(
                [node_obs, jnp.zeros((pad, N, D), node_obs.dtype)], axis=0)
            adj = jnp.concatenate(
                [adj, jnp.zeros((pad, N, N), adj.dtype)], axis=0)
        # wrapper-side transpose: adjT[b, target, source] (one cheap XLA op, no in-kernel MXU transpose)
        adjT = jnp.swapaxes(adj, 1, 2)

        in_specs = [
            pl.BlockSpec((Bt, N, D), lambda g: (g, 0, 0)),
            pl.BlockSpec((Bt, N, N), lambda g: (g, 0, 0)),
        ] + [_full_spec(p) for p in flat_params]

        out = pl.pallas_call(
            kernel,
            grid=(G,),
            in_specs=in_specs,
            out_specs=pl.BlockSpec((Bt, out_feat), lambda g: (g, 0)),
            out_shape=jax.ShapeDtypeStruct((Bp, out_feat), jnp.float32),
            compiler_params=pltpu.CompilerParams(
                dimension_semantics=("parallel",),
                vmem_limit_bytes=32 * 1024 * 1024),
        )(node_obs, adjT, *flat_params)
        return out[:B]

    return forward


# ----------------------------------------------------------------------------
# Full TransformerConvNet forward (single fused pallas_call)
# ----------------------------------------------------------------------------
def transformer_conv_net_forward(node_obs, adj, params, cfg, Bt=8):
    if cfg['graph_aggr'] != 'global':
        # TODO(synk): graph_aggr='node' / gatherNodeFeats path not wired into the fused kernel.
        raise NotImplementedError("only graph_aggr='global' is implemented")
    assert cfg['edge_dim'] == 1, "kernel hard-codes scalar edge attributes (edge_dim == 1)"
    assert not cfg.get('embed_use_layerNorm', False), "layerNorm path not implemented"

    B, N, _ = node_obs.shape
    H, C = cfg['num_heads'], cfg['hidden_size']
    HC = H * C

    # head lane masks: head_mask[h] is 1.0 on lanes [h*C, (h+1)*C) — built wrapper-side once
    lane = jnp.arange(HC)
    head_mask = (lane[None, :] // C == jnp.arange(H)[:, None]).astype(jnp.float32)   # (H, HC)

    flat = [head_mask, params['emb_table'],
            params['embed']['w1_feat'], params['embed']['w1_emb'],
            params['embed']['w1_edge'], params['embed']['b1']]
    for (w, b) in params['embed']['hidden']:
        flat += [w, b]
    for p in [params['gnn1']] + list(params['gnn2']):
        # fuse Q/K/V/skip weights & biases into one wide matmul; place lin_edge per head lane block
        wqkvs = jnp.concatenate([p['wq'], p['wk'], p['wv'], p['wskip']], axis=1)
        bqkvs = jnp.concatenate([p['bq'], p['bk'], p['bv'], p['bskip']], axis=1)
        we_placed = p['we'] * head_mask                        # (H, HC)
        flat += [wqkvs, bqkvs, we_placed]

    Bt = max(1, min(Bt, B))
    fwd = build_forward(cfg, B, N, Bt)
    return fwd(node_obs, adj, flat)                            # (B, out_feat)


# ----------------------------------------------------------------------------
# Deterministic parameter init (synthetic — no checkpoint)
# ----------------------------------------------------------------------------
def _w(key, fan_in, fan_out, scale=0.2):
    return jax.random.normal(key, (fan_in, fan_out), dtype=jnp.float32) * scale


def init_params(key, cfg):
    D = cfg['input_dim']
    E = cfg['embedding_size']
    Hh = cfg['embed_hidden_size']
    H, C = cfg['num_heads'], cfg['hidden_size']
    HC = H * C

    keys = jax.random.split(key, 64)
    ki = iter(keys)

    params = {}
    params['emb_table'] = jax.random.normal(
        next(ki), (cfg['num_embeddings'], E), dtype=jnp.float32) * 0.5

    # EmbedConv lin1 input = [node_feat (D-1 cols), entity_embedding (E), edge_attr (1)]
    params['embed'] = {
        'w1_feat': _w(next(ki), D - 1, Hh),
        'w1_emb': _w(next(ki), E, Hh),
        'w1_edge': _w(next(ki), 1, Hh),
        'b1': jnp.zeros((1, Hh), jnp.float32),
        'hidden': [(_w(next(ki), Hh, Hh), jnp.zeros((1, Hh), jnp.float32))
                   for _ in range(cfg['embed_layer_N'])],
    }

    def tc_params(fin):
        skip_out = HC if cfg['concat_heads'] else C
        return {
            'wq': _w(next(ki), fin, HC), 'bq': jnp.zeros((1, HC), jnp.float32),
            'wk': _w(next(ki), fin, HC), 'bk': jnp.zeros((1, HC), jnp.float32),
            'wv': _w(next(ki), fin, HC), 'bv': jnp.zeros((1, HC), jnp.float32),
            'we': _w(next(ki), 1, HC),                         # lin_edge, no bias
            'wskip': _w(next(ki), fin, skip_out),
            'bskip': jnp.zeros((1, skip_out), jnp.float32),
        }

    params['gnn1'] = tc_params(Hh)
    fin2 = HC if cfg['concat_heads'] else C
    params['gnn2'] = [tc_params(fin2) for _ in range(cfg['layer_N'])]
    return params


if __name__ == "__main__":
    cfg = dict(
        input_dim=7, num_embeddings=3, embedding_size=4,
        hidden_size=16, num_heads=2, concat_heads=True, layer_N=1, use_ReLU=True,
        graph_aggr='global', global_aggr_type='mean',
        embed_hidden_size=32, embed_layer_N=1, embed_use_ReLU=True,
        embed_use_layerNorm=False, edge_dim=1,
    )
    B, N, D = 16, 8, cfg['input_dim']        # B=16, Bt=8 -> 2 parallel grid steps

    key = jax.random.PRNGKey(0)
    k_feat, k_type, k_pos, k_param = jax.random.split(key, 4)

    feats = jax.random.normal(k_feat, (B, N, D - 1), dtype=jnp.float32)
    types = jax.random.randint(k_type, (B, N, 1), 0, cfg['num_embeddings']).astype(jnp.float32)
    node_obs = jnp.concatenate([feats, types], axis=-1)        # (B, N, D)

    # adjacency = pairwise distances, thresholded (0 => no edge, like process_adj nonzero)
    pos = jax.random.uniform(k_pos, (B, N, 2), dtype=jnp.float32)
    dist = jnp.sqrt(jnp.sum((pos[:, :, None, :] - pos[:, None, :, :]) ** 2, axis=-1) + 1e-12)
    adj = jnp.where(dist < 0.8, dist, 0.0)
    adj = adj * (1.0 - jnp.eye(N, dtype=jnp.float32)[None])    # no self-distance edge

    params = init_params(k_param, cfg)

    out = transformer_conv_net_forward(node_obs, adj, params, cfg, Bt=8)
    out = jax.block_until_ready(out)
    assert out.shape == (B, cfg['num_heads'] * cfg['hidden_size'])
    assert bool(jnp.all(jnp.isfinite(out)))
    print("KERNEL_OK")
</pallas_src>

<mosaic_0001>
module attributes {stable_mosaic.version = 11 : i64} {
  func.func @kernel(%arg0: i32, %arg1: memref<8x8x7xf32, #tpu.memory_space<vmem>>, %arg2: memref<8x8x8xf32, #tpu.memory_space<vmem>>, %arg3: memref<2x32xf32, #tpu.memory_space<vmem>>, %arg4: memref<3x4xf32, #tpu.memory_space<vmem>>, %arg5: memref<6x32xf32, #tpu.memory_space<vmem>>, %arg6: memref<4x32xf32, #tpu.memory_space<vmem>>, %arg7: memref<1x32xf32, #tpu.memory_space<vmem>>, %arg8: memref<1x32xf32, #tpu.memory_space<vmem>>, %arg9: memref<32x32xf32, #tpu.memory_space<vmem>>, %arg10: memref<1x32xf32, #tpu.memory_space<vmem>>, %arg11: memref<32x128xf32, #tpu.memory_space<vmem>>, %arg12: memref<1x128xf32, #tpu.memory_space<vmem>>, %arg13: memref<2x32xf32, #tpu.memory_space<vmem>>, %arg14: memref<32x128xf32, #tpu.memory_space<vmem>>, %arg15: memref<1x128xf32, #tpu.memory_space<vmem>>, %arg16: memref<2x32xf32, #tpu.memory_space<vmem>>, %arg17: memref<8x32xf32, #tpu.memory_space<vmem>>) attributes {dimension_semantics = [#tpu.dimension_semantics<parallel>], iteration_bounds = array<i64: 2>, scalar_prefetch = 0 : i64, scratch_operands = 0 : i64, tpu.core_type = #tpu.core_type<tc>, window_params = [{transform_indices = @transform_0, window_bounds = array<i64: 8, 8, 7>}, {transform_indices = @transform_1, window_bounds = array<i64: 8, 8, 8>}, {pipeline_mode = #tpu.pipeline_mode<synchronous>, transform_indices = @transform_2, window_bounds = array<i64: 2, 32>}, {pipeline_mode = #tpu.pipeline_mode<synchronous>, transform_indices = @transform_3, window_bounds = array<i64: 3, 4>}, {pipeline_mode = #tpu.pipeline_mode<synchronous>, transform_indices = @transform_4, window_bounds = array<i64: 6, 32>}, {pipeline_mode = #tpu.pipeline_mode<synchronous>, transform_indices = @transform_5, window_bounds = array<i64: 4, 32>}, {pipeline_mode = #tpu.pipeline_mode<synchronous>, transform_indices = @transform_6, window_bounds = array<i64: 1, 32>}, {pipeline_mode = #tpu.pipeline_mode<synchronous>, transform_indices = @transform_7, window_bounds = array<i64: 1, 32>}, {pipeline_mode = #tpu.pipeline_mode<synchronous>, transform_indices = @transform_8, window_bounds = array<i64: 32, 32>}, {pipeline_mode = #tpu.pipeline_mode<synchronous>, transform_indices = @transform_9, window_bounds = array<i64: 1, 32>}, {pipeline_mode = #tpu.pipeline_mode<synchronous>, transform_indices = @transform_10, window_bounds = array<i64: 32, 128>}, {pipeline_mode = #tpu.pipeline_mode<synchronous>, transform_indices = @transform_11, window_bounds = array<i64: 1, 128>}, {pipeline_mode = #tpu.pipeline_mode<synchronous>, transform_indices = @transform_12, window_bounds = array<i64: 2, 32>}, {pipeline_mode = #tpu.pipeline_mode<synchronous>, transform_indices = @transform_13, window_bounds = array<i64: 32, 128>}, {pipeline_mode = #tpu.pipeline_mode<synchronous>, transform_indices = @transform_14, window_bounds = array<i64: 1, 128>}, {pipeline_mode = #tpu.pipeline_mode<synchronous>, transform_indices = @transform_15, window_bounds = array<i64: 2, 32>}, {transform_indices = @transform_16, window_bounds = array<i64: 8, 32>}]} {
    %c0 = arith.constant 0 : index
    %c0_0 = arith.constant 0 : index
    %c0_1 = arith.constant 0 : index
    %0 = vector.load %arg1[%c0, %c0_0, %c0_1] : memref<8x8x7xf32, #tpu.memory_space<vmem>>, vector<8x8x7xf32>
    %1 = vector.shape_cast %0 : vector<8x8x7xf32> to vector<64x7xf32>
    %c0_2 = arith.constant 0 : index
    %c0_3 = arith.constant 0 : index
    %c0_4 = arith.constant 0 : index
    %2 = vector.load %arg2[%c0_2, %c0_3, %c0_4] : memref<8x8x8xf32, #tpu.memory_space<vmem>>, vector<8x8x8xf32>
    %cst = arith.constant 0.000000e+00 : f32
    %3 = vector.broadcast %cst : f32 to vector<8x8x8xf32>
    %4 = arith.cmpf one, %2, %3 : vector<8x8x8xf32>
    %5 = arith.extui %4 : vector<8x8x8xi1> to vector<8x8x8xi32>
    %6 = arith.sitofp %5 : vector<8x8x8xi32> to vector<8x8x8xf32>
    %7 = vector.extract_strided_slice %1 {offsets = [0, 0], sizes = [64, 6], strides = [1, 1]} : vector<64x7xf32> to vector<64x6xf32>
    %8 = vector.extract_strided_slice %1 {offsets = [0, 6], sizes = [64, 1], strides = [1, 1]} : vector<64x7xf32> to vector<64x1xf32>
    %9 = tpu.iota {dimensions = array<i32: 1>} : vector<64x3xi32>
    %10 = arith.sitofp %9 : vector<64x3xi32> to vector<64x3xf32>
    %11 = vector.broadcast %8 : vector<64x1xf32> to vector<64x3xf32>
    %12 = arith.subf %11, %10 : vector<64x3xf32>
    %13 = math.absf %12 : vector<64x3xf32>
    %cst_5 = arith.constant 5.000000e-01 : f32
    %14 = vector.broadcast %cst_5 : f32 to vector<64x3xf32>
    %15 = arith.cmpf olt, %13, %14 : vector<64x3xf32>
    %16 = arith.extui %15 : vector<64x3xi1> to vector<64x3xi32>
    %17 = arith.sitofp %16 : vector<64x3xi32> to vector<64x3xf32>
    %c0_6 = arith.constant 0 : index
    %c0_7 = arith.constant 0 : index
    %18 = vector.load %arg4[%c0_6, %c0_7] : memref<3x4xf32, #tpu.memory_space<vmem>>, vector<3x4xf32>
    %cst_8 = arith.constant dense<0.000000e+00> : vector<64x4xf32>
    %19 = tpu.matmul %17, %18, %cst_8 {dimension_numbers = #tpu.dot_dimension_numbers<[1], [0], [0], [1], [0, 0, 1, 1], [], []>} : vector<64x3xf32>, vector<3x4xf32>, vector<64x4xf32> -> vector<64x4xf32>
    %c0_9 = arith.constant 0 : index
    %c0_10 = arith.constant 0 : index
    %20 = vector.load %arg5[%c0_9, %c0_10] : memref<6x32xf32, #tpu.memory_space<vmem>>, vector<6x32xf32>
    %cst_11 = arith.constant dense<0.000000e+00> : vector<64x32xf32>
    %21 = tpu.matmul %7, %20, %cst_11 {dimension_numbers = #tpu.dot_dimension_numbers<[1], [0], [0], [1], [0, 0, 1, 1], [], []>} : vector<64x6xf32>, vector<6x32xf32>, vector<64x32xf32> -> vector<64x32xf32>
    %c0_12 = arith.constant 0 : index
    %c0_13 = arith.constant 0 : index
    %22 = vector.load %arg6[%c0_12, %c0_13] : memref<4x32xf32, #tpu.memory_space<vmem>>, vector<4x32xf32>
    %cst_14 = arith.constant dense<0.000000e+00> : vector<64x32xf32>
    %23 = tpu.matmul %19, %22, %cst_14 {dimension_numbers = #tpu.dot_dimension_numbers<[1], [0], [0], [1], [0, 0, 1, 1], [], []>} : vector<64x4xf32>, vector<4x32xf32>, vector<64x32xf32> -> vector<64x32xf32>
    %24 = arith.addf %21, %23 : vector<64x32xf32>
    %c0_15 = arith.constant 0 : index
    %c0_16 = arith.constant 0 : index
    %25 = vector.load %arg8[%c0_15, %c0_16] : memref<1x32xf32, #tpu.memory_space<vmem>>, vector<1x32xf32>
    %26 = vector.broadcast %25 : vector<1x32xf32> to vector<64x32xf32>
    %27 = arith.addf %24, %26 : vector<64x32xf32>
    %28 = vector.shape_cast %27 : vector<64x32xf32> to vector<8x8x32xf32>
    %29 = vector.shape_cast %28 : vector<8x8x32xf32> to vector<8x1x8x32xf32>
    %30 = vector.shape_cast %2 : vector<8x8x8xf32> to vector<8x8x8x1xf32>
    %c0_17 = arith.constant 0 : index
    %c0_18 = arith.constant 0 : index
    %31 = vector.load %arg7[%c0_17, %c0_18] : memref<1x32xf32, #tpu.memory_space<vmem>>, vector<1x32xf32>
    %32 = vector.shape_cast %31 : vector<1x32xf32> to vector<1x1x1x32xf32>
    %33 = vector.broadcast %30 : vector<8x8x8x1xf32> to vector<8x8x8x32xf32>
    %34 = vector.broadcast %32 : vector<1x1x1x32xf32> to vector<8x8x8x32xf32>
    %35 = arith.mulf %33, %34 : vector<8x8x8x32xf32>
    %36 = vector.broadcast %29 : vector<8x1x8x32xf32> to vector<8x8x8x32xf32>
    %37 = arith.addf %36, %35 : vector<8x8x8x32xf32>
    %cst_19 = arith.constant 0.000000e+00 : f32
    %38 = vector.broadcast %cst_19 : f32 to vector<8x8x8x32xf32>
    %39 = arith.maximumf %37, %38 : vector<8x8x8x32xf32>
    %40 = vector.shape_cast %39 : vector<8x8x8x32xf32> to vector<512x32xf32>
    %c0_20 = arith.constant 0 : index
    %c0_21 = arith.constant 0 : index
    %41 = vector.load %arg9[%c0_20, %c0_21] : memref<32x32xf32, #tpu.memory_space<vmem>>, vector<32x32xf32>
    %cst_22 = arith.constant dense<0.000000e+00> : vector<512x32xf32>
    %42 = tpu.matmul %40, %41, %cst_22 {dimension_numbers = #tpu.dot_dimension_numbers<[1], [0], [0], [1], [0, 0, 1, 1], [], []>} : vector<512x32xf32>, vector<32x32xf32>, vector<512x32xf32> -> vector<512x32xf32>
    %c0_23 = arith.constant 0 : index
    %c0_24 = arith.constant 0 : index
    %43 = vector.load %arg10[%c0_23, %c0_24] : memref<1x32xf32, #tpu.memory_space<vmem>>, vector<1x32xf32>
    %44 = vector.broadcast %43 : vector<1x32xf32> to vector<512x32xf32>
    %45 = arith.addf %42, %44 : vector<512x32xf32>
    %cst_25 = arith.constant 0.000000e+00 : f32
    %46 = vector.broadcast %cst_25 : f32 to vector<512x32xf32>
    %47 = arith.maximumf %45, %46 : vector<512x32xf32>
    %48 = vector.shape_cast %47 : vector<512x32xf32> to vector<8x8x8x32xf32>
    %49 = vector.shape_cast %6 : vector<8x8x8xf32> to vector<8x8x8x1xf32>
    %50 = vector.broadcast %49 : vector<8x8x8x1xf32> to vector<8x8x8x32xf32>
    %51 = arith.mulf %50, %48 : vector<8x8x8x32xf32>
    %cst_26 = arith.constant dense<0.000000e+00> : vector<8x8x32xf32>
    %52 = vector.multi_reduction <add>, %51, %cst_26 [2] : vector<8x8x8x32xf32> to vector<8x8x32xf32>
    %53 = vector.shape_cast %52 : vector<8x8x32xf32> to vector<64x32xf32>
    %c0_27 = arith.constant 0 : index
    %c0_28 = arith.constant 0 : index
    %54 = vector.load %arg11[%c0_27, %c0_28] : memref<32x128xf32, #tpu.memory_space<vmem>>, vector<32x128xf32>
    %cst_29 = arith.constant dense<0.000000e+00> : vector<64x128xf32>
    %55 = tpu.matmul %53, %54, %cst_29 {dimension_numbers = #tpu.dot_dimension_numbers<[1], [0], [0], [1], [0, 0, 1, 1], [], []>} : vector<64x32xf32>, vector<32x128xf32>, vector<64x128xf32> -> vector<64x128xf32>
    %c0_30 = arith.constant 0 : index
    %c0_31 = arith.constant 0 : index
    %56 = vector.load %arg12[%c0_30, %c0_31] : memref<1x128xf32, #tpu.memory_space<vmem>>, vector<1x128xf32>
    %57 = vector.broadcast %56 : vector<1x128xf32> to vector<64x128xf32>
    %58 = arith.addf %55, %57 : vector<64x128xf32>
    %59 = vector.extract_strided_slice %58 {offsets = [0, 0], sizes = [64, 32], strides = [1, 1]} : vector<64x128xf32> to vector<64x32xf32>
    %60 = vector.shape_cast %59 : vector<64x32xf32> to vector<8x8x32xf32>
    %61 = vector.extract_strided_slice %58 {offsets = [0, 32], sizes = [64, 32], strides = [1, 1]} : vector<64x128xf32> to vector<64x32xf32>
    %62 = vector.shape_cast %61 : vector<64x32xf32> to vector<8x8x32xf32>
    %63 = vector.extract_strided_slice %58 {offsets = [0, 64], sizes = [64, 32], strides = [1, 1]} : vector<64x128xf32> to vector<64x32xf32>
    %64 = vector.shape_cast %63 : vector<64x32xf32> to vector<8x8x32xf32>
    %65 = vector.extract_strided_slice %58 {offsets = [0, 96], sizes = [64, 32], strides = [1, 1]} : vector<64x128xf32> to vector<64x32xf32>
    %66 = vector.shape_cast %65 : vector<64x32xf32> to vector<8x8x32xf32>
    %cst_32 = arith.constant 0.000000e+00 : f32
    %67 = vector.broadcast %cst_32 : f32 to vector<8x8x32xf32>
    %c0_33 = arith.constant 0 : index
    %c0_34 = arith.constant 0 : index
    %68 = vector.load %arg3[%c0_33, %c0_34] : memref<2x32xf32, #tpu.memory_space<vmem>>, vector<1x32xf32>
    %c0_35 = arith.constant 0 : index
    %c0_36 = arith.constant 0 : index
    %69 = vector.load %arg13[%c0_35, %c0_36] : memref<2x32xf32, #tpu.memory_space<vmem>>, vector<1x32xf32>
    %70 = vector.shape_cast %68 : vector<1x32xf32> to vector<1x1x32xf32>
    %71 = vector.broadcast %70 : vector<1x1x32xf32> to vector<8x8x32xf32>
    %72 = arith.mulf %62, %71 : vector<8x8x32xf32>
    %73 = vector.shape_cast %68 : vector<1x32xf32> to vector<1x1x32xf32>
    %74 = vector.broadcast %73 : vector<1x1x32xf32> to vector<8x8x32xf32>
    %75 = arith.mulf %64, %74 : vector<8x8x32xf32>
    "tpu.trace_start"() <{level = 10 : i32, message = "btf,bsf->bts"}> : () -> ()
    %cst_37 = arith.constant dense<0.000000e+00> : vector<8x8x8xf32>
    %76 = tpu.matmul %60, %72, %cst_37 {dimension_numbers = #tpu.dot_dimension_numbers<[2], [2], [1], [1], [0, 0, 0, 1, 1, 1], [0], [0]>} : vector<8x8x32xf32>, vector<8x8x32xf32>, vector<8x8x8xf32> -> vector<8x8x8xf32>
    "tpu.trace_stop"() : () -> ()
    %77 = vector.shape_cast %69 : vector<1x32xf32> to vector<1x1x32xf32>
    %78 = vector.broadcast %77 : vector<1x1x32xf32> to vector<8x8x32xf32>
    %79 = arith.mulf %60, %78 : vector<8x8x32xf32>
    %cst_38 = arith.constant dense<0.000000e+00> : vector<8x8xf32>
    %80 = vector.multi_reduction <add>, %79, %cst_38 [2] : vector<8x8x32xf32> to vector<8x8xf32>
    %81 = vector.shape_cast %80 : vector<8x8xf32> to vector<8x8x1xf32>
    %82 = vector.broadcast %81 : vector<8x8x1xf32> to vector<8x8x8xf32>
    %83 = arith.mulf %2, %82 : vector<8x8x8xf32>
    %84 = arith.addf %76, %83 : vector<8x8x8xf32>
    %cst_39 = arith.constant 2.500000e-01 : f32
    %85 = vector.broadcast %cst_39 : f32 to vector<8x8x8xf32>
    %86 = arith.mulf %84, %85 : vector<8x8x8xf32>
    %cst_40 = arith.constant dense<0xFF800000> : vector<8x8xf32>
    %87 = vector.multi_reduction <maximumf>, %86, %cst_40 [2] : vector<8x8x8xf32> to vector<8x8xf32>
    %88 = vector.shape_cast %87 : vector<8x8xf32> to vector<8x8x1xf32>
    %89 = vector.broadcast %88 : vector<8x8x1xf32> to vector<8x8x8xf32>
    %90 = arith.subf %86, %89 : vector<8x8x8xf32>
    %91 = math.exp %90 : vector<8x8x8xf32>
    %92 = arith.mulf %91, %6 : vector<8x8x8xf32>
    %cst_41 = arith.constant dense<0.000000e+00> : vector<8x8xf32>
    %93 = vector.multi_reduction <add>, %92, %cst_41 [2] : vector<8x8x8xf32> to vector<8x8xf32>
    %94 = vector.shape_cast %93 : vector<8x8xf32> to vector<8x8x1xf32>
    %cst_42 = arith.constant 9.99999968E-21 : f32
    %95 = vector.broadcast %cst_42 : f32 to vector<8x8x1xf32>
    %96 = arith.maximumf %94, %95 : vector<8x8x1xf32>
    %97 = tpu.reciprocal %96 {approx = true} : vector<8x8x1xf32> -> vector<8x8x1xf32>
    %98 = vector.broadcast %97 : vector<8x8x1xf32> to vector<8x8x8xf32>
    %99 = arith.mulf %92, %98 : vector<8x8x8xf32>
    "tpu.trace_start"() <{level = 10 : i32, message = "bts,bsf->btf"}> : () -> ()
    %cst_43 = arith.constant dense<0.000000e+00> : vector<8x8x32xf32>
    %100 = tpu.matmul %99, %75, %cst_43 {dimension_numbers = #tpu.dot_dimension_numbers<[2], [1], [1], [2], [0, 0, 0, 1, 1, 2], [0], [0]>} : vector<8x8x8xf32>, vector<8x8x32xf32>, vector<8x8x32xf32> -> vector<8x8x32xf32>
    "tpu.trace_stop"() : () -> ()
    %101 = arith.mulf %99, %2 : vector<8x8x8xf32>
    %cst_44 = arith.constant dense<0.000000e+00> : vector<8x8xf32>
    %102 = vector.multi_reduction <add>, %101, %cst_44 [2] : vector<8x8x8xf32> to vector<8x8xf32>
    %103 = arith.addf %67, %100 : vector<8x8x32xf32>
    %104 = vector.shape_cast %102 : vector<8x8xf32> to vector<8x8x1xf32>
    %105 = vector.shape_cast %69 : vector<1x32xf32> to vector<1x1x32xf32>
    %106 = vector.broadcast %104 : vector<8x8x1xf32> to vector<8x8x32xf32>
    %107 = vector.broadcast %105 : vector<1x1x32xf32> to vector<8x8x32xf32>
    %108 = arith.mulf %106, %107 : vector<8x8x32xf32>
    %109 = arith.addf %103, %108 : vector<8x8x32xf32>
    %c1 = arith.constant 1 : index
    %c0_45 = arith.constant 0 : index
    %110 = vector.load %arg3[%c1, %c0_45] : memref<2x32xf32, #tpu.memory_space<vmem>>, vector<1x32xf32>
    %c1_46 = arith.constant 1 : index
    %c0_47 = arith.constant 0 : index
    %111 = vector.load %arg13[%c1_46, %c0_47] : memref<2x32xf32, #tpu.memory_space<vmem>>, vector<1x32xf32>
    %112 = vector.shape_cast %110 : vector<1x32xf32> to vector<1x1x32xf32>
    %113 = vector.broadcast %112 : vector<1x1x32xf32> to vector<8x8x32xf32>
    %114 = arith.mulf %62, %113 : vector<8x8x32xf32>
    %115 = vector.shape_cast %110 : vector<1x32xf32> to vector<1x1x32xf32>
    %116 = vector.broadcast %115 : vector<1x1x32xf32> to vector<8x8x32xf32>
    %117 = arith.mulf %64, %116 : vector<8x8x32xf32>
    "tpu.trace_start"() <{level = 10 : i32, message = "btf,bsf->bts"}> : () -> ()
    %cst_48 = arith.constant dense<0.000000e+00> : vector<8x8x8xf32>
    %118 = tpu.matmul %60, %114, %cst_48 {dimension_numbers = #tpu.dot_dimension_numbers<[2], [2], [1], [1], [0, 0, 0, 1, 1, 1], [0], [0]>} : vector<8x8x32xf32>, vector<8x8x32xf32>, vector<8x8x8xf32> -> vector<8x8x8xf32>
    "tpu.trace_stop"() : () -> ()
    %119 = vector.shape_cast %111 : vector<1x32xf32> to vector<1x1x32xf32>
    %120 = vector.broadcast %119 : vector<1x1x32xf32> to vector<8x8x32xf32>
    %121 = arith.mulf %60, %120 : vector<8x8x32xf32>
    %cst_49 = arith.constant dense<0.000000e+00> : vector<8x8xf32>
    %122 = vector.multi_reduction <add>, %121, %cst_49 [2] : vector<8x8x32xf32> to vector<8x8xf32>
    %123 = vector.shape_cast %122 : vector<8x8xf32> to vector<8x8x1xf32>
    %124 = vector.broadcast %123 : vector<8x8x1xf32> to vector<8x8x8xf32>
    %125 = arith.mulf %2, %124 : vector<8x8x8xf32>
    %126 = arith.addf %118, %125 : vector<8x8x8xf32>
    %cst_50 = arith.constant 2.500000e-01 : f32
    %127 = vector.broadcast %cst_50 : f32 to vector<8x8x8xf32>
    %128 = arith.mulf %126, %127 : vector<8x8x8xf32>
    %cst_51 = arith.constant dense<0xFF800000> : vector<8x8xf32>
    %129 = vector.multi_reduction <maximumf>, %128, %cst_51 [2] : vector<8x8x8xf32> to vector<8x8xf32>
    %130 = vector.shape_cast %129 : vector<8x8xf32> to vector<8x8x1xf32>
    %131 = vector.broadcast %130 : vector<8x8x1xf32> to vector<8x8x8xf32>
    %132 = arith.subf %128, %131 : vector<8x8x8xf32>
    %133 = math.exp %132 : vector<8x8x8xf32>
    %134 = arith.mulf %133, %6 : vector<8x8x8xf32>
    %cst_52 = arith.constant dense<0.000000e+00> : vector<8x8xf32>
    %135 = vector.multi_reduction <add>, %134, %cst_52 [2] : vector<8x8x8xf32> to vector<8x8xf32>
    %136 = vector.shape_cast %135 : vector<8x8xf32> to vector<8x8x1xf32>
    %cst_53 = arith.constant 9.99999968E-21 : f32
    %137 = vector.broadcast %cst_53 : f32 to vector<8x8x1xf32>
    %138 = arith.maximumf %136, %137 : vector<8x8x1xf32>
    %139 = tpu.reciprocal %138 {approx = true} : vector<8x8x1xf32> -> vector<8x8x1xf32>
    %140 = vector.broadcast %139 : vector<8x8x1xf32> to vector<8x8x8xf32>
    %141 = arith.mulf %134, %140 : vector<8x8x8xf32>
    "tpu.trace_start"() <{level = 10 : i32, message = "bts,bsf->btf"}> : () -> ()
    %cst_54 = arith.constant dense<0.000000e+00> : vector<8x8x32xf32>
    %142 = tpu.matmul %141, %117, %cst_54 {dimension_numbers = #tpu.dot_dimension_numbers<[2], [1], [1], [2], [0, 0, 0, 1, 1, 2], [0], [0]>} : vector<8x8x8xf32>, vector<8x8x32xf32>, vector<8x8x32xf32> -> vector<8x8x32xf32>
    "tpu.trace_stop"() : () -> ()
    %143 = arith.mulf %141, %2 : vector<8x8x8xf32>
    %cst_55 = arith.constant dense<0.000000e+00> : vector<8x8xf32>
    %144 = vector.multi_reduction <add>, %143, %cst_55 [2] : vector<8x8x8xf32> to vector<8x8xf32>
    %145 = arith.addf %109, %142 : vector<8x8x32xf32>
    %146 = vector.shape_cast %144 : vector<8x8xf32> to vector<8x8x1xf32>
    %147 = vector.shape_cast %111 : vector<1x32xf32> to vector<1x1x32xf32>
    %148 = vector.broadcast %146 : vector<8x8x1xf32> to vector<8x8x32xf32>
    %149 = vector.broadcast %147 : vector<1x1x32xf32> to vector<8x8x32xf32>
    %150 = arith.mulf %148, %149 : vector<8x8x32xf32>
    %151 = arith.addf %145, %150 : vector<8x8x32xf32>
    %152 = arith.addf %151, %66 : vector<8x8x32xf32>
    %cst_56 = arith.constant 0.000000e+00 : f32
    %153 = vector.broadcast %cst_56 : f32 to vector<8x8x32xf32>
    %154 = arith.maximumf %152, %153 : vector<8x8x32xf32>
    %155 = vector.shape_cast %154 : vector<8x8x32xf32> to vector<64x32xf32>
    %c0_57 = arith.constant 0 : index
    %c0_58 = arith.constant 0 : index
    %156 = vector.load %arg14[%c0_57, %c0_58] : memref<32x128xf32, #tpu.memory_space<vmem>>, vector<32x128xf32>
    %cst_59 = arith.constant dense<0.000000e+00> : vector<64x128xf32>
    %157 = tpu.matmul %155, %156, %cst_59 {dimension_numbers = #tpu.dot_dimension_numbers<[1], [0], [0], [1], [0, 0, 1, 1], [], []>} : vector<64x32xf32>, vector<32x128xf32>, vector<64x128xf32> -> vector<64x128xf32>
    %c0_60 = arith.constant 0 : index
    %c0_61 = arith.constant 0 : index
    %158 = vector.load %arg15[%c0_60, %c0_61] : memref<1x128xf32, #tpu.memory_space<vmem>>, vector<1x128xf32>
    %159 = vector.broadcast %158 : vector<1x128xf32> to vector<64x128xf32>
    %160 = arith.addf %157, %159 : vector<64x128xf32>
    %161 = vector.extract_strided_slice %160 {offsets = [0, 0], sizes = [64, 32], strides = [1, 1]} : vector<64x128xf32> to vector<64x32xf32>
    %162 = vector.shape_cast %161 : vector<64x32xf32> to vector<8x8x32xf32>
    %163 = vector.extract_strided_slice %160 {offsets = [0, 32], sizes = [64, 32], strides = [1, 1]} : vector<64x128xf32> to vector<64x32xf32>
    %164 = vector.shape_cast %163 : vector<64x32xf32> to vector<8x8x32xf32>
    %165 = vector.extract_strided_slice %160 {offsets = [0, 64], sizes = [64, 32], strides = [1, 1]} : vector<64x128xf32> to vector<64x32xf32>
    %166 = vector.shape_cast %165 : vector<64x32xf32> to vector<8x8x32xf32>
    %167 = vector.extract_strided_slice %160 {offsets = [0, 96], sizes = [64, 32], strides = [1, 1]} : vector<64x128xf32> to vector<64x32xf32>
    %168 = vector.shape_cast %167 : vector<64x32xf32> to vector<8x8x32xf32>
    %cst_62 = arith.constant 0.000000e+00 : f32
    %169 = vector.broadcast %cst_62 : f32 to vector<8x8x32xf32>
    %c0_63 = arith.constant 0 : index
    %c0_64 = arith.constant 0 : index
    %170 = vector.load %arg3[%c0_63, %c0_64] : memref<2x32xf32, #tpu.memory_space<vmem>>, vector<1x32xf32>
    %c0_65 = arith.constant 0 : index
    %c0_66 = arith.constant 0 : index
    %171 = vector.load %arg16[%c0_65, %c0_66] : memref<2x32xf32, #tpu.memory_space<vmem>>, vector<1x32xf32>
    %172 = vector.shape_cast %170 : vector<1x32xf32> to vector<1x1x32xf32>
    %173 = vector.broadcast %172 : vector<1x1x32xf32> to vector<8x8x32xf32>
    %174 = arith.mulf %164, %173 : vector<8x8x32xf32>
    %175 = vector.shape_cast %170 : vector<1x32xf32> to vector<1x1x32xf32>
    %176 = vector.broadcast %175 : vector<1x1x32xf32> to vector<8x8x32xf32>
    %177 = arith.mulf %166, %176 : vector<8x8x32xf32>
    "tpu.trace_start"() <{level = 10 : i32, message = "btf,bsf->bts"}> : () -> ()
    %cst_67 = arith.constant dense<0.000000e+00> : vector<8x8x8xf32>
    %178 = tpu.matmul %162, %174, %cst_67 {dimension_numbers = #tpu.dot_dimension_numbers<[2], [2], [1], [1], [0, 0, 0, 1, 1, 1], [0], [0]>} : vector<8x8x32xf32>, vector<8x8x32xf32>, vector<8x8x8xf32> -> vector<8x8x8xf32>
    "tpu.trace_stop"() : () -> ()
    %179 = vector.shape_cast %171 : vector<1x32xf32> to vector<1x1x32xf32>
    %180 = vector.broadcast %179 : vector<1x1x32xf32> to vector<8x8x32xf32>
    %181 = arith.mulf %162, %180 : vector<8x8x32xf32>
    %cst_68 = arith.constant dense<0.000000e+00> : vector<8x8xf32>
    %182 = vector.multi_reduction <add>, %181, %cst_68 [2] : vector<8x8x32xf32> to vector<8x8xf32>
    %183 = vector.shape_cast %182 : vector<8x8xf32> to vector<8x8x1xf32>
    %184 = vector.broadcast %183 : vector<8x8x1xf32> to vector<8x8x8xf32>
    %185 = arith.mulf %2, %184 : vector<8x8x8xf32>
    %186 = arith.addf %178, %185 : vector<8x8x8xf32>
    %cst_69 = arith.constant 2.500000e-01 : f32
    %187 = vector.broadcast %cst_69 : f32 to vector<8x8x8xf32>
    %188 = arith.mulf %186, %187 : vector<8x8x8xf32>
    %cst_70 = arith.constant dense<0xFF800000> : vector<8x8xf32>
    %189 = vector.multi_reduction <maximumf>, %188, %cst_70 [2] : vector<8x8x8xf32> to vector<8x8xf32>
    %190 = vector.shape_cast %189 : vector<8x8xf32> to vector<8x8x1xf32>
    %191 = vector.broadcast %190 : vector<8x8x1xf32> to vector<8x8x8xf32>
    %192 = arith.subf %188, %191 : vector<8x8x8xf32>
    %193 = math.exp %192 : vector<8x8x8xf32>
    %194 = arith.mulf %193, %6 : vector<8x8x8xf32>
    %cst_71 = arith.constant dense<0.000000e+00> : vector<8x8xf32>
    %195 = vector.multi_reduction <add>, %194, %cst_71 [2] : vector<8x8x8xf32> to vector<8x8xf32>
    %196 = vector.shape_cast %195 : vector<8x8xf32> to vector<8x8x1xf32>
    %cst_72 = arith.constant 9.99999968E-21 : f32
    %197 = vector.broadcast %cst_72 : f32 to vector<8x8x1xf32>
    %198 = arith.maximumf %196, %197 : vector<8x8x1xf32>
    %199 = tpu.reciprocal %198 {approx = true} : vector<8x8x1xf32> -> vector<8x8x1xf32>
    %200 = vector.broadcast %199 : vector<8x8x1xf32> to vector<8x8x8xf32>
    %201 = arith.mulf %194, %200 : vector<8x8x8xf32>
    "tpu.trace_start"() <{level = 10 : i32, message = "bts,bsf->btf"}> : () -> ()
    %cst_73 = arith.constant dense<0.000000e+00> : vector<8x8x32xf32>
    %202 = tpu.matmul %201, %177, %cst_73 {dimension_numbers = #tpu.dot_dimension_numbers<[2], [1], [1], [2], [0, 0, 0, 1, 1, 2], [0], [0]>} : vector<8x8x8xf32>, vector<8x8x32xf32>, vector<8x8x32xf32> -> vector<8x8x32xf32>
    "tpu.trace_stop"() : () -> ()
    %203 = arith.mulf %201, %2 : vector<8x8x8xf32>
    %cst_74 = arith.constant dense<0.000000e+00> : vector<8x8xf32>
    %204 = vector.multi_reduction <add>, %203, %cst_74 [2] : vector<8x8x8xf32> to vector<8x8xf32>
    %205 = arith.addf %169, %202 : vector<8x8x32xf32>
    %206 = vector.shape_cast %204 : vector<8x8xf32> to vector<8x8x1xf32>
    %207 = vector.shape_cast %171 : vector<1x32xf32> to vector<1x1x32xf32>
    %208 = vector.broadcast %206 : vector<8x8x1xf32> to vector<8x8x32xf32>
    %209 = vector.broadcast %207 : vector<1x1x32xf32> to vector<8x8x32xf32>
    %210 = arith.mulf %208, %209 : vector<8x8x32xf32>
    %211 = arith.addf %205, %210 : vector<8x8x32xf32>
    %c1_75 = arith.constant 1 : index
    %c0_76 = arith.constant 0 : index
    %212 = vector.load %arg3[%c1_75, %c0_76] : memref<2x32xf32, #tpu.memory_space<vmem>>, vector<1x32xf32>
    %c1_77 = arith.constant 1 : index
    %c0_78 = arith.constant 0 : index
    %213 = vector.load %arg16[%c1_77, %c0_78] : memref<2x32xf32, #tpu.memory_space<vmem>>, vector<1x32xf32>
    %214 = vector.shape_cast %212 : vector<1x32xf32> to vector<1x1x32xf32>
    %215 = vector.broadcast %214 : vector<1x1x32xf32> to vector<8x8x32xf32>
    %216 = arith.mulf %164, %215 : vector<8x8x32xf32>
    %217 = vector.shape_cast %212 : vector<1x32xf32> to vector<1x1x32xf32>
    %218 = vector.broadcast %217 : vector<1x1x32xf32> to vector<8x8x32xf32>
    %219 = arith.mulf %166, %218 : vector<8x8x32xf32>
    "tpu.trace_start"() <{level = 10 : i32, message = "btf,bsf->bts"}> : () -> ()
    %cst_79 = arith.constant dense<0.000000e+00> : vector<8x8x8xf32>
    %220 = tpu.matmul %162, %216, %cst_79 {dimension_numbers = #tpu.dot_dimension_numbers<[2], [2], [1], [1], [0, 0, 0, 1, 1, 1], [0], [0]>} : vector<8x8x32xf32>, vector<8x8x32xf32>, vector<8x8x8xf32> -> vector<8x8x8xf32>
    "tpu.trace_stop"() : () -> ()
    %221 = vector.shape_cast %213 : vector<1x32xf32> to vector<1x1x32xf32>
    %222 = vector.broadcast %221 : vector<1x1x32xf32> to vector<8x8x32xf32>
    %223 = arith.mulf %162, %222 : vector<8x8x32xf32>
    %cst_80 = arith.constant dense<0.000000e+00> : vector<8x8xf32>
    %224 = vector.multi_reduction <add>, %223, %cst_80 [2] : vector<8x8x32xf32> to vector<8x8xf32>
    %225 = vector.shape_cast %224 : vector<8x8xf32> to vector<8x8x1xf32>
    %226 = vector.broadcast %225 : vector<8x8x1xf32> to vector<8x8x8xf32>
    %227 = arith.mulf %2, %226 : vector<8x8x8xf32>
    %228 = arith.addf %220, %227 : vector<8x8x8xf32>
    %cst_81 = arith.constant 2.500000e-01 : f32
    %229 = vector.broadcast %cst_81 : f32 to vector<8x8x8xf32>
    %230 = arith.mulf %228, %229 : vector<8x8x8xf32>
    %cst_82 = arith.constant dense<0xFF800000> : vector<8x8xf32>
    %231 = vector.multi_reduction <maximumf>, %230, %cst_82 [2] : vector<8x8x8xf32> to vector<8x8xf32>
    %232 = vector.shape_cast %231 : vector<8x8xf32> to vector<8x8x1xf32>
    %233 = vector.broadcast %232 : vector<8x8x1xf32> to vector<8x8x8xf32>
    %234 = arith.subf %230, %233 : vector<8x8x8xf32>
    %235 = math.exp %234 : vector<8x8x8xf32>
    %236 = arith.mulf %235, %6 : vector<8x8x8xf32>
    %cst_83 = arith.constant dense<0.000000e+00> : vector<8x8xf32>
    %237 = vector.multi_reduction <add>, %236, %cst_83 [2] : vector<8x8x8xf32> to vector<8x8xf32>
    %238 = vector.shape_cast %237 : vector<8x8xf32> to vector<8x8x1xf32>
    %cst_84 = arith.constant 9.99999968E-21 : f32
    %239 = vector.broadcast %cst_84 : f32 to vector<8x8x1xf32>
    %240 = arith.maximumf %238, %239 : vector<8x8x1xf32>
    %241 = tpu.reciprocal %240 {approx = true} : vector<8x8x1xf32> -> vector<8x8x1xf32>
    %242 = vector.broadcast %241 : vector<8x8x1xf32> to vector<8x8x8xf32>
    %243 = arith.mulf %236, %242 : vector<8x8x8xf32>
    "tpu.trace_start"() <{level = 10 : i32, message = "bts,bsf->btf"}> : () -> ()
    %cst_85 = arith.constant dense<0.000000e+00> : vector<8x8x32xf32>
    %244 = tpu.matmul %243, %219, %cst_85 {dimension_numbers = #tpu.dot_dimension_numbers<[2], [1], [1], [2], [0, 0, 0, 1, 1, 2], [0], [0]>} : vector<8x8x8xf32>, vector<8x8x32xf32>, vector<8x8x32xf32> -> vector<8x8x32xf32>
    "tpu.trace_stop"() : () -> ()
    %245 = arith.mulf %243, %2 : vector<8x8x8xf32>
    %cst_86 = arith.constant dense<0.000000e+00> : vector<8x8xf32>
    %246 = vector.multi_reduction <add>, %245, %cst_86 [2] : vector<8x8x8xf32> to vector<8x8xf32>
    %247 = arith.addf %211, %244 : vector<8x8x32xf32>
    %248 = vector.shape_cast %246 : vector<8x8xf32> to vector<8x8x1xf32>
    %249 = vector.shape_cast %213 : vector<1x32xf32> to vector<1x1x32xf32>
    %250 = vector.broadcast %248 : vector<8x8x1xf32> to vector<8x8x32xf32>
    %251 = vector.broadcast %249 : vector<1x1x32xf32> to vector<8x8x32xf32>
    %252 = arith.mulf %250, %251 : vector<8x8x32xf32>
    %253 = arith.addf %247, %252 : vector<8x8x32xf32>
    %254 = arith.addf %253, %168 : vector<8x8x32xf32>
    %cst_87 = arith.constant 0.000000e+00 : f32
    %255 = vector.broadcast %cst_87 : f32 to vector<8x8x32xf32>
    %256 = arith.maximumf %254, %255 : vector<8x8x32xf32>
    %cst_88 = arith.constant dense<0.000000e+00> : vector<8x32xf32>
    %257 = vector.multi_reduction <add>, %256, %cst_88 [1] : vector<8x8x32xf32> to vector<8x32xf32>
    %cst_89 = arith.constant 1.250000e-01 : f32
    %258 = vector.broadcast %cst_89 : f32 to vector<8x32xf32>
    %259 = arith.mulf %257, %258 : vector<8x32xf32>
    %c0_90 = arith.constant 0 : index
    %c0_91 = arith.constant 0 : index
    %260 = vector.load %arg17[%c0_90, %c0_91] : memref<8x32xf32, #tpu.memory_space<vmem>>, vector<8x32xf32>
    tpu.vector_store %arg17[%c0_90, %c0_91], %259 {strides = array<i32>} : memref<8x32xf32, #tpu.memory_space<vmem>>, vector<8x32xf32>,
    return
  }
  func.func @transform_0(%arg0: i32) -> (i32, i32, i32) {
    %c0_i32 = arith.constant 0 : i32
    %c0_i32_0 = arith.constant 0 : i32
    %c0_i32_1 = arith.constant 0 : i32
    return %arg0, %c0_i32, %c0_i32_0 : i32, i32, i32
  }
  func.func @transform_1(%arg0: i32) -> (i32, i32, i32) {
    %c0_i32 = arith.constant 0 : i32
    %c0_i32_0 = arith.constant 0 : i32
    %c0_i32_1 = arith.constant 0 : i32
    return %arg0, %c0_i32, %c0_i32_0 : i32, i32, i32
  }
  func.func @transform_2(%arg0: i32) -> (i32, i32) {
    %c0_i32 = arith.constant 0 : i32
    %c0_i32_0 = arith.constant 0 : i32
    %c0_i32_1 = arith.constant 0 : i32
    return %c0_i32, %c0_i32_0 : i32, i32
  }
  func.func @transform_3(%arg0: i32) -> (i32, i32) {
    %c0_i32 = arith.constant 0 : i32
    %c0_i32_0 = arith.constant 0 : i32
    %c0_i32_1 = arith.constant 0 : i32
    return %c0_i32, %c0_i32_0 : i32, i32
  }
  func.func @transform_4(%arg0: i32) -> (i32, i32) {
    %c0_i32 = arith.constant 0 : i32
    %c0_i32_0 = arith.constant 0 : i32
    %c0_i32_1 = arith.constant 0 : i32
    return %c0_i32, %c0_i32_0 : i32, i32
  }
  func.func @transform_5(%arg0: i32) -> (i32, i32) {
    %c0_i32 = arith.constant 0 : i32
    %c0_i32_0 = arith.constant 0 : i32
    %c0_i32_1 = arith.constant 0 : i32
    return %c0_i32, %c0_i32_0 : i32, i32
  }
  func.func @transform_6(%arg0: i32) -> (i32, i32) {
    %c0_i32 = arith.constant 0 : i32
    %c0_i32_0 = arith.constant 0 : i32
    %c0_i32_1 = arith.constant 0 : i32
    return %c0_i32, %c0_i32_0 : i32, i32
  }
  func.func @transform_7(%arg0: i32) -> (i32, i32) {
    %c0_i32 = arith.constant 0 : i32
    %c0_i32_0 = arith.constant 0 : i32
    %c0_i32_1 = arith.constant 0 : i32
    return %c0_i32, %c0_i32_0 : i32, i32
  }
  func.func @transform_8(%arg0: i32) -> (i32, i32) {
    %c0_i32 = arith.constant 0 : i32
    %c0_i32_0 = arith.constant 0 : i32
    %c0_i32_1 = arith.constant 0 : i32
    return %c0_i32, %c0_i32_0 : i32, i32
  }
  func.func @transform_9(%arg0: i32) -> (i32, i32) {
    %c0_i32 = arith.constant 0 : i32
    %c0_i32_0 = arith.constant 0 : i32
    %c0_i32_1 = arith.constant 0 : i32
    return %c0_i32, %c0_i32_0 : i32, i32
  }
  func.func @transform_10(%arg0: i32) -> (i32, i32) {
    %c0_i32 = arith.constant 0 : i32
    %c0_i32_0 = arith.constant 0 : i32
    %c0_i32_1 = arith.constant 0 : i32
    return %c0_i32, %c0_i32_0 : i32, i32
  }
  func.func @transform_11(%arg0: i32) -> (i32, i32) {
    %c0_i32 = arith.constant 0 : i32
    %c0_i32_0 = arith.constant 0 : i32
    %c0_i32_1 = arith.constant 0 : i32
    return %c0_i32, %c0_i32_0 : i32, i32
  }
  func.func @transform_12(%arg0: i32) -> (i32, i32) {
    %c0_i32 = arith.constant 0 : i32
    %c0_i32_0 = arith.constant 0 : i32
    %c0_i32_1 = arith.constant 0 : i32
    return %c0_i32, %c0_i32_0 : i32, i32
  }
  func.func @transform_13(%arg0: i32) -> (i32, i32) {
    %c0_i32 = arith.constant 0 : i32
    %c0_i32_0 = arith.constant 0 : i32
    %c0_i32_1 = arith.constant 0 : i32
    return %c0_i32, %c0_i32_0 : i32, i32
  }
  func.func @transform_14(%arg0: i32) -> (i32, i32) {
    %c0_i32 = arith.constant 0 : i32
    %c0_i32_0 = arith.constant 0 : i32
    %c0_i32_1 = arith.constant 0 : i32
    return %c0_i32, %c0_i32_0 : i32, i32
  }
  func.func @transform_15(%arg0: i32) -> (i32, i32) {
    %c0_i32 = arith.constant 0 : i32
    %c0_i32_0 = arith.constant 0 : i32
    %c0_i32_1 = arith.constant 0 : i32
    return %c0_i32, %c0_i32_0 : i32, i32
  }
  func.func @transform_16(%arg0: i32) -> (i32, i32) {
    %c0_i32 = arith.constant 0 : i32
    %c0_i32_0 = arith.constant 0 : i32
    return %arg0, %c0_i32 : i32, i32
  }
}

</mosaic_0001>

<bundles_post_ra>
// kernel: tpu_custom_call.1
= control target key start
LH: loop header
LB: loop body
LE: loop exit
PB: predicated region body
PF: predicated region fallthrough
CT: control target
= control target key end

     0   :  { %s9383_s0 = inlined_call_operand.vmem [shape: f32[16,8,7], index: 0, kind: input, shape index: {}]   ;;  %s9384_s1 = inlined_call_operand.vmem [shape: f32[16,8,8], index: 1, kind: input, shape index: {}]   ;;  %s9385_s2 = inlined_call_operand.vmem [shape: f32[2,32], index: 2, kind: input, shape index: {}]   ;;  %s9386_s3 = inlined_call_operand.vmem [shape: f32[3,4], index: 3, kind: input, shape index: {}]   ;;  %s9387_s4 = inlined_call_operand.vmem [shape: f32[6,32], index: 4, kind: input, shape index: {}]   ;;  %s9388_s5 = inlined_call_operand.vmem [shape: f32[4,32], index: 5, kind: input, shape index: {}]   ;;  %s9389_s6 = inlined_call_operand.vmem [shape: f32[1,32], index: 6, kind: input, shape index: {}]   ;;  %s9390_s7 = inlined_call_operand.vmem [shape: f32[1,32], index: 7, kind: input, shape index: {}]   ;;  %s9391_s8 = inlined_call_operand.vmem [shape: f32[32,32], index: 8, kind: input, shape index: {}]   ;;  %s9392_s9 = inlined_call_operand.vmem [shape: f32[1,32], index: 9, kind: input, shape index: {}]   ;;  %s9393_s10 = inlined_call_operand.vmem [shape: f32[32,128], index: 10, kind: input, shape index: {}]   ;;  %s9394_s11 = inlined_call_operand.vmem [shape: f32[1,128], index: 11, kind: input, shape index: {}]   ;;  %s9395_s12 = inlined_call_operand.vmem [shape: f32[2,32], index: 12, kind: input, shape index: {}]   ;;  %s9396_s13 = inlined_call_operand.vmem [shape: f32[32,128], index: 13, kind: input, shape index: {}]   ;;  %s9397_s14 = inlined_call_operand.vmem [shape: f32[1,128], index: 14, kind: input, shape index: {}]   ;;  %s9398_s15 = inlined_call_operand.vmem [shape: f32[2,32], index: 15, kind: input, shape index: {}]   ;;  %s9399_s16 = inlined_call_operand.hbm [shape: f32[16,32], index: 16, kind: output, shape index: {}]  }
   0x1   :  { %9424 = sst [smem:[#allocation26_spill]] %s9383_s0 }
   0x2   :  { %9425 = sst [smem:[#allocation27_spill]] %s9384_s1 }
   0x3   :  { %9426 = sst [smem:[#allocation28_spill]] %s9385_s2 }
   0x4   :  { %9427 = sst [smem:[#allocation29_spill]] %s9386_s3 }
   0x5   :  { %9428 = sst [smem:[#allocation30_spill]] %s9387_s4 }
   0x6   :  { %21 = vsyncpa [#allocation3], 0 }
   0x7   :  { %23 = vsyncpa [#allocation3 + $0x1], 0  ;;  %s6945_s21 = smov 0   ;;  %s6947_s22 = smov 0  }
   0x8   :  { %s6949_s23 = smov 0   ;;  %s6951_s24 = smov 0  }
   0x9 LB: > { %s6095_s25 = sadd.s32 4294967295, %s6853_s24   ;;  %s6096_s26 = sadd.s32 4294967294, %s6853_s24   ;;  %s6853_s24 = sphi %s6951_s24, %s9522_s24   ;;  %s6849_s23 = sphi %s6949_s23, %s9521_s23   ;;  %s6845_s22 = sphi %s6947_s22, %s9520_s22   ;;  %s6841_s21 = sphi %s6945_s21, %s9519_s21  }
   0xa   : > { %s6968_s27 = sadd.s32 1, %s6853_s24   ;;  %s382_s28 = sadd.s32 1, %s6849_s23 }
   0xb   : > { %s379_s29 = ssub.s32 %s6853_s24, %s6968_s27  ;;  %p392_p0 = scmp.ne.s32.totalorder %s6849_s23, %s6845_s22 }
   0xc   : > { %p380_p1 = scmp.eq.s32.totalorder %s379_s29, 0  ;;  %p393_p2 = scmp.eq.s32.totalorder %s6095_s25, 1 }
   0xd   : > { %p398_p3 = scmp.ne.s32.totalorder %s6845_s22, %s6841_s21  ;;  %p399_p4 = scmp.eq.s32.totalorder %s6096_s26, 1 }
   0xe   : > { %s6978_s30 = scalar_select %p380_p1, %s6849_s23, %s382_s28  }
   0xf   : > { %p6980_p5 = por %p393_p2, %p392_p0  ;;  %p6984_p6 = por %p399_p4, %p398_p3 }
  0x10   : > { %9429 = sst [smem:[#allocation5_spill]] %s6978_s30  ;;  %p6099_p7 = scmp.ge.s32.totalorder %s6853_s24, 1 }
  0x11   : > { %p477_p8 = scmp.lt.s32.totalorder %s6853_s24, 3 }
  0x13   : > { %p478_p9 = pnand %p6099_p7, %p477_p8 }
  0x15   : > { %481 = sbr.rel (%p478_p9) target bundleno = 3765 (0xeb5), region = 84 }
  0x1a   : > { %s6990_s18 = sshll.u32 %s6095_s25, 3  ;;  %v6855_v0 = vmov 6   ;;  %s9432_s29 = sld [smem:[#allocation26_spill]]  ;;  %v584_v7 = vlaneseq  ;;  %vm693_vm0 = vcmask 1042432   ;;  %vm668_vm1 = vcmask 23552  }
  0x1b   : > { %6382 = vset.pattern.permute.xlu1 %v6855_v0  ;;  %6381 = vset.pattern.permute.xlu0 %v6855_v0  ;;  %p533_p10 = scmp.lt.s32.totalorder %s6990_s18, 15  ;;  %s9433_s1 = sld [smem:[#allocation27_spill]]  ;;  %v6856_v61 = vmov 0.0   ;;  %vm827_vm12 = vcmask 1045504   ;;  %vm810_vm13 = vcmask 48128   ;;  %vm765_vm14 = vcmask 1043456  }
  0x1c   : > { %6383 = vset.pattern.permute.xlu2 %v6855_v0  ;;  %v886_v10 = vshrl.u32 %v584_v7, 7  ;;  %s9434_s3 = sld [smem:[#allocation29_spill]]  ;;  %v585_v51 = vand.u32 127, %v584_v7  ;;  %s9419_s25 = smov 96  }
  0x1d   : > { %s534_s19 = scalar_select %p533_p10, %s6990_s18, 15 }
  0x1e   : > { %v7086_v54 = vcvt.s32.f32 %v585_v51  ;;  %s9436_s4 = sld [smem:[#allocation30_spill]]  ;;  %s9417_s28 = smov 64  }
  0x1f   : > { %s6102_s20 = sshll.u32 %s534_s19, 3  ;;  %s9462_s2 = sld [smem:[#allocation28_spill]] }
  0x20   : > { %s536_s30 = scalar_lea.vmem %s9432_s29, %s6102_s20  ;;  %s9514_s19 = smov 96  }
  0x21   : > { %v6997_v1 = vld [vmem:[%s536_s30 + $0x10] sm:$0xff]  ;;  %v7000_v2 = vld [vmem:[%s536_s30] sm:$0xff]  ;;  %v7006_v4 = vld [vmem:[%s536_s30 + $0x18] sm:$0xff]  ;;  %s7024_s26 = scalar_lea.vmem %s9433_s1, %s6102_s20  ;;  %s9515_s29 = smov 64  }
  0x22   : > { %599 = vperm.xlu1 %6382, %v6997_v1   ;;  %589 = vperm.xlu0 %6381, %v7000_v2   ;;  %v7003_v3 = vld [vmem:[%s536_s30 + $0x20] sm:$0xff]  ;;  %v7009_v5 = vld [vmem:[%s536_s30 + $0x8] sm:$0xff]  ;;  %v7015_v8 = vld [vmem:[%s536_s30 + $0x38] sm:$0xff] }
  0x23   : > { %609 = vperm.xlu2 %6383, %v7003_v3   ;;  %v7011_v6 = vld [vmem:[%s536_s30 + $0x28] sm:$0xff]  ;;  %v7018_v9 = vld [vmem:[%s536_s30 + $0x30] sm:$0xff]  ;;  %v7032_v13 = vld [vmem:[%s7024_s26 + $0x18] sm:$0xff]  ;;  %s9421_s30 = smov 32  }
  0x24   : > { %v7028_v11 = vld [vmem:[%s7024_s26 + $0x10] sm:$0xff]  ;;  %v1052_v14 = vperm.slane %v7032_v13, 0  ;;  %v1059_v16 = vperm.slane %v7032_v13, 1  ;;  %v1066_v17 = vperm.slane %v7032_v13, 2  ;;  %v1080_v18 = vperm.slane %v7032_v13, 4  ;;  %v7044_v23 = vld [vmem:[%s7024_s26 + $0x20] sm:$0xff] }
  0x25   : > { %v1038_v12 = vperm.slane %v7028_v11, 6  ;;  %v1045_v15 = vperm.slane %v7028_v11, 7  ;;  %v1073_v19 = vperm.slane %v7032_v13, 3  ;;  %v1087_v20 = vperm.slane %v7032_v13, 5  ;;  %v7053_v30 = vld [vmem:[%s7024_s26 + $0x28] sm:$0xff]  ;;  %v7062_v37 = vld [vmem:[%s7024_s26] sm:$0xff] }
  0x26   : > { %v1101_v21 = vperm.slane %v7032_v13, 7  ;;  %v1094_v22 = vperm.slane %v7032_v13, 6  ;;  %v1108_v24 = vperm.slane %v7044_v23, 0  ;;  %v1122_v25 = vperm.slane %v7044_v23, 2  ;;  %v667_v41 = vld [vmem:[%s9434_s3] sm:$0x7] }
  0x27   : > { %v1115_v26 = vperm.slane %v7044_v23, 1  ;;  %v1129_v27 = vperm.slane %v7044_v23, 3  ;;  %v1143_v28 = vperm.slane %v7044_v23, 5  ;;  %v1136_v29 = vperm.slane %v7044_v23, 4  ;;  %6121 = vmatpush.msk.msra.mxu0 %vm693_vm0, %v667_v41  ;;  %6328 = vmatpush.msk.msra.mxu1 %vm693_vm0, %v667_v41  ;;  %v7075_v46 = vld [vmem:[%s7024_s26 + $0x30] sm:$0xff]  ;;  %v7080_v49 = vld [vmem:[%s7024_s26 + $0x8] sm:$0xff] }
  0x28   : > { %v1150_v31 = vperm.slane %v7044_v23, 6  ;;  %v1164_v32 = vperm.slane %v7053_v30, 0  ;;  %v1157_v33 = vperm.slane %v7044_v23, 7  ;;  %v1171_v34 = vperm.slane %v7053_v30, 1 }
  0x29   : > { %v1185_v35 = vperm.slane %v7053_v30, 3  ;;  %v1178_v36 = vperm.slane %v7053_v30, 2  ;;  %v1192_v38 = vperm.slane %v7053_v30, 4  ;;  %v884_v39 = vperm.slane %v7062_v37, 0 }
  0x2a   : > { %604 = vperm.xlu1 %6382, %v7006_v4   ;;  %594 = vperm.xlu0 %6381, %v7009_v5   ;;  %v1199_v40 = vperm.slane %v7053_v30, 5  ;;  %v1206_v42 = vperm.slane %v7053_v30, 6  ;;  %v1213_v43 = vperm.slane %v7053_v30, 7  ;;  %v891_v44 = vperm.slane %v7062_v37, 1 }
  0x2b   : > { %614 = vperm.xlu2 %6383, %v7011_v6   ;;  %v898_v45 = vperm.slane %v7062_v37, 2  ;;  %v905_v47 = vperm.slane %v7062_v37, 3  ;;  %v1220_v48 = vperm.slane %v7075_v46, 0  ;;  %v1227_v50 = vperm.slane %v7075_v46, 1 }
  0x2c   : > { %v975_v52 = vperm.slane %v7080_v49, 5  ;;  %v912_v53 = vperm.slane %v7062_v37, 4  ;;  %v1234_v55 = vperm.slane %v7075_v46, 2  ;;  %v982_v58 = vperm.slane %v7080_v49, 6 }
  0x2d   : > { %v919_v60 = vperm.slane %v7062_v37, 5  ;;  %v1241_v63 = vperm.slane %v7075_v46, 3  ;;  %vm560_vm10 = vcmp.ne.f32.partialorder %v7062_v37, 0.0  ;;  %vm561_vm11 = vcmp.ne.f32.partialorder %v7080_v49, 0.0 }
  0x2e   : > { %vm562_vm15 = vcmp.ne.f32.partialorder %v7028_v11, 0.0  ;;  %vm563_vm0 = vcmp.ne.f32.partialorder %v7032_v13, 0.0 }
  0x32   : > { %624 = vperm.xlu1 %6382, %v7015_v8   ;;  %619 = vperm.xlu0 %6381, %v7018_v9  }
  0x33   : > { %6384 = vset.pattern.permute.xlu2 %v886_v10 }
  0x3a   : > { %6386 = vset.pattern.permute.xlu1 %v886_v10  ;;  %6385 = vset.pattern.permute.xlu0 %v886_v10 }
  0x3b   : > { %1043 = vperm.xlu2 %6384, %v1038_v12  }
  0x42   : > { %1057 = vperm.xlu1 %6386, %v1052_v14   ;;  %1050 = vperm.xlu0 %6385, %v1045_v15   ;;  %v989_v14 = vperm.slane %v7080_v49, 7 }
  0x43   : > { %1064 = vperm.xlu2 %6384, %v1059_v16   ;;  %v926_v16 = vperm.slane %v7062_v37, 6 }
  0x4a   : > { %1071 = vperm.xlu1 %6386, %v1066_v17   ;;  %1085 = vperm.xlu0 %6385, %v1080_v18  }
  0x4b   : > { %1078 = vperm.xlu2 %6384, %v1073_v19   ;;  %v1248_v19 = vperm.slane %v7075_v46, 4 }
  0x52   : > { %1092 = vperm.xlu1 %6386, %v1087_v20   ;;  %1106 = vperm.xlu0 %6385, %v1101_v21   ;;  %v996_v21 = vperm.slane %v7028_v11, 0 }
  0x53   : > { %1099 = vperm.xlu2 %6384, %v1094_v22  }
  0x5a   : > { %1113 = vperm.xlu1 %6386, %v1108_v24   ;;  %1127 = vperm.xlu0 %6385, %v1122_v25   ;;  %v933_v24 = vperm.slane %v7062_v37, 7 }
  0x5b   : > { %1120 = vperm.xlu2 %6384, %v1115_v26  }
  0x62   : > { %1134 = vperm.xlu1 %6386, %v1129_v27   ;;  %1148 = vperm.xlu0 %6385, %v1143_v28   ;;  %v1255_v28 = vperm.slane %v7075_v46, 5 }
  0x63   : > { %1141 = vperm.xlu2 %6384, %v1136_v29  }
  0x6a   : > { %1155 = vperm.xlu1 %6386, %v1150_v31   ;;  %1169 = vperm.xlu0 %6385, %v1164_v32   ;;  %v1003_v31 = vperm.slane %v7028_v11, 1  ;;  %v940_v32 = vperm.slane %v7080_v49, 0 }
  0x6b   : > { %1162 = vperm.xlu2 %6384, %v1157_v33  }
  0x72   : > { %1176 = vperm.xlu1 %6386, %v1171_v34   ;;  %1190 = vperm.xlu0 %6385, %v1185_v35   ;;  %v1262_v35 = vperm.slane %v7075_v46, 6 }
  0x73   : > { %1183 = vperm.xlu2 %6384, %v1178_v36  }
  0x7a   : > { %1197 = vperm.xlu1 %6386, %v1192_v38   ;;  %889 = vperm.xlu0 %6385, %v884_v39   ;;  %v1010_v39 = vperm.slane %v7028_v11, 2 }
  0x7b   : > { %1204 = vperm.xlu2 %6384, %v1199_v40   ;;  %v947_v40 = vperm.slane %v7080_v49, 1 }
  0x7d   : > { %v610_v26 = vpop.permute.xlu2 %609 }
  0x7e   : > { %v631_v29 = vsub.f32 %v610_v26, %v7086_v54 }
  0x80   : > { %v639_v33 = vand.u32 2147483647, %v631_v29 }
  0x82   : > { %1211 = vperm.xlu1 %6386, %v1206_v42   ;;  %1218 = vperm.xlu0 %6385, %v1213_v43   ;;  %vm647_vm6 = vcmp.lt.f32.partialorder %v639_v33, 0.5  ;;  %v1269_v43 = vperm.slane %v7075_v46, 7  ;;  %v739_v33 = vld [vmem:[%s9388_s5] sm:$0xf] }
  0x83   : > { %896 = vperm.xlu2 %6384, %v891_v44   ;;  %v6117_v41 = vsel %vm647_vm6, 1.0, %v6856_v61  ;;  %6130 = vmatpush.msk.msrb.mxu1 %vm765_vm14, %v739_v33  ;;  %vm1536_vm6 = vcmask 261120   ;;  %vm3453_vm14 = vcmask 64512  }
  0x85   : > { %v615_v36 = vpop.permute.xlu2 %614 }
  0x86   : > { %v632_v38 = vsub.f32 %v615_v36, %v7086_v54 }
  0x88   : > { %v640_v42 = vand.u32 2147483647, %v632_v38 }
  0x8a   : > { %903 = vperm.xlu1 %6386, %v898_v45   ;;  %910 = vperm.xlu0 %6385, %v905_v47   ;;  %vm648_vm7 = vcmp.lt.f32.partialorder %v640_v42, 0.5  ;;  %v1017_v45 = vperm.slane %v7028_v11, 3 }
  0x8b   : > { %1225 = vperm.xlu2 %6384, %v1220_v48   ;;  %v954_v48 = vperm.slane %v7080_v49, 2  ;;  %v6118_v51 = vsel %vm648_vm7, 1.0, %v6856_v61  ;;  %vm3034_vm7 = vcmask 1041409  }
  0x92   : > { %1232 = vperm.xlu1 %6386, %v1227_v50   ;;  %980 = vperm.xlu0 %6385, %v975_v52   ;;  %v7124_v50 = vld [vmem:[%s7024_s26 + $0x38] sm:$0xff] }
  0x93   : > { %917 = vperm.xlu2 %6384, %v912_v53   ;;  %v1276_v53 = vperm.slane %v7124_v50, 0 }
  0x94   : > { %v590_v56 = vpop.permute.xlu0 %589  ;;  %v600_v0 = vpop.permute.xlu1 %599 }
  0x95   : > { %v627_v57 = vsub.f32 %v590_v56, %v7086_v54  ;;  %v629_v10 = vsub.f32 %v600_v0, %v7086_v54  ;;  %v1024_v56 = vperm.slane %v7028_v11, 4  ;;  %v968_v0 = vperm.slane %v7080_v49, 4 }
  0x97   : > { %v635_v59 = vand.u32 2147483647, %v627_v57  ;;  %v637_v17 = vand.u32 2147483647, %v629_v10  ;;  %v1304_v10 = vperm.slane %v7124_v50, 4 }
  0x99   : > { %vm643_vm2 = vcmp.lt.f32.partialorder %v635_v59, 0.5  ;;  %vm645_vm4 = vcmp.lt.f32.partialorder %v637_v17, 0.5  ;;  %v1318_v17 = vperm.slane %v7124_v50, 6 }
  0x9a   : > { %1239 = vperm.xlu1 %6386, %v1234_v55   ;;  %v6113_v62 = vsel %vm643_vm2, 1.0, %v6856_v61  ;;  %987 = vperm.xlu0 %6385, %v982_v58   ;;  %v6115_v25 = vsel %vm645_vm4, 1.0, %v6856_v61  ;;  %v961_v58 = vperm.slane %v7080_v49, 3  ;;  %vm565_vm2 = vcmp.ne.f32.partialorder %v7053_v30, 0.0 }
  0x9b   : > { %6122 = vmatmul.msk.f32.vlgmr.msra.gmra.mxu0 %vm668_vm1, %v6113_v62  ;;  %924 = vperm.xlu2 %6384, %v919_v60   ;;  %v1283_v62 = vperm.slane %v7124_v50, 1  ;;  %vm566_vm4 = vcmp.ne.f32.partialorder %v7075_v46, 0.0 }
  0x9c   : > { %v595_v7 = vpop.permute.xlu0 %594  ;;  %v605_v20 = vpop.permute.xlu1 %604 }
  0x9d   : > { %v628_v12 = vsub.f32 %v595_v7, %v7086_v54  ;;  %v630_v22 = vsub.f32 %v605_v20, %v7086_v54  ;;  %v1290_v7 = vperm.slane %v7124_v50, 2 }
  0x9f   : > { %v636_v15 = vand.u32 2147483647, %v628_v12  ;;  %v638_v27 = vand.u32 2147483647, %v630_v22  ;;  %v1297_v12 = vperm.slane %v7124_v50, 3 }
  0xa1   : > { %vm644_vm3 = vcmp.lt.f32.partialorder %v636_v15, 0.5  ;;  %vm646_vm5 = vcmp.lt.f32.partialorder %v638_v27, 0.5  ;;  %v7145_v15 = vsel %vm560_vm10, 1.0, %v6856_v61  ;;  %vm3040_vm10 = vcmask 1044484  }
  0xa2   : > { %1246 = vperm.xlu1 %6386, %v1241_v63   ;;  %v6114_v18 = vsel %vm644_vm3, 1.0, %v6856_v61  ;;  %994 = vperm.xlu0 %6385, %v989_v14   ;;  %v6116_v34 = vsel %vm646_vm5, 1.0, %v6856_v61  ;;  %v1031_v63 = vperm.slane %v7028_v11, 5  ;;  %v1311_v14 = vperm.slane %v7124_v50, 5  ;;  %9435 = vst [vmem:[#allocation6_spill] sm:$0xff] %v7145_v15 }
  0xa3   : > { %6123 = vmatmul.msk.f32.vlgmr.msra.gmra.mxu1 %vm668_vm1, %v6114_v18  ;;  %931 = vperm.xlu2 %6384, %v926_v16   ;;  %v1325_v16 = vperm.slane %v7124_v50, 7  ;;  %v2002_v18 = vperm.slane %v7145_v15, 0  ;;  %v2030_v20 = vperm.slane %v7145_v15, 4  ;;  %v2037_v37 = vperm.slane %v7145_v15, 5 }
  0xa4   : > { %v620_v44 = vpop.permute.xlu0 %619  ;;  %v625_v55 = vpop.permute.xlu1 %624  ;;  %v2016_v22 = vperm.slane %v7145_v15, 2  ;;  %v2051_v29 = vperm.slane %v7145_v15, 7  ;;  %vm740_vm3 = vcmask 31744   ;;  %vm567_vm5 = vcmp.ne.f32.partialorder %v7124_v50, 0.0 }
  0xa5   : > { %v633_v47 = vsub.f32 %v620_v44, %v7086_v54  ;;  %v634_v57 = vsub.f32 %v625_v55, %v7086_v54  ;;  %v6397_v26 = vpack.i.bf16 %v2037_v37, %v2030_v20 }
  0xa7   : > { %v641_v52 = vand.u32 2147483647, %v633_v47  ;;  %v642_v60 = vand.u32 2147483647, %v634_v57 }
  0xa9   : > { %vm649_vm8 = vcmp.lt.f32.partialorder %v641_v52, 0.5  ;;  %vm650_vm9 = vcmp.lt.f32.partialorder %v642_v60, 0.5 }
  0xaa   : > { %1253 = vperm.xlu1 %6386, %v1248_v19   ;;  %1001 = vperm.xlu0 %6385, %v996_v21   ;;  %v6119_v59 = vsel %vm649_vm8, 1.0, %v6856_v61  ;;  %v6120_v54 = vsel %vm650_vm9, 1.0, %v6856_v61  ;;  %v2009_v19 = vperm.slane %v7145_v15, 1  ;;  %vm3036_vm8 = vcmask 1042434  }
  0xab   : > { %6124 = vmatmul.msk.f32.gmra.mxu1 %vm668_vm1, %v6115_v25  ;;  %938 = vperm.xlu2 %6384, %v933_v24   ;;  %v2023_v24 = vperm.slane %v7145_v15, 3  ;;  %v738_v25 = vld [vmem:[%s9436_s4] sm:$0x3f]  ;;  %vm3038_vm9 = vcmask 1043459  }
  0xac   : > { %v6387_v21 = vpack.i.bf16 %v2009_v19, %v2002_v18  ;;  %6139 = vmatpush.msk.msra.mxu2 %vm827_vm12, %v738_v25  ;;  %vm3044_vm12 = vcmask 1046534  }
  0xad   : > { %v6392_v27 = vpack.i.bf16 %v2023_v24, %v2016_v22  ;;  %6140 = vmatmul.msk.f32.vlgmr.msra.gmra.mxu2 %vm810_vm13, %v7000_v2  ;;  %v7221_v24 = vsel %vm565_vm2, 1.0, %v6856_v61 }
  0xae   : > { %9441 = vst [vmem:[#allocation11_spill] sm:$0xff] %v7221_v24  ;;  %v2282_v25 = vperm.slane %v7221_v24, 0  ;;  %v2303_v33 = vperm.slane %v7221_v24, 3 }
  0xb2   : > { %1260 = vperm.xlu1 %6386, %v1255_v28   ;;  %1008 = vperm.xlu0 %6385, %v1003_v31   ;;  %v2044_v28 = vperm.slane %v7145_v15, 6  ;;  %v7162_v31 = vsel %vm561_vm11, 1.0, %v6856_v61  ;;  %vm3042_vm11 = vcmask 1045509  }
  0xb3   : > { %6125 = vmatmul.msk.f32.gmra.mxu1 %vm668_vm1, %v6116_v34  ;;  %945 = vperm.xlu2 %6384, %v940_v32   ;;  %9437 = vst [vmem:[#allocation7_spill] sm:$0xff] %v7162_v31  ;;  %v2072_v49 = vperm.slane %v7162_v31, 2  ;;  %v2079_v32 = vperm.slane %v7162_v31, 3  ;;  %v2065_v36 = vperm.slane %v7162_v31, 1  ;;  %v2100_v44 = vperm.slane %v7162_v31, 6 }
  0xb4   : > { %v6402_v34 = vpack.i.bf16 %v2051_v29, %v2044_v28 }
  0xb5   : > { %v6412_v2 = vpack.i.bf16 %v2079_v32, %v2072_v49  ;;  %6141 = vmatmul.msk.f32.gmra.mxu2 %vm810_vm13, %v7009_v5  ;;  %v2296_v32 = vperm.slane %v7221_v24, 2 }
  0xba   : > { %1267 = vperm.xlu1 %6386, %v1262_v35   ;;  %1015 = vperm.xlu0 %6385, %v1010_v39   ;;  %v2058_v35 = vperm.slane %v7162_v31, 0  ;;  %v2086_v39 = vperm.slane %v7162_v31, 4 }
  0xbb   : > { %6126 = vmatmul.msk.f32.gmra.mxu1 %vm668_vm1, %v6117_v41  ;;  %952 = vperm.xlu2 %6384, %v947_v40   ;;  %v2093_v40 = vperm.slane %v7162_v31, 5  ;;  %v7177_v41 = vsel %vm562_vm15, 1.0, %v6856_v61 }
  0xbc   : > { %v6407_v38 = vpack.i.bf16 %v2065_v36, %v2058_v35  ;;  %9438 = vst [vmem:[#allocation8_spill] sm:$0xff] %v7177_v41  ;;  %v2114_v42 = vperm.slane %v7177_v41, 0  ;;  %v2135_v52 = vperm.slane %v7177_v41, 3  ;;  %v2156_v5 = vperm.slane %v7177_v41, 6 }
  0xbd   : > { %v6417_v11 = vpack.i.bf16 %v2093_v40, %v2086_v39  ;;  %6142 = vmatmul.msk.f32.gmra.mxu2 %vm810_vm13, %v6997_v1  ;;  %v2149_v57 = vperm.slane %v7177_v41, 5  ;;  %v2331_v35 = vperm.slane %v7221_v24, 7  ;;  %v6492_v36 = vpack.i.bf16 %v2303_v33, %v2296_v32 }
  0xbe   : > { %v7240_v39 = vsel %vm566_vm4, 1.0, %v6856_v61 }
  0xbf   : > { %9442 = vst [vmem:[#allocation12_spill] sm:$0xff] %v7240_v39  ;;  %v2345_v46 = vperm.slane %v7240_v39, 1 }
  0xc2   : > { %1274 = vperm.xlu1 %6386, %v1269_v43   ;;  %1022 = vperm.xlu0 %6385, %v1017_v45   ;;  %v2121_v43 = vperm.slane %v7177_v41, 1  ;;  %v2107_v45 = vperm.slane %v7162_v31, 7 }
  0xc3   : > { %6127 = vmatmul.msk.f32.gmra.mxu1 %vm668_vm1, %v6118_v51  ;;  %959 = vperm.xlu2 %6384, %v954_v48   ;;  %v2128_v51 = vperm.slane %v7177_v41, 2 }
  0xc4   : > { %v6427_v47 = vpack.i.bf16 %v2121_v43, %v2114_v42  ;;  %v6422_v48 = vpack.i.bf16 %v2107_v45, %v2100_v44  ;;  %v2338_v42 = vperm.slane %v7240_v39, 0  ;;  %v2373_v44 = vperm.slane %v7240_v39, 5 }
  0xc5   : > { %v6432_v55 = vpack.i.bf16 %v2135_v52, %v2128_v51  ;;  %6143 = vmatmul.msk.f32.gmra.mxu2 %vm810_vm13, %v7006_v4 }
  0xc6   : > { %v6507_v45 = vpack.i.bf16 %v2345_v46, %v2338_v42  ;;  %v1529_v42 = vld [vmem:[%s9391_s8 + $0x8] sm:$0xff] }
  0xca   : > { %1281 = vperm.xlu1 %6386, %v1276_v53   ;;  %1029 = vperm.xlu0 %6385, %v1024_v56   ;;  %v2163_v53 = vperm.slane %v7177_v41, 7  ;;  %v2142_v56 = vperm.slane %v7177_v41, 4 }
  0xcb   : > { %6128 = vmatmul.msk.f32.gmra.mxu1 %vm668_vm1, %v6119_v59  ;;  %966 = vperm.xlu2 %6384, %v961_v58   ;;  %v7195_v58 = vsel %vm563_vm0, 1.0, %v6856_v61 }
  0xcc   : > { %9439 = vst [vmem:[#allocation9_spill] sm:$0xff] %v7195_v58  ;;  %v6442_v59 = vpack.i.bf16 %v2163_v53, %v2156_v5  ;;  %v6437_v60 = vpack.i.bf16 %v2149_v57, %v2142_v56  ;;  %v2170_v1 = vperm.slane %v7195_v58, 0  ;;  %v2177_v13 = vperm.slane %v7195_v58, 1 }
  0xcd   : > { %v2219_v4 = vperm.slane %v7195_v58, 7  ;;  %6144 = vmatmul.msk.f32.gmra.mxu2 %vm810_vm13, %v7003_v3  ;;  %v2387_v5 = vperm.slane %v7240_v39, 7  ;;  %v7255_v53 = vsel %vm567_vm5, 1.0, %v6856_v61 }
  0xce   : > { %9443 = vst [vmem:[#allocation13_spill] sm:$0xff] %v7255_v53  ;;  %v2408_v57 = vperm.slane %v7255_v53, 2  ;;  %v2415_v50 = vperm.slane %v7255_v53, 3 }
  0xd2   : > { %1288 = vperm.xlu1 %6386, %v1283_v62   ;;  %1036 = vperm.xlu0 %6385, %v1031_v63   ;;  %v2198_v62 = vperm.slane %v7195_v58, 4  ;;  %v2205_v63 = vperm.slane %v7195_v58, 5 }
  0xd3   : > { %6129 = vmatmul.msk.f32.gmra.mxu1 %vm668_vm1, %v6120_v54  ;;  %973 = vperm.xlu2 %6384, %v968_v0   ;;  %v6447_v0 = vpack.i.bf16 %v2177_v13, %v2170_v1  ;;  %v2184_v54 = vperm.slane %v7195_v58, 2  ;;  %vm564_vm1 = vcmp.ne.f32.partialorder %v7044_v23, 0.0  ;;  %v2401_v1 = vperm.slane %v7255_v53, 1 }
  0xd4   : > { %v6532_v13 = vpack.i.bf16 %v2415_v50, %v2408_v57 }
  0xd5   : > { %6145 = vmatmul.msk.f32.gmra.mxu2 %vm810_vm13, %v7011_v6 }
  0xda   : > { %1295 = vperm.xlu1 %6386, %v1290_v7   ;;  %1309 = vperm.xlu0 %6385, %v1304_v10   ;;  %v2191_v7 = vperm.slane %v7195_v58, 3  ;;  %v6457_v10 = vpack.i.bf16 %v2205_v63, %v2198_v62  ;;  %v2422_v62 = vperm.slane %v7255_v53, 4  ;;  %v2429_v63 = vperm.slane %v7255_v53, 5 }
  0xdb   : > { %1302 = vperm.xlu2 %6384, %v1297_v12  }
  0xdc   : > { %v6452_v12 = vpack.i.bf16 %v2191_v7, %v2184_v54  ;;  %v6537_v7 = vpack.i.bf16 %v2429_v63, %v2422_v62 }
  0xdd   : > { %6146 = vmatmul.msk.f32.gmra.mxu2 %vm810_vm13, %v7018_v9 }
  0xe2   : > { %1316 = vperm.xlu1 %6386, %v1311_v14   ;;  %1330 = vperm.xlu0 %6385, %v1325_v16   ;;  %v2212_v14 = vperm.slane %v7195_v58, 6  ;;  %v7209_v16 = vsel %vm564_vm1, 1.0, %v6856_v61 }
  0xe3   : > { %1323 = vperm.xlu2 %6384, %v1318_v17   ;;  %9440 = vst [vmem:[#allocation10_spill] sm:$0xff] %v7209_v16  ;;  %v2240_v17 = vperm.slane %v7209_v16, 2  ;;  %v2247_v18 = vperm.slane %v7209_v16, 3  ;;  %v2226_v19 = vperm.slane %v7209_v16, 0  ;;  %v2233_v20 = vperm.slane %v7209_v16, 1 }
  0xe4   : > { %v6462_v23 = vpack.i.bf16 %v2219_v4, %v2212_v14  ;;  %v2254_v22 = vperm.slane %v7209_v16, 4  ;;  %v2261_v3 = vperm.slane %v7209_v16, 5  ;;  %v2275_v28 = vperm.slane %v7209_v16, 7  ;;  %v7271_v14 = vpop.permute.xlu2 %1043 }
  0xe5   : > { %v6472_v37 = vpack.i.bf16 %v2247_v18, %v2240_v17  ;;  %6147 = vmatmul.msk.f32.gmra.mxu2 %vm810_vm13, %v7015_v8  ;;  %v2380_v8 = vperm.slane %v7240_v39, 6  ;;  %v7274_v18 = vpop.permute.xlu1 %1057  ;;  %vm3046_vm13 = vcmask 1047559  }
  0xe6   : > { %v6477_v30 = vpack.i.bf16 %v2261_v3, %v2254_v22 }
  0xea   : > { %6388 = vperm.xlu1 %6386, %v6387_v21   ;;  %6398 = vperm.xlu0 %6385, %v6397_v26   ;;  %v6467_v21 = vpack.i.bf16 %v2233_v20, %v2226_v19  ;;  %v2289_v26 = vperm.slane %v7221_v24, 1 }
  0xeb   : > { %6393 = vperm.xlu2 %6384, %v6392_v27   ;;  %v2268_v27 = vperm.slane %v7209_v16, 6 }
  0xec   : > { %v6487_v29 = vpack.i.bf16 %v2289_v26, %v2282_v25  ;;  %v7278_v19 = vpop.permute.xlu2 %1064 }
  0xed   : > { %v6482_v49 = vpack.i.bf16 %v2275_v28, %v2268_v27 }
  0xf2   : > { %6403 = vperm.xlu1 %6386, %v6402_v34   ;;  %6413 = vperm.xlu0 %6385, %v6412_v2   ;;  %v2324_v34 = vperm.slane %v7221_v24, 6  ;;  %v2310_v2 = vperm.slane %v7221_v24, 4 }
  0xf3   : > { %6408 = vperm.xlu2 %6384, %v6407_v38   ;;  %v2317_v38 = vperm.slane %v7221_v24, 5 }
  0xf4   : > { %v6502_v9 = vpack.i.bf16 %v2331_v35, %v2324_v34  ;;  %v7286_v3 = vpop.permute.xlu2 %1078 }
  0xf5   : > { %v6497_v40 = vpack.i.bf16 %v2317_v38, %v2310_v2  ;;  %v1531_v38 = vld [vmem:[%s9391_s8 + $0x18] sm:$0xff] }
  0xf6   : > { %1741 = vmatpush.msrb.mxu0 %v1531_v38  ;;  %6329 = vmatpush.msrb.mxu2 %v1531_v38 }
  0xf7   : > { %6330 = vmatpush.msra.mxu3 %v1531_v38 }
  0xfa   : > { %6418 = vperm.xlu1 %6386, %v6417_v11   ;;  %6428 = vperm.xlu0 %6385, %v6427_v47   ;;  %v2366_v11 = vperm.slane %v7240_v39, 4  ;;  %v2352_v47 = vperm.slane %v7240_v39, 2 }
  0xfb   : > { %6423 = vperm.xlu2 %6384, %v6422_v48   ;;  %v2359_v48 = vperm.slane %v7240_v39, 3 }
  0xfc   : > { %v6517_v51 = vpack.i.bf16 %v2373_v44, %v2366_v11  ;;  %v7293_v27 = vpop.permute.xlu2 %1099 }
  0xfd   : > { %v6512_v52 = vpack.i.bf16 %v2359_v48, %v2352_v47 }
 0x102   : > { %6433 = vperm.xlu1 %6386, %v6432_v55   ;;  %6443 = vperm.xlu0 %6385, %v6442_v59   ;;  %v7257_v55 = vpop.permute.xlu0 %1050  ;;  %v6522_v59 = vpack.i.bf16 %v2387_v5, %v2380_v8  ;;  %v7338_v8 = vld [vmem:[%s9389_s6] ss:$0 sm:$0xff] }
 0x103   : > { %6438 = vperm.xlu2 %6384, %v6437_v60   ;;  %v2394_v60 = vperm.slane %v7255_v53, 0 }
 0x105   : > { %v6527_v61 = vpack.i.bf16 %v2401_v1, %v2394_v60 }
 0x10a   : > { %6448 = vperm.xlu1 %6386, %v6447_v0   ;;  %6458 = vperm.xlu0 %6385, %v6457_v10   ;;  %v7267_v54 = vpop.permute.xlu0 %1085  ;;  %v2436_v10 = vperm.slane %v7255_v53, 6 }
 0x10b   : > { %6453 = vperm.xlu2 %6384, %v6452_v12   ;;  %v2443_v12 = vperm.slane %v7255_v53, 7 }
 0x10d   : > { %v6542_v4 = vpack.i.bf16 %v2443_v12, %v2436_v10 }
 0x112   : > { %6463 = vperm.xlu1 %6386, %v6462_v23   ;;  %6473 = vperm.xlu0 %6385, %v6472_v37   ;;  %v7276_v23 = vpop.permute.xlu0 %1106  ;;  %v7281_v37 = vpop.permute.xlu1 %1071 }
 0x113   : > { %6468 = vperm.xlu2 %6384, %v6467_v21  }
 0x118   : > { %v714_v6 = vpop.f32.mrf.mxu0 }
 0x119   : > { %6131 = vmatmul.msk.f32.vlgmr.msrb.gmra.mxu1 %vm740_vm3, %v714_v6 }
 0x11a   : > { %6478 = vperm.xlu1 %6386, %v6477_v30   ;;  %6488 = vperm.xlu0 %6385, %v6487_v29   ;;  %v7283_v21 = vpop.permute.xlu0 %1127  ;;  %v7288_v25 = vpop.permute.xlu1 %1092 }
 0x11b   : > { %6483 = vperm.xlu2 %6384, %v6482_v49   ;;  %v7299_v49 = vpop.permute.xlu2 %1120 }
 0x120   : > { %v717_v43 = vpop.f32.mrf.mxu1 }
 0x121   : > { %6132 = vmatmul.msk.f32.gmra.mxu1 %vm740_vm3, %v717_v43  ;;  %v1528_v43 = vld [vmem:[%s9391_s8] sm:$0xff] }
 0x122   : > { %6493 = vperm.xlu1 %6386, %v6492_v36   ;;  %6503 = vperm.xlu0 %6385, %v6502_v9   ;;  %v7290_v26 = vpop.permute.xlu0 %1148  ;;  %v7295_v28 = vpop.permute.xlu1 %1113 }
 0x123   : > { %6498 = vperm.xlu2 %6384, %v6497_v40   ;;  %v7305_v6 = vpop.permute.xlu2 %1141  ;;  %v1530_v40 = vld [vmem:[%s9391_s8 + $0x10] sm:$0xff] }
 0x124   : > { %1742 = vmatpush.msrb.mxu0 %v1530_v40  ;;  %6331 = vmatpush.msrb.mxu2 %v1530_v40 }
 0x125   : > { %6332 = vmatpush.msra.mxu3 %v1530_v40 }
 0x126   : > { %1743 = vmatpush.msrb.mxu0 %v1529_v42  ;;  %6333 = vmatpush.msrb.mxu2 %v1529_v42 }
 0x127   : > { %6334 = vmatpush.msra.mxu3 %v1529_v42 }
 0x128   : > { %v720_v56 = vpop.f32.mrf.mxu1  ;;  %1744 = vmatpush.msrb.mxu0 %v1528_v43  ;;  %6335 = vmatpush.msrb.mxu2 %v1528_v43 }
 0x129   : > { %6133 = vmatmul.msk.f32.gmra.mxu1 %vm740_vm3, %v720_v56  ;;  %6336 = vmatpush.msra.mxu3 %v1528_v43  ;;  %v7343_v56 = vld [vmem:[%s9390_s7] ss:$0 sm:$0xff] }
 0x12a   : > { %6508 = vperm.xlu1 %6386, %v6507_v45   ;;  %6518 = vperm.xlu0 %6385, %v6517_v51   ;;  %v7297_v29 = vpop.permute.xlu0 %1169  ;;  %v7301_v32 = vpop.permute.xlu1 %1134 }
 0x12b   : > { %6513 = vperm.xlu2 %6384, %v6512_v52   ;;  %v7309_v36 = vpop.permute.xlu2 %1162 }
 0x130   : > { %v723_v0 = vpop.f32.mrf.mxu1  ;;  %v848_v52 = vpop.f32.mrf.mxu2 }
 0x131   : > { %6134 = vmatmul.msk.f32.gmra.mxu1 %vm740_vm3, %v723_v0 }
 0x132   : > { %6523 = vperm.xlu1 %6386, %v6522_v59   ;;  %6533 = vperm.xlu0 %6385, %v6532_v13   ;;  %v7303_v33 = vpop.permute.xlu0 %1190  ;;  %v7307_v34 = vpop.permute.xlu1 %1155 }
 0x133   : > { %6528 = vperm.xlu2 %6384, %v6527_v61   ;;  %v7324_v46 = vpop.permute.xlu2 %1183 }
 0x138   : > { %v726_v17 = vpop.f32.mrf.mxu1  ;;  %v851_v61 = vpop.f32.mrf.mxu2 }
 0x139   : > { %6135 = vmatmul.msk.f32.gmra.mxu1 %vm740_vm3, %v726_v17 }
 0x13a   : > { %6538 = vperm.xlu1 %6386, %v6537_v7   ;;  %v890_v35 = vpop.permute.xlu0 %889  ;;  %v7311_v2 = vpop.permute.xlu1 %1176 }
 0x13b   : > { %6543 = vperm.xlu2 %6384, %v6542_v4   ;;  %v7331_v45 = vpop.permute.xlu2 %1204  ;;  %v1336_v59 = vmul.f32 %v7338_v8, %v890_v35 }
 0x140   : > { %v729_v20 = vpop.f32.mrf.mxu1  ;;  %v854_v38 = vpop.f32.mrf.mxu2 }
 0x141   : > { %6136 = vmatmul.msk.f32.gmra.mxu1 %vm740_vm3, %v729_v20 }
 0x142   : > { %v7316_v9 = vpop.permute.xlu0 %1218  ;;  %v7329_v11 = vpop.permute.xlu1 %1197 }
 0x143   : > { %v897_v51 = vpop.permute.xlu2 %896 }
 0x144   : > { %v1337_v63 = vmul.f32 %v7338_v8, %v897_v51 }
 0x148   : > { %v732_v22 = vpop.f32.mrf.mxu1 }
 0x149   : > { %6137 = vmatmul.msk.f32.gmra.mxu1 %vm740_vm3, %v732_v22 }
 0x14a   : > { %v911_v44 = vpop.permute.xlu0 %910  ;;  %v7333_v47 = vpop.permute.xlu1 %1211 }
 0x14b   : > { %v7349_v13 = vpop.permute.xlu2 %1225 }
 0x150   : > { %v735_v30 = vpop.f32.mrf.mxu1 }
 0x151   : > { %6138 = vmatmul.msk.f32.gmra.mxu1 %vm740_vm3, %v735_v30 }
 0x152   : > { %v981_v48 = vpop.permute.xlu0 %980  ;;  %v904_v5 = vpop.permute.xlu1 %903 }
 0x153   : > { %v1349_v10 = vmul.f32 %v7338_v8, %v981_v48  ;;  %v918_v35 = vpop.permute.xlu2 %917  ;;  %v1338_v40 = vmul.f32 %v7338_v8, %v904_v5 }
 0x15a   : > { %v988_v57 = vpop.permute.xlu0 %987  ;;  %v7355_v4 = vpop.permute.xlu1 %1232 }
 0x15b   : > { %v1350_v42 = vmul.f32 %v7338_v8, %v988_v57 }
 0x162   : > { %v995_v17 = vpop.permute.xlu0 %994 }
 0x16a   : > { %v1002_v57 = vpop.permute.xlu0 %1001 }
 0x196   : > { %v786_v50 = vpop.f32.mrf.mxu1 }
 0x197   : > { %v849_v60 = vadd.f32 %v848_v52, %v786_v50  ;;  %v1358_v52 = vmul.f32 %v7338_v8, %v7271_v14  ;;  %v1351_v14 = vmul.f32 %v7338_v8, %v995_v17 }
 0x199   : > { %v7347_v1 = vadd.f32 %v7343_v56, %v849_v60 }
 0x19b   : > { %v1400_v62 = vadd.f32 %v1336_v59, %v7347_v1  ;;  %v1401_v22 = vadd.f32 %v1337_v63, %v7347_v1  ;;  %v1402_v60 = vadd.f32 %v1338_v40, %v7347_v1  ;;  %v1339_v63 = vmul.f32 %v7338_v8, %v911_v44 }
 0x19d   : > { %v1464_v0 = vmax.f32 %v1400_v62, 0.0  ;;  %v1465_v43 = vmax.f32 %v1401_v22, 0.0  ;;  %v925_v22 = vpop.permute.xlu2 %924  ;;  %v1403_v40 = vadd.f32 %v1339_v63, %v7347_v1 }
 0x19e   : > { %v789_v7 = vpop.f32.mrf.mxu1 }
 0x19f   : > { %v852_v12 = vadd.f32 %v851_v61, %v789_v7  ;;  %6148 = vmatmul.msk.f32.vlgmr.msrb.gmra.mxu0 %vm1536_vm6, %v1464_v0  ;;  %v7373_v61 = vpop.permute.xlu1 %1239  ;;  %v1466_v0 = vmax.f32 %v1402_v60, 0.0  ;;  %v1360_v60 = vmul.f32 %v7338_v8, %v7274_v18 }
 0x1a1   : > { %v7358_v20 = vadd.f32 %v7343_v56, %v852_v12  ;;  %v1359_v12 = vmul.f32 %v7338_v8, %v7257_v55  ;;  %v1340_v55 = vmul.f32 %v7338_v8, %v918_v35 }
 0x1a3   : > { %v1413_v30 = vadd.f32 %v1349_v10, %v7358_v20  ;;  %v1414_v5 = vadd.f32 %v1350_v42, %v7358_v20  ;;  %v1415_v44 = vadd.f32 %v1351_v14, %v7358_v20  ;;  %v1404_v35 = vadd.f32 %v1340_v55, %v7347_v1 }
 0x1a5   : > { %v1477_v48 = vmax.f32 %v1413_v30, 0.0  ;;  %v1478_v7 = vmax.f32 %v1414_v5, 0.0  ;;  %v932_v63 = vpop.permute.xlu2 %931 }
 0x1a6   : > { %v792_v51 = vpop.f32.mrf.mxu1 }
 0x1a7   : > { %v855_v50 = vadd.f32 %v854_v38, %v792_v51  ;;  %6149 = vmatmul.msk.f32.gmra.mxu0 %vm1536_vm6, %v1465_v43  ;;  %6161 = vmatmul.msk.f32.vlgmr.msrb.gmra.mxu2 %vm1536_vm6, %v1477_v48  ;;  %v857_v38 = vpop.f32.mrf.mxu2  ;;  %v7386_v43 = vpop.permute.xlu1 %1246  ;;  %v1352_v51 = vmul.f32 %v7338_v8, %v1002_v57 }
 0x1a8   : > { %v1009_v48 = vpop.permute.xlu0 %1008 }
 0x1a9   : > { %v7369_v59 = vadd.f32 %v7343_v56, %v855_v50  ;;  %v1479_v50 = vmax.f32 %v1415_v44, 0.0  ;;  %v1353_v18 = vmul.f32 %v7338_v8, %v1009_v48  ;;  %v1342_v48 = vmul.f32 %v7338_v8, %v932_v63 }
 0x1ab   : > { %v1422_v62 = vadd.f32 %v1358_v52, %v7369_v59  ;;  %v1423_v42 = vadd.f32 %v1359_v12, %v7369_v59  ;;  %v1467_v52 = vmax.f32 %v1403_v40, 0.0  ;;  %v1416_v57 = vadd.f32 %v1352_v51, %v7369_v59 }
 0x1ac   : > { %v1361_v40 = vmul.f32 %v7338_v8, %v7278_v19 }
 0x1ad   : > { %v1486_v10 = vmax.f32 %v1422_v62, 0.0  ;;  %v1487_v62 = vmax.f32 %v1423_v42, 0.0 }
 0x1ae   : > { %v795_v30 = vpop.f32.mrf.mxu1 }
 0x1af   : > { %6150 = vmatmul.msk.f32.gmra.mxu0 %vm1536_vm6, %v1466_v0  ;;  %6162 = vmatmul.msk.f32.gmra.mxu2 %vm1536_vm6, %v1478_v7  ;;  %v858_v17 = vadd.f32 %v857_v38, %v795_v30  ;;  %v1341_v0 = vmul.f32 %v7338_v8, %v925_v22  ;;  %v1468_v7 = vmax.f32 %v1404_v35, 0.0  ;;  %v7403_v12 = vpop.permute.xlu1 %1253  ;;  %v1417_v22 = vadd.f32 %v1353_v18, %v7369_v59 }
 0x1b0   : > { %6170 = vmatmul.msk.f32.vlgmr.msra.gmra.mxu3 %vm1536_vm6, %v1486_v10  ;;  %v1480_v10 = vmax.f32 %v1416_v57, 0.0  ;;  %v1016_v30 = vpop.permute.xlu0 %1015  ;;  %v1406_v35 = vadd.f32 %v1342_v48, %v7347_v1 }
 0x1b1   : > { %v7393_v5 = vadd.f32 %v7343_v56, %v858_v17  ;;  %v1405_v44 = vadd.f32 %v1341_v0, %v7347_v1  ;;  %v939_v17 = vpop.permute.xlu2 %938  ;;  %v1354_v55 = vmul.f32 %v7338_v8, %v1016_v30  ;;  %v1363_v30 = vmul.f32 %v7338_v8, %v7286_v3 }
 0x1b2   : > { %v1343_v0 = vmul.f32 %v7338_v8, %v939_v17  ;;  %v1470_v18 = vmax.f32 %v1406_v35, 0.0  ;;  %v1364_v3 = vmul.f32 %v7338_v8, %v7267_v54 }
 0x1b3   : > { %v1424_v14 = vadd.f32 %v1360_v60, %v7393_v5  ;;  %v1425_v42 = vadd.f32 %v1361_v40, %v7393_v5  ;;  %v1469_v51 = vmax.f32 %v1405_v44, 0.0  ;;  %v1418_v63 = vadd.f32 %v1354_v55, %v7369_v59 }
 0x1b4   : > { %v1427_v17 = vadd.f32 %v1363_v30, %v7393_v5 }
 0x1b5   : > { %v1488_v38 = vmax.f32 %v1424_v14, 0.0  ;;  %v1489_v60 = vmax.f32 %v1425_v42, 0.0 }
 0x1b7   : > { %6151 = vmatmul.msk.f32.gmra.mxu0 %vm1536_vm6, %v1467_v52  ;;  %6163 = vmatmul.msk.f32.gmra.mxu2 %vm1536_vm6, %v1479_v50  ;;  %v1481_v52 = vmax.f32 %v1417_v22, 0.0  ;;  %v1362_v50 = vmul.f32 %v7338_v8, %v7281_v37  ;;  %v7419_v19 = vpop.permute.xlu1 %1260 }
 0x1b8   : > { %6171 = vmatmul.msk.f32.gmra.mxu3 %vm1536_vm6, %v1487_v62  ;;  %9444 = vst [vmem:[#allocation14_spill] sm:$0xff] %v7419_v19  ;;  %v1023_v62 = vpop.permute.xlu0 %1022 }
 0x1b9   : > { %v1426_v57 = vadd.f32 %v1362_v50, %v7393_v5  ;;  %v946_v14 = vpop.permute.xlu2 %945  ;;  %v1355_v37 = vmul.f32 %v7338_v8, %v1023_v62  ;;  %v1491_v50 = vmax.f32 %v1427_v17, 0.0  ;;  %v1428_v62 = vadd.f32 %v1364_v3, %v7393_v5 }
 0x1ba   : > { %v1344_v42 = vmul.f32 %v7338_v8, %v946_v14 }
 0x1bb   : > { %v1419_v40 = vadd.f32 %v1355_v37, %v7369_v59  ;;  %v1365_v37 = vmul.f32 %v7338_v8, %v7288_v25 }
 0x1bf   : > { %6152 = vmatmul.msk.f32.gmra.mxu0 %vm1536_vm6, %v1468_v7  ;;  %6164 = vmatmul.msk.f32.gmra.mxu2 %vm1536_vm6, %v1480_v10  ;;  %v1482_v7 = vmax.f32 %v1418_v63, 0.0  ;;  %v1490_v10 = vmax.f32 %v1426_v57, 0.0  ;;  %v7434_v44 = vpop.permute.xlu1 %1267 }
 0x1c0   : > { %6172 = vmatmul.msk.f32.gmra.mxu3 %vm1536_vm6, %v1488_v38  ;;  %v1407_v38 = vadd.f32 %v1343_v0, %v7347_v1  ;;  %9445 = vst [vmem:[#allocation15_spill] sm:$0xff] %v7434_v44  ;;  %v1030_v22 = vpop.permute.xlu0 %1029  ;;  %v1408_v1 = vadd.f32 %v1344_v42, %v7358_v20 }
 0x1c1   : > { %v1356_v48 = vmul.f32 %v7338_v8, %v1030_v22 }
 0x1c2   : > { %v1471_v55 = vmax.f32 %v1407_v38, 0.0  ;;  %v1472_v14 = vmax.f32 %v1408_v1, 0.0  ;;  %v1429_v38 = vadd.f32 %v1365_v37, %v7393_v5 }
 0x1c4   : > { %v1493_v25 = vmax.f32 %v1429_v38, 0.0 }
 0x1c7   : > { %6153 = vmatmul.msk.f32.gmra.mxu0 %vm1536_vm6, %v1469_v51  ;;  %6165 = vmatmul.msk.f32.gmra.mxu2 %vm1536_vm6, %v1481_v52  ;;  %v1483_v51 = vmax.f32 %v1419_v40, 0.0  ;;  %v953_v52 = vpop.permute.xlu2 %952  ;;  %v7447_v35 = vpop.permute.xlu1 %1274 }
 0x1c8   : > { %6173 = vmatmul.msk.f32.gmra.mxu3 %vm1536_vm6, %v1489_v60  ;;  %v1420_v60 = vadd.f32 %v1356_v48, %v7369_v59  ;;  %9446 = vst [vmem:[#allocation16_spill] sm:$0xff] %v7447_v35  ;;  %v1037_v63 = vpop.permute.xlu0 %1036  ;;  %v1345_v57 = vmul.f32 %v7338_v8, %v953_v52  ;;  %v1366_v48 = vmul.f32 %v7338_v8, %v7293_v27 }
 0x1c9   : > { %v1357_v54 = vmul.f32 %v7338_v8, %v1037_v63 }
 0x1ca   : > { %v1484_v0 = vmax.f32 %v1420_v60, 0.0  ;;  %v798_v60 = vpop.f32.mrf.mxu1 }
 0x1cb   : > { %v1421_v30 = vadd.f32 %v1357_v54, %v7369_v59 }
 0x1cd   : > { %v1485_v17 = vmax.f32 %v1421_v30, 0.0 }
 0x1cf   : > { %6154 = vmatmul.msk.f32.gmra.mxu0 %vm1536_vm6, %v1470_v18  ;;  %6166 = vmatmul.msk.f32.gmra.mxu2 %vm1536_vm6, %v1482_v7  ;;  %v1492_v18 = vmax.f32 %v1428_v62, 0.0  ;;  %v960_v7 = vpop.permute.xlu2 %959  ;;  %v7460_v42 = vpop.permute.xlu1 %1281 }
 0x1d0   : > { %6174 = vmatmul.msk.f32.gmra.mxu3 %vm1536_vm6, %v1490_v10  ;;  %v1409_v10 = vadd.f32 %v1345_v57, %v7358_v20  ;;  %v1346_v40 = vmul.f32 %v7338_v8, %v960_v7  ;;  %9447 = vst [vmem:[#allocation17_spill] sm:$0xff] %v7460_v42  ;;  %v860_v62 = vpop.f32.mrf.mxu2 }
 0x1d1   : > { %v861_v57 = vadd.f32 %v860_v62, %v798_v60 }
 0x1d2   : > { %v1473_v22 = vmax.f32 %v1409_v10, 0.0  ;;  %v1410_v59 = vadd.f32 %v1346_v40, %v7358_v20 }
 0x1d4   : > { %v1474_v52 = vmax.f32 %v1410_v59, 0.0  ;;  %v1370_v59 = vmul.f32 %v7338_v8, %v7283_v21 }
 0x1d7   : > { %6155 = vmatmul.msk.f32.gmra.mxu0 %vm1536_vm6, %v1471_v55  ;;  %6167 = vmatmul.msk.f32.gmra.mxu2 %vm1536_vm6, %v1483_v51  ;;  %v967_v55 = vpop.permute.xlu2 %966  ;;  %v1430_v51 = vadd.f32 %v1366_v48, %v7393_v5  ;;  %v7473_v63 = vpop.permute.xlu1 %1288 }
 0x1d8   : > { %6175 = vmatmul.msk.f32.gmra.mxu3 %vm1536_vm6, %v1491_v50  ;;  %v1347_v3 = vmul.f32 %v7338_v8, %v967_v55  ;;  %v1367_v50 = vmul.f32 %v7338_v8, %v7276_v23  ;;  %9448 = vst [vmem:[#allocation18_spill] sm:$0xff] %v7473_v63  ;;  %v1368_v23 = vmul.f32 %v7338_v8, %v7295_v28 }
 0x1d9   : > { %v1494_v1 = vmax.f32 %v1430_v51, 0.0  ;;  %v1369_v28 = vmul.f32 %v7338_v8, %v7299_v49  ;;  %v1371_v49 = vmul.f32 %v7338_v8, %v7301_v32 }
 0x1da   : > { %v1411_v27 = vadd.f32 %v1347_v3, %v7358_v20  ;;  %v1431_v54 = vadd.f32 %v1367_v50, %v7393_v5  ;;  %v863_v50 = vpop.f32.mrf.mxu2 }
 0x1dc   : > { %v1475_v37 = vmax.f32 %v1411_v27, 0.0  ;;  %v1495_v7 = vmax.f32 %v1431_v54, 0.0 }
 0x1df   : > { %6156 = vmatmul.msk.f32.gmra.mxu0 %vm1536_vm6, %v1472_v14  ;;  %6168 = vmatmul.msk.f32.gmra.mxu2 %vm1536_vm6, %v1484_v0  ;;  %v974_v14 = vpop.permute.xlu2 %973  ;;  %v7487_v30 = vpop.permute.xlu1 %1295 }
 0x1e0   : > { %6176 = vmatmul.msk.f32.gmra.mxu3 %vm1536_vm6, %v1492_v18  ;;  %v1348_v0 = vmul.f32 %v7338_v8, %v974_v14  ;;  %v7482_v18 = vadd.f32 %v7343_v56, %v861_v57  ;;  %9449 = vst [vmem:[#allocation19_spill] sm:$0xff] %v7487_v30  ;;  %v1372_v57 = vmul.f32 %v7338_v8, %v7305_v6 }
 0x1e2   : > { %v1412_v10 = vadd.f32 %v1348_v0, %v7358_v20  ;;  %v1432_v5 = vadd.f32 %v1368_v23, %v7482_v18  ;;  %v1434_v51 = vadd.f32 %v1370_v59, %v7482_v18  ;;  %v1435_v21 = vadd.f32 %v1371_v49, %v7482_v18  ;;  %v7523_v14 = vpop.f32.mrf.mxu2  ;;  %v7550_v49 = vld [vmem:[%s9392_s9] ss:$0 sm:$0xff] }
 0x1e3   : > { %v1436_v32 = vadd.f32 %v1372_v57, %v7482_v18 }
 0x1e4   : > { %v1476_v38 = vmax.f32 %v1412_v10, 0.0  ;;  %v1499_v27 = vmax.f32 %v1435_v21, 0.0 }
 0x1e5   : > { %v1500_v23 = vmax.f32 %v1436_v32, 0.0  ;;  %v1375_v32 = vmul.f32 %v7338_v8, %v7309_v36  ;;  %v7576_v36 = vmul.f32 %v7338_v8, %v7303_v33 }
 0x1e7   : > { %6157 = vmatmul.msk.f32.gmra.mxu0 %vm1536_vm6, %v1473_v22  ;;  %6169 = vmatmul.msk.f32.gmra.mxu2 %vm1536_vm6, %v1485_v17  ;;  %v7490_v40 = vpop.permute.xlu2 %1302  ;;  %v1496_v22 = vmax.f32 %v1432_v5, 0.0  ;;  %v7496_v17 = vpop.permute.xlu0 %1309 }
 0x1e8   : > { %6177 = vmatmul.msk.f32.gmra.mxu3 %vm1536_vm6, %v1493_v25  ;;  %9450 = vst [vmem:[#allocation20_spill] sm:$0xff] %v7490_v40  ;;  %v1433_v25 = vadd.f32 %v1369_v28, %v7482_v18  ;;  %v7499_v20 = vpop.permute.xlu1 %1316  ;;  %v1374_v28 = vmul.f32 %v7338_v8, %v7307_v34  ;;  %v801_v34 = vpop.f32.mrf.mxu1 }
 0x1e9   : > { %9451 = vst [vmem:[#allocation21_spill] sm:$0xff] %v7496_v17 }
 0x1ea   : > { %9452 = vst [vmem:[#allocation22_spill] sm:$0xff] %v7499_v20  ;;  %v1497_v48 = vmax.f32 %v1433_v25, 0.0  ;;  %v7536_v5 = vpop.f32.mrf.mxu2 }
 0x1eb   : > { %9455 = vst [vmem:[#allocation25_spill] sm:$0xff] %v7536_v5 }
 0x1ef   : > { %6158 = vmatmul.msk.f32.gmra.mxu0 %vm1536_vm6, %v1474_v52  ;;  %v7503_v55 = vpop.permute.xlu2 %1323  ;;  %v7507_v3 = vpop.permute.xlu0 %1330 }
 0x1f0   : > { %6178 = vmatmul.msk.f32.gmra.mxu3 %vm1536_vm6, %v1494_v1  ;;  %9453 = vst [vmem:[#allocation23_spill] sm:$0xff] %v7503_v55  ;;  %v7511_v52 = vpop.permute.xlu1 %6388  ;;  %v1498_v1 = vmax.f32 %v1434_v51, 0.0  ;;  %v1438_v51 = vadd.f32 %v1374_v28, %v7482_v18  ;;  %v1376_v28 = vmul.f32 %v7338_v8, %v7297_v29  ;;  %v7588_v29 = vmul.f32 %v7338_v8, %v7329_v11  ;;  %v804_v15 = vpop.f32.mrf.mxu1 }
 0x1f1   : > { %9454 = vst [vmem:[#allocation24_spill] sm:$0xff] %v7507_v3  ;;  %v6390_v53 = vunpack.i.l.bf16 %v7511_v52  ;;  %v867_v24 = vadd.f32 %v7523_v14, %v804_v15 }
 0x1f7   : > { %6159 = vmatmul.msk.f32.gmra.mxu0 %vm1536_vm6, %v1475_v37  ;;  %v7514_v60 = vpop.permute.xlu2 %6393  ;;  %v7517_v62 = vpop.permute.xlu0 %6398 }
 0x1f8   : > { %6179 = vmatmul.msk.f32.gmra.mxu3 %vm1536_vm6, %v1495_v7  ;;  %v7521_v54 = vpop.permute.xlu1 %6403  ;;  %v1373_v7 = vmul.f32 %v7338_v8, %v7290_v26  ;;  %v9457_v17 = vunpack.i.l.bf16 %v7517_v62 }
 0x1ff   : > { %6160 = vmatmul.msk.f32.gmra.mxu0 %vm1536_vm6, %v1476_v38  ;;  %v7527_v0 = vpop.permute.xlu2 %6408  ;;  %v7531_v10 = vpop.permute.xlu0 %6413  ;;  %v1437_v38 = vadd.f32 %v1373_v7, %v7482_v18  ;;  %v7562_v7 = vmul.f32 %v7338_v8, %v7324_v46 }
 0x200   : > { %6180 = vmatmul.msk.f32.gmra.mxu3 %vm1536_vm6, %v1496_v22  ;;  %v7534_v6 = vpop.permute.xlu1 %6418 }
 0x207   : > { %v7541_v25 = vpop.permute.xlu2 %6423  ;;  %v7544_v26 = vpop.permute.xlu0 %6428 }
 0x208   : > { %6181 = vmatmul.msk.f32.gmra.mxu3 %vm1536_vm6, %v1497_v48  ;;  %v1501_v48 = vmax.f32 %v1437_v38, 0.0  ;;  %v7566_v38 = vmul.f32 %v7338_v8, %v7331_v45  ;;  %v7584_v45 = vmul.f32 %v7338_v8, %v7349_v13  ;;  %v7606_v13 = vmul.f32 %v7338_v8, %v7373_v61 }
 0x20f   : > { %v7608_v11 = vpop.permute.xlu0 %6443 }
 0x210   : > { %6182 = vmatmul.msk.f32.gmra.mxu3 %vm1536_vm6, %v1498_v1  ;;  %v7552_v1 = vpop.permute.xlu1 %6433 }
 0x218   : > { %6183 = vmatmul.msk.f32.gmra.mxu3 %vm1536_vm6, %v1499_v27  ;;  %v1502_v27 = vmax.f32 %v1438_v51, 0.0  ;;  %v7616_v39 = vpop.permute.xlu1 %6448 }
 0x21c   : > { %v1746_v37 = vpop.f32.mrf.mxu0 }
 0x21d   : > { %v1747_v57 = vadd.f32 %v7550_v49, %v1746_v37  ;;  %v7572_v37 = vmul.f32 %v7338_v8, %v7311_v2  ;;  %v7592_v2 = vmul.f32 %v7338_v8, %v7333_v47 }
 0x21f   : > { %v1938_v33 = vmax.f32 %v1747_v57, 0.0  ;;  %v6391_v57 = vunpack.i.h.bf16 %v7511_v52 }
 0x220   : > { %6184 = vmatmul.msk.f32.gmra.mxu3 %vm1536_vm6, %v1500_v23  ;;  %v7557_v23 = vpop.permute.xlu2 %6438 }
 0x221   : > { %v2450_v31 = vmul.f32 %v6390_v53, %v1938_v33 }
 0x224   : > { %v1749_v22 = vpop.f32.mrf.mxu0 }
 0x225   : > { %v1750_v51 = vadd.f32 %v7550_v49, %v1749_v22  ;;  %v7598_v22 = vmul.f32 %v7338_v8, %v7316_v9 }
 0x227   : > { %v1939_v61 = vmax.f32 %v1750_v51, 0.0  ;;  %v2514_v51 = vsel %vm1536_vm6, %v2450_v31, 0.0  ;;  %v7652_v31 = vpop.permute.xlu0 %6458 }
 0x228   : > { %6185 = vmatmul.msk.f32.gmra.mxu3 %vm1536_vm6, %v1501_v48  ;;  %v864_v48 = vadd.f32 %v863_v50, %v801_v34  ;;  %v7633_v53 = vpop.permute.xlu2 %6453  ;;  %v2515_v3 = vrot.slane %v2514_v51, 4 }
 0x229   : > { %v2451_v33 = vmul.f32 %v6391_v57, %v1939_v61 }
 0x22a   : > { %v1785_v59 = vpop.f32.mrf.mxu2 }
 0x22b   : > { %v1786_v58 = vadd.f32 %v7550_v49, %v1785_v59  ;;  %v2521_v52 = vsel %vm1536_vm6, %v2451_v33, 0.0 }
 0x22c   : > { %v1752_v21 = vpop.f32.mrf.mxu0  ;;  %v2522_v59 = vrot.slane %v2521_v52, 4 }
 0x22d   : > { %v1753_v47 = vadd.f32 %v7550_v49, %v1752_v21  ;;  %v1951_v55 = vmax.f32 %v1786_v58, 0.0 }
 0x22f   : > { %v1940_v41 = vmax.f32 %v1753_v47, 0.0 }
 0x230   : > { %6186 = vmatmul.msk.f32.gmra.mxu3 %vm1536_vm6, %v1502_v27  ;;  %v1439_v27 = vadd.f32 %v1375_v32, %v7482_v18  ;;  %v7602_v18 = vmul.f32 %v7338_v8, %v7355_v4  ;;  %v6395_v32 = vunpack.i.l.bf16 %v7514_v60  ;;  %v7619_v8 = vadd.f32 %v7343_v56, %v864_v48  ;;  %v7660_v4 = vpop.permute.xlu1 %6463 }
 0x231   : > { %v6421_v48 = vunpack.i.h.bf16 %v7534_v6 }
 0x232   : > { %v7579_v46 = vpop.f32.mrf.mxu2  ;;  %v1503_v16 = vmax.f32 %v1439_v27, 0.0  ;;  %v1440_v47 = vadd.f32 %v1376_v28, %v7619_v8  ;;  %v2452_v61 = vmul.f32 %v6395_v32, %v1940_v41  ;;  %v2516_v32 = vadd.f32 %v2515_v3, %v2514_v51 }
 0x233   : > { %v7594_v50 = vpop.f32.mrf.mxu3  ;;  %v7676_v14 = vadd.f32 %v7562_v7, %v7619_v8  ;;  %v7684_v3 = vadd.f32 %v7576_v36, %v7619_v8  ;;  %v7691_v7 = vadd.f32 %v7588_v29, %v7619_v8  ;;  %v2523_v51 = vadd.f32 %v2522_v59, %v2521_v52 }
 0x234   : > { %v1755_v34 = vpop.f32.mrf.mxu0  ;;  %v1504_v57 = vmax.f32 %v1440_v47, 0.0  ;;  %v2528_v20 = vsel %vm1536_vm6, %v2452_v61, 0.0  ;;  %v1813_v41 = vadd.f32 %v7550_v49, %v7594_v50  ;;  %v2517_v29 = vrot.slane %v2516_v32, 2 }
 0x235   : > { %v1756_v28 = vadd.f32 %v7550_v49, %v1755_v34  ;;  %v1441_v34 = vadd.f32 %v7572_v37, %v7619_v8 }
 0x237   : > { %v1941_v61 = vmax.f32 %v1756_v28, 0.0  ;;  %v1505_v47 = vmax.f32 %v1441_v34, 0.0 }
 0x238   : > { %6187 = vmatmul.msk.f32.gmra.mxu3 %vm1536_vm6, %v1503_v16  ;;  %v2463_v16 = vmul.f32 %v6421_v48, %v1951_v55  ;;  %v7687_v55 = vadd.f32 %v7343_v56, %v867_v24  ;;  %v7698_v48 = vadd.f32 %v7566_v38, %v7619_v8  ;;  %v7703_v24 = vadd.f32 %v7592_v2, %v7619_v8  ;;  %v2964_v38 = vld [vmem:[%s9393_s10 + $0x10] sm:$0xff] }
 0x239   : > { %v7707_v56 = vadd.f32 %v7598_v22, %v7619_v8  ;;  %v1506_v8 = vmax.f32 %v7676_v14, 0.0  ;;  %v9459_v14 = vunpack.i.l.bf16 %v7608_v11 }
 0x23a   : > { %v7636_v9 = vpop.f32.mrf.mxu2  ;;  %v2605_v28 = vsel %vm1536_vm6, %v2463_v16, 0.0 }
 0x23b   : > { %v7643_v21 = vpop.f32.mrf.mxu3  ;;  %v2606_v34 = vrot.slane %v2605_v28, 4 }
 0x23c   : > { %v1758_v27 = vpop.f32.mrf.mxu0 }
 0x23d   : > { %v1759_v33 = vadd.f32 %v7550_v49, %v1758_v27  ;;  %v2529_v27 = vrot.slane %v2528_v20, 4 }
 0x23f   : > { %v1942_v37 = vmax.f32 %v1759_v33, 0.0  ;;  %v1960_v33 = vmax.f32 %v1813_v41, 0.0  ;;  %v2530_v52 = vadd.f32 %v2529_v27, %v2528_v20  ;;  %v2963_v41 = vld [vmem:[%s9393_s10 + $0x8] sm:$0xff]  ;;  %v7725_v20 = vadd.f32 %v7584_v45, %v7687_v55  ;;  %v2962_v45 = vld [vmem:[%s9393_s10] sm:$0xff] }
 0x240   : > { %6188 = vmatmul.msk.f32.gmra.mxu3 %vm1536_vm6, %v1504_v57  ;;  %v1789_v57 = vadd.f32 %v7550_v49, %v7579_v46  ;;  %v2965_v46 = vld [vmem:[%s9393_s10 + $0x18] sm:$0xff]  ;;  %v9458_v27 = vunpack.i.h.bf16 %v7517_v62 }
 0x241   : > { %3125 = vmatpush.msra.mxu0 %v2965_v46  ;;  %v2454_v22 = vmul.f32 %v9457_v17, %v1942_v37  ;;  %v2531_v62 = vrot.slane %v2530_v52, 2 }
 0x242   : > { %v7672_v15 = vpop.f32.mrf.mxu2  ;;  %v1952_v59 = vmax.f32 %v1789_v57, 0.0 }
 0x243   : > { %v7680_v58 = vpop.f32.mrf.mxu3  ;;  %3126 = vmatpush.msra.mxu0 %v2964_v38  ;;  %v7738_v38 = vadd.f32 %v7602_v18, %v7687_v55  ;;  %v7751_v18 = vadd.f32 %v7606_v13, %v7687_v55  ;;  %v2532_v40 = vadd.f32 %v2531_v62, %v2530_v52  ;;  %v1816_v13 = vadd.f32 %v7550_v49, %v7643_v21 }
 0x244   : > { %v1761_v50 = vpop.f32.mrf.mxu0 }
 0x245   : > { %v1762_v36 = vadd.f32 %v7550_v49, %v1761_v50  ;;  %v9456_v50 = vunpack.i.h.bf16 %v7514_v60  ;;  %v2524_v60 = vrot.slane %v2523_v51, 2  ;;  %3127 = vmatpush.msra.mxu0 %v2963_v41  ;;  %v2542_v41 = vsel %vm1536_vm6, %v2454_v22, 0.0 }
 0x246   : > { %v2533_v21 = vrot.slane %v2532_v40, 1  ;;  %v1961_v5 = vmax.f32 %v1816_v13, 0.0 }
 0x247   : > { %v2453_v46 = vmul.f32 %v9456_v50, %v1941_v61  ;;  %v1943_v2 = vmax.f32 %v1762_v36, 0.0  ;;  %v2472_v61 = vmul.f32 %v9459_v14, %v1960_v33  ;;  %v9460_v50 = vunpack.i.l.bf16 %v7541_v25  ;;  %3128 = vmatpush.msra.mxu0 %v2962_v45 }
 0x248   : > { %6189 = vmatmul.msk.f32.gmra.mxu3 %vm1536_vm6, %v1505_v47  ;;  %v2518_v47 = vadd.f32 %v2517_v29, %v2516_v32  ;;  %v2525_v17 = vadd.f32 %v2524_v60, %v2523_v51  ;;  %v2543_v36 = vrot.slane %v2542_v41, 4 }
 0x249   : > { %v2455_v57 = vmul.f32 %v9458_v27, %v1943_v2  ;;  %v2464_v2 = vmul.f32 %v9460_v50, %v1952_v59  ;;  %v2535_v32 = vsel %vm1536_vm6, %v2453_v46, 0.0  ;;  %v2607_v59 = vadd.f32 %v2606_v34, %v2605_v28 }
 0x24a   : > { %v1797_v37 = vpop.f32.mrf.mxu2  ;;  %v2519_v45 = vrot.slane %v2518_v47, 1  ;;  %v2668_v33 = vsel %vm1536_vm6, %v2472_v61, 0.0  ;;  %v2536_v16 = vrot.slane %v2535_v32, 4  ;;  %v2526_v60 = vrot.slane %v2525_v17, 1 }
 0x24b   : > { %v7743_v29 = vpop.f32.mrf.mxu3  ;;  %v2549_v46 = vsel %vm1536_vm6, %v2455_v57, 0.0  ;;  %v2612_v14 = vsel %vm1536_vm6, %v2464_v2, 0.0  ;;  %v2608_v34 = vrot.slane %v2607_v59, 2  ;;  %v2669_v57 = vrot.slane %v2668_v33, 4 }
 0x24c   : > { %v1764_v27 = vpop.f32.mrf.mxu0  ;;  %v2550_v51 = vrot.slane %v2549_v46, 4  ;;  %v9461_v61 = vunpack.i.l.bf16 %v7521_v54  ;;  %v2520_v62 = vadd.f32 %v2519_v45, %v2518_v47  ;;  %v2613_v2 = vrot.slane %v2612_v14, 4 }
 0x24d   : > { %v1765_v50 = vadd.f32 %v7550_v49, %v1764_v27  ;;  %v2537_v27 = vadd.f32 %v2536_v16, %v2535_v32  ;;  %v2544_v63 = vadd.f32 %v2543_v36, %v2542_v41  ;;  %v2527_v16 = vadd.f32 %v2526_v60, %v2525_v17 }
 0x24e   : > { %v2551_v35 = vadd.f32 %v2550_v51, %v2549_v46  ;;  %v7772_v32 = vadd.f32 %v2608_v34, %v2607_v59  ;;  %v7776_v19 = vadd.f32 %v2613_v2, %v2612_v14  ;;  %v9463_v17 = vunpack.i.h.bf16 %v7608_v11 }
 0x24f   : > { %v1944_v30 = vmax.f32 %v1765_v50, 0.0  ;;  %v1792_v50 = vadd.f32 %v7550_v49, %v7636_v9  ;;  %v2670_v9 = vadd.f32 %v2669_v57, %v2668_v33  ;;  %v2538_v36 = vrot.slane %v2537_v27, 2 }
 0x250   : > { %6190 = vmatmul.msk.f32.gmra.mxu3 %vm1536_vm6, %v1506_v8  ;;  %v1795_v8 = vadd.f32 %v7550_v49, %v7672_v15  ;;  %v2545_v13 = vrot.slane %v2544_v63, 2  ;;  %v2473_v59 = vmul.f32 %v9463_v17, %v1961_v5  ;;  %v2552_v33 = vrot.slane %v2551_v35, 2 }
 0x251   : > { %v2456_v52 = vmul.f32 %v9461_v61, %v1944_v30  ;;  %v1798_v30 = vadd.f32 %v7550_v49, %v1797_v37  ;;  %v1953_v41 = vmax.f32 %v1792_v50, 0.0  ;;  %v6630_v37 = vld [vmem:[%s9462_s2] ss:$0 sm:$0xff]  ;;  %v9464_v60 = vmax.f32 %v7684_v3, 0.0 }
 0x252   : > { %v1800_v22 = vpop.f32.mrf.mxu2  ;;  %v1954_v46 = vmax.f32 %v1795_v8, 0.0  ;;  %v2610_v14 = vrot.slane %v7772_v32, 1  ;;  %3158 = vrot.lane.b32.xlu0 %v6630_v37, %s9421_s30  ;;  %v2671_v57 = vrot.slane %v2670_v9, 2  ;;  %v2539_v2 = vadd.f32 %v2538_v36, %v2537_v27 }
 0x253   : > { %v2556_v28 = vsel %vm1536_vm6, %v2456_v52, 0.0  ;;  %v7769_v42 = vpop.f32.mrf.mxu3  ;;  %v1801_v61 = vadd.f32 %v7550_v49, %v1800_v22  ;;  %v2534_v52 = vadd.f32 %v2533_v21, %v2532_v40  ;;  %v1955_v51 = vmax.f32 %v1798_v30, 0.0 }
 0x254   : > { %v2557_v47 = vrot.slane %v2556_v28, 4  ;;  %v1767_v45 = vpop.f32.mrf.mxu0  ;;  %v3035_v40 = vsel %vm3034_vm7, %v2527_v16, %v2520_v62  ;;  %v9465_v5 = vunpack.i.h.bf16 %v7541_v25  ;;  %v9466_v50 = vunpack.i.h.bf16 %v7521_v54 }
 0x255   : > { %v1768_v15 = vadd.f32 %v7550_v49, %v1767_v45  ;;  %v1956_v34 = vmax.f32 %v1801_v61, 0.0  ;;  %v2615_v8 = vrot.slane %v7776_v19, 2  ;;  %v2546_v30 = vadd.f32 %v2545_v13, %v2544_v63 }
 0x256   : > { %v2558_v44 = vadd.f32 %v2557_v47, %v2556_v28  ;;  %v2465_v11 = vmul.f32 %v9465_v5, %v1953_v41  ;;  %v9467_v62 = vunpack.i.l.bf16 %v7544_v26  ;;  %v3037_v27 = vsel %vm3036_vm8, %v2534_v52, %v3035_v40 }
 0x257   : > { %v1945_v22 = vmax.f32 %v1768_v15, 0.0  ;;  %v2675_v25 = vsel %vm1536_vm6, %v2473_v59, 0.0  ;;  %v2553_v61 = vadd.f32 %v2552_v33, %v2551_v35  ;;  %v9468_v54 = vunpack.i.h.bf16 %v7544_v26 }
 0x258   : > { %6191 = vmatmul.msk.f32.gmra.mxu3 %vm1536_vm6, %v9464_v60  ;;  %v2559_v28 = vrot.slane %v2558_v44, 2  ;;  %v2466_v47 = vmul.f32 %v9467_v62, %v1954_v46  ;;  %v9469_v63 = vunpack.i.l.bf16 %v7552_v1  ;;  %v7806_v17 = vadd.f32 %v2671_v57, %v2670_v9 }
 0x259   : > { %v2457_v21 = vmul.f32 %v9466_v50, %v1945_v22  ;;  %v2467_v36 = vmul.f32 %v9468_v54, %v1955_v51  ;;  %v2540_v22 = vrot.slane %v2539_v2, 1  ;;  %v7809_v52 = vsel %vm1536_vm6, %v2465_v11, 0.0 }
 0x25a   : > { %v1803_v3 = vpop.f32.mrf.mxu2  ;;  %v2560_v15 = vadd.f32 %v2559_v28, %v2558_v44  ;;  %v2468_v13 = vmul.f32 %v9469_v63, %v1956_v34  ;;  %v2676_v59 = vrot.slane %v2675_v25, 4  ;;  %v2547_v26 = vrot.slane %v2546_v30, 1 }
 0x25b   : > { %v1804_v45 = vadd.f32 %v7550_v49, %v1803_v3  ;;  %v7797_v16 = vpop.f32.mrf.mxu3  ;;  %v2563_v46 = vsel %vm1536_vm6, %v2457_v21, 0.0  ;;  %v2626_v33 = vsel %vm1536_vm6, %v2466_v47, 0.0  ;;  %v9470_v44 = vunpack.i.h.bf16 %v7552_v1 }
 0x25c   : > { %v1770_v41 = vpop.f32.mrf.mxu0  ;;  %v2564_v35 = vrot.slane %v2563_v46, 4  ;;  %v1819_v60 = vadd.f32 %v7550_v49, %v7680_v58  ;;  %v2554_v40 = vrot.slane %v2553_v61, 1  ;;  %v2633_v28 = vsel %vm1536_vm6, %v2467_v36, 0.0 }
 0x25d   : > { %v1957_v37 = vmax.f32 %v1804_v45, 0.0  ;;  %v9471_v34 = vmax.f32 %v7691_v7, 0.0  ;;  %v2620_v57 = vrot.slane %v7809_v52, 4  ;;  %v2561_v5 = vrot.slane %v2560_v15, 1 }
 0x25e   : > { %v2565_v9 = vadd.f32 %v2564_v35, %v2563_v46  ;;  %v2640_v11 = vsel %vm1536_vm6, %v2468_v13, 0.0  ;;  %v2541_v50 = vadd.f32 %v2540_v22, %v2539_v2  ;;  %v2627_v1 = vrot.slane %v2626_v33, 4 }
 0x25f   : > { %v2469_v51 = vmul.f32 %v9470_v44, %v1957_v37  ;;  %v2677_v62 = vadd.f32 %v2676_v59, %v2675_v25  ;;  %v2548_v47 = vadd.f32 %v2547_v26, %v2546_v30  ;;  %v2634_v45 = vrot.slane %v2633_v28, 4 }
 0x260   : > { %6192 = vmatmul.msk.f32.gmra.mxu3 %vm1536_vm6, %v9471_v34  ;;  %v2566_v21 = vrot.slane %v2565_v9, 2  ;;  %v1962_v36 = vmax.f32 %v1819_v60, 0.0  ;;  %v2555_v63 = vadd.f32 %v2554_v40, %v2553_v61  ;;  %v2641_v46 = vrot.slane %v2640_v11, 4 }
 0x261   : > { %v2647_v3 = vsel %vm1536_vm6, %v2469_v51, 0.0  ;;  %v2562_v13 = vadd.f32 %v2561_v5, %v2560_v15  ;;  %v1771_v2 = vadd.f32 %v7550_v49, %v1770_v41  ;;  %v2628_v34 = vadd.f32 %v2627_v1, %v2626_v33 }
 0x262   : > { %v1806_v58 = vpop.f32.mrf.mxu2  ;;  %v2567_v37 = vadd.f32 %v2566_v21, %v2565_v9  ;;  %v2648_v44 = vrot.slane %v2647_v3, 4  ;;  %v3039_v25 = vsel %vm3038_vm9, %v2541_v50, %v3037_v27  ;;  %v2635_v30 = vadd.f32 %v2634_v45, %v2633_v28 }
 0x263   : > { %v1807_v54 = vadd.f32 %v7550_v49, %v1806_v58  ;;  %v7824_v7 = vpop.f32.mrf.mxu3  ;;  %v9472_v59 = vunpack.i.l.bf16 %v7557_v23  ;;  %v3041_v61 = vsel %vm3040_vm10, %v2548_v47, %v3039_v25  ;;  %v2678_v40 = vrot.slane %v2677_v62, 2 }
 0x264   : > { %v1773_v35 = vpop.f32.mrf.mxu0  ;;  %v2568_v51 = vrot.slane %v2567_v37, 1  ;;  %v2642_v9 = vadd.f32 %v2641_v46, %v2640_v11  ;;  %v9473_v15 = vmax.f32 %v7698_v48, 0.0  ;;  %v3043_v33 = vsel %vm3042_vm11, %v2555_v63, %v3041_v61 }
 0x265   : > { %v1958_v22 = vmax.f32 %v1807_v54, 0.0  ;;  %v1774_v60 = vadd.f32 %v7550_v49, %v1773_v35  ;;  %v2649_v5 = vadd.f32 %v2648_v44, %v2647_v3  ;;  %v1946_v27 = vmax.f32 %v1771_v2, 0.0 }
 0x266   : > { %v2569_v41 = vadd.f32 %v2568_v51, %v2567_v37  ;;  %v3045_v50 = vsel %vm3044_vm12, %v2562_v13, %v3043_v33  ;;  %v2629_v1 = vrot.slane %v2628_v34, 2  ;;  %v7842_v48 = vadd.f32 %v2615_v8, %v7776_v19 }
 0x267   : > { %v2470_v26 = vmul.f32 %v9472_v59, %v1958_v22  ;;  %v1947_v58 = vmax.f32 %v1774_v60, 0.0  ;;  %v2636_v11 = vrot.slane %v2635_v30, 2  ;;  %v2673_v63 = vrot.slane %v7806_v17, 1 }
 0x268   : > { %6193 = vmatmul.msk.f32.gmra.mxu3 %vm1536_vm6, %v9473_v15  ;;  %v3047_v47 = vsel %vm3046_vm13, %v2569_v41, %v3045_v50  ;;  %v9474_v46 = vunpack.i.l.bf16 %v7616_v39  ;;  %v1822_v35 = vadd.f32 %v7550_v49, %v7743_v29  ;;  %v2643_v13 = vrot.slane %v2642_v9, 2 }
 0x269   : > { %v2654_v28 = vsel %vm1536_vm6, %v2470_v26, 0.0  ;;  %6212 = vmatmul.msk.f32.vlgmr.msra.gmra.mxu0 %vm1536_vm6, %v3047_v47  ;;  %v7854_v19 = vadd.f32 %v2620_v57, %v7809_v52  ;;  %v2650_v8 = vrot.slane %v2649_v5, 2  ;;  %v9475_v22 = vunpack.i.l.bf16 %v7527_v0 }
 0x26a   : > { %v2655_v21 = vrot.slane %v2654_v28, 4  ;;  %v1809_v45 = vpop.f32.mrf.mxu2  ;;  %v2474_v37 = vmul.f32 %v9474_v46, %v1962_v36  ;;  %v2630_v59 = vadd.f32 %v2629_v1, %v2628_v34  ;;  %v9476_v60 = vunpack.i.h.bf16 %v7527_v0 }
 0x26b   : > { %v1810_v3 = vadd.f32 %v7550_v49, %v1809_v45  ;;  %v7846_v54 = vpop.f32.mrf.mxu3  ;;  %v2458_v51 = vmul.f32 %v9475_v22, %v1946_v27  ;;  %v7860_v36 = vadd.f32 %v2678_v40, %v2677_v62  ;;  %v2637_v15 = vadd.f32 %v2636_v11, %v2635_v30 }
 0x26c   : > { %v2656_v44 = vadd.f32 %v2655_v21, %v2654_v28  ;;  %v1776_v2 = vpop.f32.mrf.mxu0  ;;  %v2459_v61 = vmul.f32 %v9476_v60, %v1947_v58  ;;  %v1825_v29 = vadd.f32 %v7550_v49, %v7769_v42  ;;  %v9477_v41 = vunpack.i.h.bf16 %v7557_v23 }
 0x26d   : > { %v1959_v25 = vmax.f32 %v1810_v3, 0.0  ;;  %v1777_v57 = vadd.f32 %v7550_v49, %v1776_v2  ;;  %v7868_v33 = vsel %vm1536_vm6, %v2474_v37, 0.0  ;;  %v1963_v27 = vmax.f32 %v1822_v35, 0.0 }
 0x26e   : > { %v2657_v26 = vrot.slane %v2656_v44, 2  ;;  %v2644_v34 = vadd.f32 %v2643_v13, %v2642_v9  ;;  %v9478_v28 = vmax.f32 %v7703_v24, 0.0  ;;  %v7874_v0 = vadd.f32 %v2673_v63, %v7806_v17 }
 0x26f   : > { %v2471_v52 = vmul.f32 %v9477_v41, %v1959_v25  ;;  %v2651_v62 = vadd.f32 %v2650_v8, %v2649_v5  ;;  %v2570_v42 = vsel %vm1536_vm6, %v2458_v51, 0.0  ;;  %v1948_v30 = vmax.f32 %v1777_v57, 0.0 }
 0x270   : > { %6194 = vmatmul.msk.f32.gmra.mxu3 %vm1536_vm6, %v9478_v28  ;;  %v2658_v40 = vadd.f32 %v2657_v26, %v2656_v44  ;;  %v2577_v50 = vsel %vm1536_vm6, %v2459_v61, 0.0  ;;  %v2680_v21 = vrot.slane %v7860_v36, 1  ;;  %v2631_v9 = vrot.slane %v2630_v59, 1 }
 0x271   : > { %v2661_v23 = vsel %vm1536_vm6, %v2471_v52, 0.0  ;;  %v2638_v58 = vrot.slane %v2637_v15, 1  ;;  %v1964_v24 = vmax.f32 %v1825_v29, 0.0  ;;  %v9479_v47 = vunpack.i.l.bf16 %v7531_v10 }
 0x272   : > { %v2662_v1 = vrot.slane %v2661_v23, 4  ;;  %v2645_v11 = vrot.slane %v2644_v34, 1  ;;  %v1828_v5 = vadd.f32 %v7550_v49, %v7797_v16  ;;  %v2571_v3 = vrot.slane %v2570_v42, 4 }
 0x273   : > { %v2460_v45 = vmul.f32 %v9479_v47, %v1948_v30  ;;  %v1836_v17 = vpop.f32.mrf.mxu3  ;;  %v2652_v37 = vrot.slane %v2651_v62, 1  ;;  %v2578_v35 = vrot.slane %v2577_v50, 4  ;;  %v9480_v2 = vunpack.i.h.bf16 %v7616_v39 }
 0x274   : > { %v2663_v63 = vadd.f32 %v2662_v1, %v2661_v23  ;;  %v1779_v46 = vpop.f32.mrf.mxu0  ;;  %v2659_v22 = vrot.slane %v2658_v40, 1  ;;  %v2632_v26 = vadd.f32 %v2631_v9, %v2630_v59  ;;  %v2639_v60 = vadd.f32 %v2638_v58, %v2637_v15 }
 0x275   : > { %v2584_v13 = vsel %vm1536_vm6, %v2460_v45, 0.0  ;;  %v1780_v44 = vadd.f32 %v7550_v49, %v1779_v46  ;;  %v2475_v8 = vmul.f32 %v9480_v2, %v1963_v27  ;;  %v1831_v16 = vadd.f32 %v7550_v49, %v7824_v7 }
 0x276   : > { %v2664_v51 = vrot.slane %v2663_v63, 2  ;;  %v2585_v25 = vrot.slane %v2584_v13, 4  ;;  %v2646_v29 = vadd.f32 %v2645_v11, %v2644_v34  ;;  %v9481_v41 = vunpack.i.l.bf16 %v7633_v53 }
 0x277   : > { %v1949_v61 = vmax.f32 %v1780_v44, 0.0  ;;  %v2572_v57 = vadd.f32 %v2571_v3, %v2570_v42  ;;  %v9482_v23 = vmax.f32 %v7707_v56, 0.0  ;;  %v2653_v39 = vadd.f32 %v2652_v37, %v2651_v62 }
 0x278   : > { %v2476_v52 = vmul.f32 %v9481_v41, %v1964_v24  ;;  %v2665_v28 = vadd.f32 %v2664_v51, %v2663_v63  ;;  %v1965_v27 = vmax.f32 %v1828_v5, 0.0  ;;  %v2579_v30 = vadd.f32 %v2578_v35, %v2577_v50 }
 0x279   : > { %6195 = vmatmul.msk.f32.gmra.mxu3 %vm1536_vm6, %v9482_v23  ;;  %v9483_v59 = vunpack.i.h.bf16 %v7531_v10  ;;  %v2660_v1 = vadd.f32 %v2659_v22, %v2658_v40  ;;  %v1834_v7 = vadd.f32 %v7550_v49, %v7846_v54  ;;  %v2586_v34 = vadd.f32 %v2585_v25, %v2584_v13 }
 0x27a   : > { %v2666_v9 = vrot.slane %v2665_v28, 1  ;;  %v1966_v58 = vmax.f32 %v1831_v16, 0.0  ;;  %v1837_v42 = vadd.f32 %v7550_v49, %v1836_v17  ;;  %v3055_v47 = vsel %vm3034_vm7, %v2639_v60, %v2632_v26 }
 0x27b   : > { %v2461_v15 = vmul.f32 %v9483_v59, %v1949_v61  ;;  %v1839_v56 = vpop.f32.mrf.mxu3  ;;  %v2573_v62 = vrot.slane %v2572_v57, 2  ;;  %v3056_v40 = vsel %vm3036_vm8, %v2646_v29, %v3055_v47  ;;  %v2580_v11 = vrot.slane %v2579_v30, 2 }
 0x27c   : > { %v1840_v50 = vadd.f32 %v7550_v49, %v1839_v56  ;;  %v1782_v10 = vpop.f32.mrf.mxu0  ;;  %v2667_v54 = vadd.f32 %v2666_v9, %v2665_v28  ;;  %v3057_v3 = vsel %vm3038_vm9, %v2653_v39, %v3056_v40  ;;  %v1967_v63 = vmax.f32 %v1834_v7, 0.0 }
 0x27d   : > { %v2591_v24 = vsel %vm1536_vm6, %v2461_v15, 0.0  ;;  %v1783_v5 = vadd.f32 %v7550_v49, %v1782_v10  ;;  %v2587_v17 = vrot.slane %v2586_v34, 2  ;;  %v3058_v37 = vsel %vm3040_vm10, %v2660_v1, %v3057_v3 }
 0x27e   : > { %v2592_v45 = vrot.slane %v2591_v24, 4  ;;  %v1968_v35 = vmax.f32 %v1837_v42, 0.0  ;;  %v2681_v44 = vadd.f32 %v2680_v21, %v7860_v36  ;;  %v3059_v2 = vsel %vm3042_vm11, %v2667_v54, %v3058_v37 }
 0x27f   : > { %v1950_v13 = vmax.f32 %v1783_v5, 0.0  ;;  %v2689_v22 = vsel %vm1536_vm6, %v2475_v8, 0.0  ;;  %v9484_v51 = vunpack.i.h.bf16 %v7633_v53  ;;  %v1969_v60 = vmax.f32 %v1840_v50, 0.0 }
 0x280   : > { %v2593_v46 = vadd.f32 %v2592_v45, %v2591_v24  ;;  %v9485_v16 = vmax.f32 %v7725_v20, 0.0  ;;  %v9486_v61 = vunpack.i.l.bf16 %v7652_v31  ;;  %v2581_v41 = vadd.f32 %v2580_v11, %v2579_v30 }
 0x281   : > { %v2477_v25 = vmul.f32 %v9484_v51, %v1965_v27  ;;  %v9487_v28 = vunpack.i.l.bf16 %v7534_v6  ;;  %v3060_v21 = vsel %vm3044_vm12, %v7874_v0, %v3059_v2  ;;  %v2696_v8 = vsel %vm1536_vm6, %v2476_v52, 0.0 }
 0x282   : > { %v2594_v26 = vrot.slane %v2593_v46, 2  ;;  %6196 = vmatmul.msk.f32.gmra.mxu3 %vm1536_vm6, %v9485_v16  ;;  %v2478_v29 = vmul.f32 %v9486_v61, %v1966_v58  ;;  %v2574_v53 = vadd.f32 %v2573_v62, %v2572_v57  ;;  %v9488_v23 = vunpack.i.h.bf16 %v7652_v31 }
 0x283   : > { %v2462_v36 = vmul.f32 %v9487_v28, %v1950_v13  ;;  %v2588_v27 = vadd.f32 %v2587_v17, %v2586_v34  ;;  %v9489_v20 = vunpack.i.l.bf16 %v7660_v4  ;;  %v7927_v30 = vpop.f32.mrf.mxu3  ;;  %v7930_v6 = vsel %vm3046_vm13, %v2681_v44, %v3060_v21 }
 0x284   : > { %v2479_v39 = vmul.f32 %v9488_v23, %v1967_v63  ;;  %v2595_v15 = vadd.f32 %v2594_v26, %v2593_v46  ;;  %v2622_v0 = vrot.slane %v7854_v19, 2  ;;  %v2703_v52 = vsel %vm1536_vm6, %v2477_v25, 0.0 }
 0x285   : > { %v2480_v59 = vmul.f32 %v9489_v20, %v1968_v35  ;;  %v2598_v1 = vsel %vm1536_vm6, %v2462_v36, 0.0  ;;  %v9490_v57 = vunpack.i.h.bf16 %v7660_v4  ;;  %v2683_v7 = vrot.slane %v7868_v33, 4 }
 0x286   : > { %v2599_v9 = vrot.slane %v2598_v1, 4  ;;  %v2690_v34 = vrot.slane %v2689_v22, 4  ;;  %v2710_v58 = vsel %vm1536_vm6, %v2478_v29, 0.0  ;;  %v2582_v42 = vrot.slane %v2581_v41, 1 }
 0x287   : > { %v2481_v31 = vmul.f32 %v9490_v57, %v1969_v60  ;;  %v2697_v24 = vrot.slane %v2696_v8, 4  ;;  %v2717_v56 = vsel %vm1536_vm6, %v2479_v39, 0.0  ;;  %v2589_v47 = vrot.slane %v2588_v27, 1 }
 0x288   : > { %v2600_v62 = vadd.f32 %v2599_v9, %v2598_v1  ;;  %v2704_v45 = vrot.slane %v2703_v52, 4  ;;  %v2575_v50 = vrot.slane %v2574_v53, 1  ;;  %v2724_v10 = vsel %vm1536_vm6, %v2480_v59, 0.0 }
 0x289   : > { %v2596_v40 = vrot.slane %v2595_v15, 1  ;;  %v2711_v11 = vrot.slane %v2710_v58, 4  ;;  %v2731_v4 = vsel %vm1536_vm6, %v2481_v31, 0.0  ;;  %v9491_v54 = vmax.f32 %v7738_v38, 0.0 }
 0x28a   : > { %v2601_v5 = vrot.slane %v2600_v62, 2  ;;  %v2623_v3 = vadd.f32 %v2622_v0, %v7854_v19  ;;  %v2684_v63 = vadd.f32 %v2683_v7, %v7868_v33  ;;  %v2691_v17 = vadd.f32 %v2690_v34, %v2689_v22 }
 0x28b   : > { %6197 = vmatmul.msk.f32.gmra.mxu3 %vm1536_vm6, %v9491_v54  ;;  %v2583_v46 = vadd.f32 %v2582_v42, %v2581_v41  ;;  %v2718_v37 = vrot.slane %v2717_v56, 4  ;;  %v2698_v35 = vadd.f32 %v2697_v24, %v2696_v8  ;;  %v2590_v13 = vadd.f32 %v2589_v47, %v2588_v27  ;;  %v7946_v16 = vpop.f32.mrf.mxu3 }
 0x28c   : > { %v2725_v44 = vrot.slane %v2724_v10, 4  ;;  %v2602_v2 = vadd.f32 %v2601_v5, %v2600_v62  ;;  %v2705_v51 = vadd.f32 %v2704_v45, %v2703_v52  ;;  %v2576_v25 = vadd.f32 %v2575_v50, %v2574_v53 }
 0x28d   : > { %v2597_v26 = vadd.f32 %v2596_v40, %v2595_v15  ;;  %v2732_v60 = vrot.slane %v2731_v4, 4  ;;  %v2712_v38 = vadd.f32 %v2711_v11, %v2710_v58  ;;  %v2611_v19 = vadd.f32 %v2610_v14, %v7772_v32  ;;  %v7958_v32 = vld [vmem:[%s9389_s6] ss:$0 sm:$0xff] }
 0x28e   : > { %v2603_v61 = vrot.slane %v2602_v2, 1  ;;  %v2617_v33 = vrot.slane %v7842_v48, 1  ;;  %v2692_v22 = vrot.slane %v2691_v17, 2  ;;  %v2719_v29 = vadd.f32 %v2718_v37, %v2717_v56 }
 0x28f   : > { %v2624_v41 = vrot.slane %v2623_v3, 1  ;;  %v3048_v28 = vsel %vm3034_vm7, %v2583_v46, %v2576_v25  ;;  %v2699_v36 = vrot.slane %v2698_v35, 2  ;;  %v2726_v21 = vadd.f32 %v2725_v44, %v2724_v10 }
 0x290   : > { %v2604_v8 = vadd.f32 %v2603_v61, %v2602_v2  ;;  %v3049_v53 = vsel %vm3036_vm8, %v2590_v13, %v3048_v28  ;;  %v2685_v23 = vrot.slane %v2684_v63, 2  ;;  %v2706_v39 = vrot.slane %v2705_v51, 2 }
 0x291   : > { %v2733_v27 = vadd.f32 %v2732_v60, %v2731_v4  ;;  %v3050_v20 = vsel %vm3038_vm9, %v2597_v26, %v3049_v53  ;;  %v1387_v14 = vmul.f32 %v7958_v32, %v7386_v43  ;;  %v2713_v59 = vrot.slane %v2712_v38, 2 }
 0x292   : > { %v9492_v15 = vmax.f32 %v7751_v18, 0.0  ;;  %v2618_v1 = vadd.f32 %v2617_v33, %v7842_v48  ;;  %v3051_v0 = vsel %vm3040_vm10, %v2604_v8, %v3050_v20  ;;  %v2693_v52 = vadd.f32 %v2692_v22, %v2691_v17  ;;  %v9493_v22 = vld [vmem:[#allocation14_spill] sm:$0xff] }
 0x293   : > { %v2720_v57 = vrot.slane %v2719_v29, 2  ;;  %v2625_v31 = vadd.f32 %v2624_v41, %v2623_v3  ;;  %v3052_v9 = vsel %vm3042_vm11, %v2611_v19, %v3051_v0  ;;  %v2700_v7 = vadd.f32 %v2699_v36, %v2698_v35  ;;  %v1848_v56 = vpop.f32.mrf.mxu3  ;;  %v9494_v0 = vld [vmem:[#allocation15_spill] sm:$0xff] }
 0x294   : > { %6198 = vmatmul.msk.f32.gmra.mxu3 %vm1536_vm6, %v9492_v15  ;;  %v2727_v34 = vrot.slane %v2726_v21, 2  ;;  %v3053_v58 = vsel %vm3044_vm12, %v2618_v1, %v3052_v9  ;;  %v1451_v43 = vadd.f32 %v1387_v14, %v7687_v55  ;;  %v2686_v42 = vadd.f32 %v2685_v23, %v2684_v63  ;;  %v6469_v15 = vpop.permute.xlu2 %6468 }
 0x295   : > { %v2707_v24 = vadd.f32 %v2706_v39, %v2705_v51  ;;  %v2734_v18 = vrot.slane %v2733_v27, 2  ;;  %v3054_v47 = vsel %vm3046_vm13, %v2625_v31, %v3053_v58  ;;  %v2714_v48 = vadd.f32 %v2713_v59, %v2712_v38 }
 0x296   : > { %6213 = vmatmul.msk.f32.gmra.mxu0 %vm1536_vm6, %v3054_v47  ;;  %v2694_v62 = vrot.slane %v2693_v52, 1  ;;  %v2721_v45 = vadd.f32 %v2720_v57, %v2719_v29  ;;  %v2701_v50 = vrot.slane %v2700_v7, 1  ;;  %v2728_v10 = vadd.f32 %v2727_v34, %v2726_v21 }
 0x297   : > { %v1515_v40 = vmax.f32 %v1451_v43, 0.0  ;;  %v2687_v11 = vrot.slane %v2686_v42, 1  ;;  %v2708_v4 = vrot.slane %v2707_v24, 1  ;;  %v2735_v5 = vadd.f32 %v2734_v18, %v2733_v27  ;;  %v7997_v27 = vld [vmem:[%s9392_s9] ss:$0 sm:$0xff]  ;;  %v6479_v43 = vpop.permute.xlu1 %6478 }
 0x298   : > { %v1388_v54 = vmul.f32 %v7958_v32, %v7403_v12  ;;  %v2715_v3 = vrot.slane %v2714_v48, 1  ;;  %v2695_v63 = vadd.f32 %v2694_v62, %v2693_v52  ;;  %v2722_v17 = vrot.slane %v2721_v45, 1 }
 0x299   : > { %v2702_v46 = vadd.f32 %v2701_v50, %v2700_v7  ;;  %v2729_v35 = vrot.slane %v2728_v10, 1  ;;  %v2688_v13 = vadd.f32 %v2687_v11, %v2686_v42  ;;  %v2709_v44 = vadd.f32 %v2708_v4, %v2707_v24 }
 0x29a   : > { %v1452_v37 = vadd.f32 %v1388_v54, %v7687_v55  ;;  %v2736_v51 = vrot.slane %v2735_v5, 1  ;;  %v2716_v25 = vadd.f32 %v2715_v3, %v2714_v48  ;;  %v2723_v26 = vadd.f32 %v2722_v17, %v2721_v45  ;;  %v9495_v3 = vld [vmem:[#allocation16_spill] sm:$0xff] }
 0x29b   : > { %v1851_v2 = vpop.f32.mrf.mxu3  ;;  %v3062_v12 = vsel %vm3034_vm7, %v2695_v63, %v2688_v13  ;;  %v2730_v38 = vadd.f32 %v2729_v35, %v2728_v10  ;;  %v1389_v29 = vmul.f32 %v7958_v32, %v9493_v22  ;;  %v1849_v8 = vadd.f32 %v7550_v49, %v1848_v56 }
 0x29c   : > { %6199 = vmatmul.msk.f32.gmra.mxu3 %vm1536_vm6, %v1515_v40  ;;  %v1516_v60 = vmax.f32 %v1452_v37, 0.0  ;;  %v3063_v61 = vsel %vm3036_vm8, %v2702_v46, %v3062_v12  ;;  %v2737_v19 = vadd.f32 %v2736_v51, %v2735_v5  ;;  %v1843_v39 = vadd.f32 %v7550_v49, %v7927_v30  ;;  %v807_v5 = vpop.f32.mrf.mxu1 }
 0x29d   : > { %v3064_v33 = vsel %vm3038_vm9, %v2709_v44, %v3063_v61  ;;  %v1453_v21 = vadd.f32 %v1389_v29, %v7687_v55  ;;  %v1852_v20 = vadd.f32 %v7997_v27, %v1851_v2  ;;  %v1972_v1 = vmax.f32 %v1849_v8, 0.0  ;;  %v9496_v44 = vld [vmem:[#allocation25_spill] sm:$0xff]  ;;  %v6484_v61 = vpop.permute.xlu2 %6483 }
 0x29e   : > { %6214 = vmatmul.msk.f32.gmra.mxu0 %vm1536_vm6, %v7930_v6  ;;  %v3065_v41 = vsel %vm3040_vm10, %v2716_v25, %v3064_v33  ;;  %v1846_v6 = vadd.f32 %v7550_v49, %v7946_v16  ;;  %v1390_v52 = vmul.f32 %v7958_v32, %v9494_v0  ;;  %v6471_v57 = vunpack.i.h.bf16 %v6469_v15  ;;  %v6474_v49 = vpop.permute.xlu0 %6473 }
 0x29f   : > { %v3066_v28 = vsel %vm3042_vm11, %v2723_v26, %v3065_v41  ;;  %v1517_v59 = vmax.f32 %v1453_v21, 0.0  ;;  %v1970_v30 = vmax.f32 %v1843_v39, 0.0  ;;  %v1973_v31 = vmax.f32 %v1852_v20, 0.0 }
 0x2a0   : > { %v3067_v36 = vsel %vm3044_vm12, %v2730_v38, %v3066_v28  ;;  %v1971_v14 = vmax.f32 %v1846_v6, 0.0  ;;  %v6475_v9 = vunpack.i.l.bf16 %v6474_v49  ;;  %v6470_v34 = vunpack.i.l.bf16 %v6469_v15  ;;  %v6770_v28 = vld [vmem:[%s9390_s7] ss:$0 sm:$0xff] }
 0x2a1   : > { %v3068_v23 = vsel %vm3046_vm13, %v2737_v19, %v3067_v36  ;;  %v6476_v58 = vunpack.i.h.bf16 %v6474_v49  ;;  %v1454_v24 = vadd.f32 %v1390_v52, %v7687_v55  ;;  %v6480_v18 = vunpack.i.l.bf16 %v6479_v43 }
 0x2a2   : > { %v2483_v42 = vmul.f32 %v6471_v57, %v1971_v14  ;;  %v2484_v56 = vmul.f32 %v6475_v9, %v1972_v1  ;;  %v2482_v48 = vmul.f32 %v6470_v34, %v1970_v30  ;;  %v6481_v10 = vunpack.i.h.bf16 %v6479_v43 }
 0x2a3   : > { %v1854_v53 = vpop.f32.mrf.mxu3  ;;  %v2485_v62 = vmul.f32 %v6476_v58, %v1973_v31  ;;  %v1518_v4 = vmax.f32 %v1454_v24, 0.0  ;;  %v1391_v63 = vmul.f32 %v7958_v32, %v9495_v3  ;;  %v870_v2 = vadd.f32 %v9496_v44, %v807_v5 }
 0x2a4   : > { %6200 = vmatmul.msk.f32.gmra.mxu3 %vm1536_vm6, %v1516_v60  ;;  %v1855_v16 = vadd.f32 %v7997_v27, %v1854_v53  ;;  %v2745_v40 = vsel %vm1536_vm6, %v2483_v42, 0.0  ;;  %v2752_v54 = vsel %vm1536_vm6, %v2484_v56, 0.0  ;;  %v2738_v17 = vsel %vm1536_vm6, %v2482_v48, 0.0 }
 0x2a5   : > { %v2759_v46 = vsel %vm1536_vm6, %v2485_v62, 0.0  ;;  %v2746_v35 = vrot.slane %v2745_v40, 4  ;;  %v2753_v51 = vrot.slane %v2752_v54, 4  ;;  %v1455_v26 = vadd.f32 %v1391_v63, %v7687_v55  ;;  %v9498_v62 = vld [vmem:[#allocation18_spill] sm:$0xff] }
 0x2a6   : > { %6215 = vmatmul.msk.f32.gmra.mxu0 %vm1536_vm6, %v3068_v23  ;;  %v1974_v7 = vmax.f32 %v1855_v16, 0.0  ;;  %v2739_v12 = vrot.slane %v2738_v17, 4  ;;  %v2760_v60 = vrot.slane %v2759_v46, 4  ;;  %v6485_v22 = vunpack.i.l.bf16 %v6484_v61  ;;  %v9497_v23 = vld [vmem:[#allocation17_spill] sm:$0xff] }
 0x2a7   : > { %v2747_v29 = vadd.f32 %v2746_v35, %v2745_v40  ;;  %v8022_v6 = vadd.f32 %v6770_v28, %v870_v2  ;;  %v2754_v36 = vadd.f32 %v2753_v51, %v2752_v54  ;;  %v1519_v8 = vmax.f32 %v1455_v26, 0.0 }
 0x2a8   : > { %v2486_v50 = vmul.f32 %v6480_v18, %v1974_v7  ;;  %v2740_v55 = vadd.f32 %v2739_v12, %v2738_v17  ;;  %v2761_v53 = vadd.f32 %v2760_v60, %v2759_v46  ;;  %v1392_v39 = vmul.f32 %v7958_v32, %v9497_v23 }
 0x2a9   : > { %v2748_v14 = vrot.slane %v2747_v29, 2  ;;  %v2755_v15 = vrot.slane %v2754_v36, 2  ;;  %v6486_v43 = vunpack.i.h.bf16 %v6484_v61 }
 0x2aa   : > { %v2766_v13 = vsel %vm1536_vm6, %v2486_v50, 0.0  ;;  %v1456_v0 = vadd.f32 %v1392_v39, %v8022_v6  ;;  %v2741_v52 = vrot.slane %v2740_v55, 2  ;;  %v2762_v57 = vrot.slane %v2761_v53, 2 }
 0x2ab   : > { %v1857_v47 = vpop.f32.mrf.mxu3  ;;  %v2767_v19 = vrot.slane %v2766_v13, 4  ;;  %v2749_v7 = vadd.f32 %v2748_v14, %v2747_v29  ;;  %v2756_v42 = vadd.f32 %v2755_v15, %v2754_v36 }
 0x2ac   : > { %6201 = vmatmul.msk.f32.gmra.mxu3 %vm1536_vm6, %v1517_v59  ;;  %v1858_v45 = vadd.f32 %v7997_v27, %v1857_v47  ;;  %v1520_v18 = vmax.f32 %v1456_v0, 0.0  ;;  %v2742_v56 = vadd.f32 %v2741_v52, %v2740_v55  ;;  %v2763_v47 = vadd.f32 %v2762_v57, %v2761_v53  ;;  %v9500_v0 = vld [vmem:[#allocation20_spill] sm:$0xff] }
 0x2ad   : > { %v2768_v20 = vadd.f32 %v2767_v19, %v2766_v13  ;;  %v2750_v40 = vrot.slane %v2749_v7, 1  ;;  %v2757_v5 = vrot.slane %v2756_v42, 1  ;;  %v9499_v19 = vld [vmem:[#allocation19_spill] sm:$0xff]  ;;  %v1395_v52 = vmul.f32 %v7958_v32, %v9500_v0 }
 0x2ae   : > { %v1975_v11 = vmax.f32 %v1858_v45, 0.0  ;;  %v1393_v45 = vmul.f32 %v7958_v32, %v9498_v62  ;;  %v2743_v17 = vrot.slane %v2742_v56, 1  ;;  %v2764_v46 = vrot.slane %v2763_v47, 1 }
 0x2af   : > { %v2769_v31 = vrot.slane %v2768_v20, 2  ;;  %v2751_v44 = vadd.f32 %v2750_v40, %v2749_v7  ;;  %v1459_v57 = vadd.f32 %v1395_v52, %v8022_v6  ;;  %v8075_v40 = vld [vmem:[%s9394_s11] ss:$0 sm:$0xff] }
 0x2b0   : > { %v2487_v37 = vmul.f32 %v6481_v10, %v1975_v11  ;;  %v1457_v63 = vadd.f32 %v1393_v45, %v8022_v6  ;;  %v2744_v60 = vadd.f32 %v2743_v17, %v2742_v56 }
 0x2b1   : > { %v2770_v50 = vadd.f32 %v2769_v31, %v2768_v20  ;;  %v1523_v31 = vmax.f32 %v1459_v57, 0.0 }
 0x2b2   : > { %v2773_v25 = vsel %vm1536_vm6, %v2487_v37, 0.0  ;;  %v1521_v26 = vmax.f32 %v1457_v63, 0.0  ;;  %v3069_v28 = vsel %vm3034_vm7, %v2751_v44, %v2744_v60  ;;  %v9503_v63 = vld [vmem:[#allocation23_spill] sm:$0xff] }
 0x2b3   : > { %v1860_v38 = vpop.f32.mrf.mxu3  ;;  %v2774_v41 = vrot.slane %v2773_v25, 4  ;;  %v2771_v13 = vrot.slane %v2770_v50, 1  ;;  %v1398_v17 = vmul.f32 %v7958_v32, %v9503_v63 }
 0x2b4   : > { %6202 = vmatmul.msk.f32.gmra.mxu3 %vm1536_vm6, %v1518_v4  ;;  %v1861_v33 = vadd.f32 %v7997_v27, %v1860_v38  ;;  %v8033_v4 = vpop.permute.xlu0 %6488  ;;  %v2765_v38 = vadd.f32 %v2764_v46, %v2763_v47 }
 0x2b5   : > { %v2775_v59 = vadd.f32 %v2774_v41, %v2773_v25  ;;  %v2758_v25 = vadd.f32 %v2757_v5, %v2756_v42  ;;  %v9502_v42 = vld [vmem:[#allocation22_spill] sm:$0xff]  ;;  %v6491_v46 = vunpack.i.h.bf16 %v8033_v4 }
 0x2b6   : > { %v1976_v21 = vmax.f32 %v1861_v33, 0.0  ;;  %v1394_v33 = vmul.f32 %v7958_v32, %v9499_v19 }
 0x2b7   : > { %v2776_v34 = vrot.slane %v2775_v59, 2 }
 0x2b8   : > { %v2488_v16 = vmul.f32 %v6485_v22, %v1976_v21  ;;  %v2772_v22 = vadd.f32 %v2771_v13, %v2770_v50  ;;  %v1458_v36 = vadd.f32 %v1394_v33, %v8022_v6 }
 0x2b9   : > { %v2777_v11 = vadd.f32 %v2776_v34, %v2775_v59 }
 0x2ba   : > { %v2780_v1 = vsel %vm1536_vm6, %v2488_v16, 0.0  ;;  %v1522_v59 = vmax.f32 %v1458_v36, 0.0 }
 0x2bb   : > { %v2781_v49 = vrot.slane %v2780_v1, 4  ;;  %v1863_v30 = vpop.f32.mrf.mxu3  ;;  %v2778_v2 = vrot.slane %v2777_v11, 1 }
 0x2bc   : > { %6203 = vmatmul.msk.f32.gmra.mxu3 %vm1536_vm6, %v1519_v8  ;;  %v1864_v9 = vadd.f32 %v7997_v27, %v1863_v30  ;;  %v3070_v8 = vsel %vm3036_vm8, %v2758_v25, %v3069_v28  ;;  %v8044_v39 = vpop.permute.xlu0 %6503 }
 0x2bd   : > { %v2782_v58 = vadd.f32 %v2781_v49, %v2780_v1  ;;  %v2779_v29 = vadd.f32 %v2778_v2, %v2777_v11  ;;  %v3071_v23 = vsel %vm3038_vm9, %v2765_v38, %v3070_v8 }
 0x2be   : > { %v1977_v24 = vmax.f32 %v1864_v9, 0.0  ;;  %v3072_v20 = vsel %vm3040_vm10, %v2772_v22, %v3071_v23  ;;  %v9501_v9 = vld [vmem:[#allocation21_spill] sm:$0xff] }
 0x2bf   : > { %v2783_v48 = vrot.slane %v2782_v58, 2  ;;  %v3073_v14 = vsel %vm3042_vm11, %v2779_v29, %v3072_v20  ;;  %v1396_v7 = vmul.f32 %v7958_v32, %v9501_v9  ;;  %v9504_v20 = vld [vmem:[#allocation24_spill] sm:$0xff] }
 0x2c0   : > { %v2489_v10 = vmul.f32 %v6486_v43, %v1977_v24  ;;  %v1397_v24 = vmul.f32 %v7958_v32, %v9502_v42  ;;  %v6505_v42 = vunpack.i.l.bf16 %v8044_v39 }
 0x2c1   : > { %v2784_v54 = vadd.f32 %v2783_v48, %v2782_v58  ;;  %v1460_v34 = vadd.f32 %v1396_v7, %v8022_v6 }
 0x2c2   : > { %v2787_v3 = vsel %vm1536_vm6, %v2489_v10, 0.0  ;;  %v1461_v47 = vadd.f32 %v1397_v24, %v8022_v6 }
 0x2c3   : > { %v2788_v37 = vrot.slane %v2787_v3, 4  ;;  %v1866_v35 = vpop.f32.mrf.mxu3  ;;  %v2785_v12 = vrot.slane %v2784_v54, 1  ;;  %v1524_v43 = vmax.f32 %v1460_v34, 0.0 }
 0x2c4   : > { %6204 = vmatmul.msk.f32.gmra.mxu3 %vm1536_vm6, %v1520_v18  ;;  %v8055_v30 = vpop.permute.xlu0 %6518  ;;  %v1867_v45 = vadd.f32 %v7997_v27, %v1866_v35  ;;  %v1525_v5 = vmax.f32 %v1461_v47, 0.0 }
 0x2c5   : > { %v2789_v51 = vadd.f32 %v2788_v37, %v2787_v3  ;;  %v2786_v21 = vadd.f32 %v2785_v12, %v2784_v54  ;;  %v6494_v54 = vpop.permute.xlu1 %6493  ;;  %v6490_v12 = vunpack.i.l.bf16 %v8033_v4 }
 0x2c6   : > { %v1978_v37 = vmax.f32 %v1867_v45, 0.0  ;;  %v6495_v2 = vunpack.i.l.bf16 %v6494_v54  ;;  %v6496_v60 = vunpack.i.h.bf16 %v6494_v54 }
 0x2c7   : > { %v2790_v61 = vrot.slane %v2789_v51, 2  ;;  %v3074_v15 = vsel %vm3044_vm12, %v2786_v21, %v3073_v14 }
 0x2c9   : > { %v2791_v41 = vadd.f32 %v2790_v61, %v2789_v51  ;;  %v1462_v61 = vadd.f32 %v1398_v17, %v8022_v6 }
 0x2cb   : > { %v1869_v55 = vpop.f32.mrf.mxu3  ;;  %v2792_v53 = vrot.slane %v2791_v41, 1 }
 0x2cc   : > { %6205 = vmatmul.msk.f32.gmra.mxu3 %vm1536_vm6, %v1521_v26  ;;  %v8063_v18 = vpop.permute.xlu0 %6533  ;;  %v1870_v56 = vadd.f32 %v7997_v27, %v1869_v55  ;;  %v6499_v26 = vpop.permute.xlu2 %6498 }
 0x2cd   : > { %v2793_v16 = vadd.f32 %v2792_v53, %v2791_v41  ;;  %v6500_v19 = vunpack.i.l.bf16 %v6499_v26  ;;  %v2490_v41 = vmul.f32 %v6490_v12, %v1978_v37  ;;  %v6501_v8 = vunpack.i.h.bf16 %v6499_v26 }
 0x2ce   : > { %v1979_v11 = vmax.f32 %v1870_v56, 0.0  ;;  %v1526_v53 = vmax.f32 %v1462_v61, 0.0 }
 0x2cf   : > { %v3075_v1 = vsel %vm3046_vm13, %v2793_v16, %v3074_v15  ;;  %v1399_v16 = vmul.f32 %v7958_v32, %v9504_v20  ;;  %v2794_v14 = vsel %vm1536_vm6, %v2490_v41, 0.0 }
 0x2d0   : > { %6216 = vmatmul.msk.f32.gmra.mxu0 %vm1536_vm6, %v3075_v1  ;;  %v2491_v38 = vmul.f32 %v6491_v46, %v1979_v11 }
 0x2d2   : > { %v2801_v4 = vsel %vm1536_vm6, %v2491_v38, 0.0 }
 0x2d3   : > { %v1872_v49 = vpop.f32.mrf.mxu3  ;;  %v2802_v1 = vrot.slane %v2801_v4, 4 }
 0x2d4   : > { %6206 = vmatmul.msk.f32.gmra.mxu3 %vm1536_vm6, %v1522_v59  ;;  %v1873_v48 = vadd.f32 %v7997_v27, %v1872_v49  ;;  %v8081_v44 = vpop.permute.xlu0 %3158  ;;  %v1463_v49 = vadd.f32 %v1399_v16, %v8022_v6 }
 0x2d6   : > { %v1980_v3 = vmax.f32 %v1873_v48, 0.0  ;;  %v1527_v47 = vmax.f32 %v1463_v49, 0.0 }
 0x2d8   : > { %v2492_v33 = vmul.f32 %v6495_v2, %v1980_v3 }
 0x2da   : > { %v2808_v23 = vsel %vm1536_vm6, %v2492_v33, 0.0 }
 0x2db   : > { %v1875_v58 = vpop.f32.mrf.mxu3  ;;  %v2809_v52 = vrot.slane %v2808_v23, 4 }
 0x2dc   : > { %6207 = vmatmul.msk.f32.gmra.mxu3 %vm1536_vm6, %v1523_v31  ;;  %v1876_v50 = vadd.f32 %v7997_v27, %v1875_v58  ;;  %v2795_v31 = vrot.slane %v2794_v14, 4  ;;  %v2803_v58 = vadd.f32 %v2802_v1, %v2801_v4 }
 0x2dd   : > { %v2810_v24 = vadd.f32 %v2809_v52, %v2808_v23 }
 0x2de   : > { %v1981_v35 = vmax.f32 %v1876_v50, 0.0  ;;  %v2796_v48 = vadd.f32 %v2795_v31, %v2794_v14  ;;  %v2804_v6 = vrot.slane %v2803_v58, 2 }
 0x2df   : > { %v2811_v11 = vrot.slane %v2810_v24, 2 }
 0x2e0   : > { %v2493_v28 = vmul.f32 %v6496_v60, %v1981_v35  ;;  %v2797_v54 = vrot.slane %v2796_v48, 2  ;;  %v2805_v35 = vadd.f32 %v2804_v6, %v2803_v58 }
 0x2e1   : > { %v2812_v26 = vadd.f32 %v2811_v11, %v2810_v24 }
 0x2e2   : > { %v2815_v59 = vsel %vm1536_vm6, %v2493_v28, 0.0  ;;  %v2798_v60 = vadd.f32 %v2797_v54, %v2796_v48 }
 0x2e3   : > { %v1878_v62 = vpop.f32.mrf.mxu3  ;;  %v2816_v9 = vrot.slane %v2815_v59, 4  ;;  %v2813_v41 = vrot.slane %v2812_v26, 1 }
 0x2e4   : > { %6208 = vmatmul.msk.f32.gmra.mxu3 %vm1536_vm6, %v1524_v43  ;;  %v1879_v10 = vadd.f32 %v7997_v27, %v1878_v62 }
 0x2e5   : > { %v2817_v62 = vadd.f32 %v2816_v9, %v2815_v59  ;;  %v2814_v16 = vadd.f32 %v2813_v41, %v2812_v26 }
 0x2e6   : > { %v3130_v13 = vpop.f32.mrf.mxu0  ;;  %v1982_v51 = vmax.f32 %v1879_v10, 0.0 }
 0x2e7   : > { %v8084_v25 = vadd.f32 %v8075_v40, %v3130_v13  ;;  %v2818_v3 = vrot.slane %v2817_v62, 2 }
 0x2e8   : > { %v2494_v21 = vmul.f32 %v6500_v19, %v1982_v51  ;;  %v6506_v51 = vunpack.i.h.bf16 %v8044_v39 }
 0x2e9   : > { %v3161_v29 = vmul.f32 %v8081_v44, %v8084_v25  ;;  %v2819_v38 = vadd.f32 %v2818_v3, %v2817_v62 }
 0x2ea   : > { %v2822_v0 = vsel %vm1536_vm6, %v2494_v21, 0.0  ;;  %v2799_v21 = vrot.slane %v2798_v60, 1 }
 0x2eb   : > { %v1881_v22 = vpop.f32.mrf.mxu3  ;;  %3222 = vrot.lane.b32.xlu1 %v3161_v29, %s9419_s25  ;;  %v2823_v34 = vrot.slane %v2822_v0, 4 }
 0x2ec   : > { %6209 = vmatmul.msk.f32.gmra.mxu3 %vm1536_vm6, %v1525_v5  ;;  %v1882_v36 = vadd.f32 %v7997_v27, %v1881_v22  ;;  %v2806_v22 = vrot.slane %v2805_v35, 1  ;;  %v2800_v59 = vadd.f32 %v2799_v21, %v2798_v60 }
 0x2ed   : > { %v2824_v45 = vadd.f32 %v2823_v34, %v2822_v0 }
 0x2ee   : > { %v1983_v55 = vmax.f32 %v1882_v36, 0.0  ;;  %v2807_v23 = vadd.f32 %v2806_v22, %v2805_v35 }
 0x2ef   : > { %v2825_v46 = vrot.slane %v2824_v45, 2 }
 0x2f0   : > { %v2495_v15 = vmul.f32 %v6501_v8, %v1983_v55  ;;  %v2820_v8 = vrot.slane %v2819_v38, 1  ;;  %v3076_v52 = vsel %vm3034_vm7, %v2807_v23, %v2800_v59  ;;  %v6521_v23 = vunpack.i.h.bf16 %v8055_v30 }
 0x2f1   : > { %v2826_v19 = vadd.f32 %v2825_v46, %v2824_v45  ;;  %v3077_v9 = vsel %vm3036_vm8, %v2814_v16, %v3076_v52 }
 0x2f2   : > { %v2829_v57 = vsel %vm1536_vm6, %v2495_v15, 0.0  ;;  %v2821_v15 = vadd.f32 %v2820_v8, %v2819_v38 }
 0x2f3   : > { %v1884_v7 = vpop.f32.mrf.mxu3  ;;  %v2830_v43 = vrot.slane %v2829_v57, 4 }
 0x2f4   : > { %6210 = vmatmul.msk.f32.gmra.mxu3 %vm1536_vm6, %v1526_v53  ;;  %v1885_v32 = vadd.f32 %v7997_v27, %v1884_v7  ;;  %v2827_v53 = vrot.slane %v2826_v19, 1 }
 0x2f5   : > { %v2831_v10 = vadd.f32 %v2830_v43, %v2829_v57 }
 0x2f6   : > { %v1984_v56 = vmax.f32 %v1885_v32, 0.0  ;;  %v2828_v0 = vadd.f32 %v2827_v53, %v2826_v19  ;;  %v3078_v32 = vsel %vm3038_vm9, %v2821_v15, %v3077_v9 }
 0x2f7   : > { %v2832_v13 = vrot.slane %v2831_v10, 2 }
 0x2f8   : > { %v2496_v50 = vmul.f32 %v6505_v42, %v1984_v56  ;;  %v3079_v58 = vsel %vm3040_vm10, %v2828_v0, %v3078_v32 }
 0x2f9   : > { %v2833_v29 = vadd.f32 %v2832_v13, %v2831_v10 }
 0x2fa   : > { %v2836_v5 = vsel %vm1536_vm6, %v2496_v50, 0.0 }
 0x2fb   : > { %v2837_v63 = vrot.slane %v2836_v5, 4  ;;  %v2834_v39 = vrot.slane %v2833_v29, 1 }
 0x2fc   : > { %6211 = vmatmul.msk.f32.gmra.mxu3 %vm1536_vm6, %v1527_v47  ;;  %v1887_v17 = vpop.f32.mrf.mxu3 }
 0x2fd   : > { %v1888_v37 = vadd.f32 %v7997_v27, %v1887_v17  ;;  %v2838_v2 = vadd.f32 %v2837_v63, %v2836_v5  ;;  %v2835_v57 = vadd.f32 %v2834_v39, %v2833_v29 }
 0x2ff   : > { %v1985_v12 = vmax.f32 %v1888_v37, 0.0  ;;  %v2839_v61 = vrot.slane %v2838_v2, 2  ;;  %v3080_v42 = vsel %vm3042_vm11, %v2835_v57, %v3079_v58 }
 0x301   : > { %v2497_v33 = vmul.f32 %v6506_v51, %v1985_v12  ;;  %v2840_v28 = vadd.f32 %v2839_v61, %v2838_v2  ;;  %v6509_v51 = vpop.permute.xlu1 %6508  ;;  %v6514_v12 = vpop.permute.xlu2 %6513 }
 0x302   : > { %v6511_v60 = vunpack.i.h.bf16 %v6509_v51  ;;  %v6515_v19 = vunpack.i.l.bf16 %v6514_v12  ;;  %v6516_v22 = vunpack.i.h.bf16 %v6514_v12  ;;  %v6510_v29 = vunpack.i.l.bf16 %v6509_v51 }
 0x303   : > { %v2843_v36 = vsel %vm1536_vm6, %v2497_v33, 0.0  ;;  %v2841_v14 = vrot.slane %v2840_v28, 1 }
 0x304   : > { %v2844_v4 = vrot.slane %v2843_v36, 4 }
 0x305   : > { %v1890_v55 = vpop.f32.mrf.mxu3  ;;  %v2842_v31 = vadd.f32 %v2841_v14, %v2840_v28  ;;  %v6520_v28 = vunpack.i.l.bf16 %v8055_v30 }
 0x306   : > { %v2845_v20 = vadd.f32 %v2844_v4, %v2843_v36  ;;  %v1891_v46 = vadd.f32 %v7997_v27, %v1890_v55 }
 0x307   : > { %v3081_v24 = vsel %vm3044_vm12, %v2842_v31, %v3080_v42 }
 0x308   : > { %v2846_v1 = vrot.slane %v2845_v20, 2  ;;  %v1986_v38 = vmax.f32 %v1891_v46, 0.0 }
 0x30a   : > { %v2847_v49 = vadd.f32 %v2846_v1, %v2845_v20  ;;  %v2498_v8 = vmul.f32 %v6510_v29, %v1986_v38 }
 0x30c   : > { %v2848_v34 = vrot.slane %v2847_v49, 1  ;;  %v2850_v14 = vsel %vm1536_vm6, %v2498_v8, 0.0 }
 0x30e   : > { %v1893_v7 = vpop.f32.mrf.mxu3  ;;  %v2849_v43 = vadd.f32 %v2848_v34, %v2847_v49  ;;  %v2851_v49 = vrot.slane %v2850_v14, 4  ;;  %v6524_v34 = vpop.permute.xlu1 %6523 }
 0x30f   : > { %v1894_v54 = vadd.f32 %v7997_v27, %v1893_v7 }
 0x310   : > { %v3082_v56 = vsel %vm3046_vm13, %v2849_v43, %v3081_v24  ;;  %v6525_v43 = vunpack.i.l.bf16 %v6524_v34 }
 0x311   : > { %6217 = vmatmul.msk.f32.gmra.mxu0 %vm1536_vm6, %v3082_v56  ;;  %v1987_v2 = vmax.f32 %v1894_v54, 0.0  ;;  %v2852_v56 = vadd.f32 %v2851_v49, %v2850_v14 }
 0x313   : > { %v3133_v47 = vpop.f32.mrf.mxu0  ;;  %v2499_v41 = vmul.f32 %v6511_v60, %v1987_v2  ;;  %v2853_v54 = vrot.slane %v2852_v56, 2 }
 0x314   : > { %v8118_v48 = vadd.f32 %v8075_v40, %v3133_v47 }
 0x315   : > { %v2857_v39 = vsel %vm1536_vm6, %v2499_v41, 0.0  ;;  %v2854_v38 = vadd.f32 %v2853_v54, %v2852_v56 }
 0x316   : > { %v3162_v45 = vmul.f32 %v8081_v44, %v8118_v48  ;;  %v2858_v1 = vrot.slane %v2857_v39, 4 }
 0x317   : > { %v1896_v62 = vpop.f32.mrf.mxu3  ;;  %v2855_v8 = vrot.slane %v2854_v38, 1 }
 0x318   : > { %3250 = vrot.lane.b32.xlu2 %v3162_v45, %s9419_s25  ;;  %v1897_v63 = vadd.f32 %v7997_v27, %v1896_v62  ;;  %v2859_v32 = vadd.f32 %v2858_v1, %v2857_v39 }
 0x31a   : > { %v1988_v26 = vmax.f32 %v1897_v63, 0.0 }
 0x31b   : > { %v3136_v50 = vpop.f32.mrf.mxu0 }
 0x31c   : > { %v8124_v6 = vadd.f32 %v8075_v40, %v3136_v50  ;;  %v2500_v36 = vmul.f32 %v6515_v19, %v1988_v26  ;;  %v2860_v50 = vrot.slane %v2859_v32, 2  ;;  %v6526_v26 = vunpack.i.h.bf16 %v6524_v34 }
 0x31e   : > { %v3163_v11 = vmul.f32 %v8081_v44, %v8124_v6  ;;  %v2864_v16 = vsel %vm1536_vm6, %v2500_v36, 0.0 }
 0x31f   : > { %v1899_v10 = vpop.f32.mrf.mxu3  ;;  %v2865_v52 = vrot.slane %v2864_v16, 4 }
 0x320   : > { %3278 = vrot.lane.b32.xlu1 %v3163_v11, %s9419_s25  ;;  %v1900_v37 = vadd.f32 %v7997_v27, %v1899_v10 }
 0x321   : > { %v2866_v42 = vadd.f32 %v2865_v52, %v2864_v16 }
 0x322   : > { %v1989_v61 = vmax.f32 %v1900_v37, 0.0 }
 0x323   : > { %v3139_v5 = vpop.f32.mrf.mxu0  ;;  %v2867_v11 = vrot.slane %v2866_v42, 2 }
 0x324   : > { %v8131_v3 = vadd.f32 %v8075_v40, %v3139_v5  ;;  %v2501_v4 = vmul.f32 %v6516_v22, %v1989_v61 }
 0x325   : > { %v2868_v12 = vadd.f32 %v2867_v11, %v2866_v42 }
 0x326   : > { %v3164_v35 = vmul.f32 %v8081_v44, %v8131_v3  ;;  %v2871_v59 = vsel %vm1536_vm6, %v2501_v4, 0.0 }
 0x327   : > { %v1902_v17 = vpop.f32.mrf.mxu3  ;;  %v2872_v31 = vrot.slane %v2871_v59, 4 }
 0x328   : > { %v1903_v13 = vadd.f32 %v7997_v27, %v1902_v17  ;;  %3306 = vrot.lane.b32.xlu0 %v3164_v35, %s9419_s25 }
 0x329   : > { %v2873_v47 = vadd.f32 %v2872_v31, %v2871_v59 }
 0x32a   : > { %v1990_v33 = vmax.f32 %v1903_v13, 0.0  ;;  %v2861_v13 = vadd.f32 %v2860_v50, %v2859_v32 }
 0x32b   : > { %v2874_v63 = vrot.slane %v2873_v47, 2 }
 0x32c   : > { %v2502_v53 = vmul.f32 %v6520_v28, %v1990_v33  ;;  %v2862_v29 = vrot.slane %v2861_v13, 1  ;;  %v2869_v28 = vrot.slane %v2868_v12, 1 }
 0x32d   : > { %v2875_v61 = vadd.f32 %v2874_v63, %v2873_v47 }
 0x32e   : > { %v2878_v0 = vsel %vm1536_vm6, %v2502_v53, 0.0  ;;  %v2863_v39 = vadd.f32 %v2862_v29, %v2861_v13  ;;  %v2870_v14 = vadd.f32 %v2869_v28, %v2868_v12 }
 0x32f   : > { %v1905_v21 = vpop.f32.mrf.mxu3  ;;  %v2879_v30 = vrot.slane %v2878_v0, 4  ;;  %v2876_v4 = vrot.slane %v2875_v61, 1 }
 0x330   : > { %v1906_v55 = vadd.f32 %v7997_v27, %v1905_v21 }
 0x331   : > { %v2880_v62 = vadd.f32 %v2879_v30, %v2878_v0  ;;  %v2877_v1 = vadd.f32 %v2876_v4, %v2875_v61  ;;  %v6535_v61 = vunpack.i.l.bf16 %v8063_v18 }
 0x332   : > { %v1991_v20 = vmax.f32 %v1906_v55, 0.0 }
 0x333   : > { %v2881_v37 = vrot.slane %v2880_v62, 2 }
 0x334   : > { %v2503_v15 = vmul.f32 %v6521_v23, %v1991_v20 }
 0x335   : > { %v2882_v33 = vadd.f32 %v2881_v37, %v2880_v62 }
 0x336   : > { %v2885_v57 = vsel %vm1536_vm6, %v2503_v15, 0.0  ;;  %v2856_v15 = vadd.f32 %v2855_v8, %v2854_v38 }
 0x337   : > { %v1908_v9 = vpop.f32.mrf.mxu3  ;;  %v2886_v58 = vrot.slane %v2885_v57, 4  ;;  %v2883_v23 = vrot.slane %v2882_v33, 1 }
 0x338   : > { %v1909_v7 = vadd.f32 %v7997_v27, %v1908_v9 }
 0x339   : > { %v2887_v10 = vadd.f32 %v2886_v58, %v2885_v57  ;;  %v2884_v52 = vadd.f32 %v2883_v23, %v2882_v33  ;;  %v3083_v57 = vsel %vm3034_vm7, %v2863_v39, %v2856_v15 }
 0x33a   : > { %v1992_v24 = vmax.f32 %v1909_v7, 0.0  ;;  %v3084_v30 = vsel %vm3036_vm8, %v2870_v14, %v3083_v57 }
 0x33b   : > { %v2888_v2 = vrot.slane %v2887_v10, 2  ;;  %v3085_v32 = vsel %vm3038_vm9, %v2877_v1, %v3084_v30 }
 0x33c   : > { %v2504_v45 = vmul.f32 %v6525_v43, %v1992_v24  ;;  %v3086_v58 = vsel %vm3040_vm10, %v2884_v52, %v3085_v32 }
 0x33d   : > { %v2889_v41 = vadd.f32 %v2888_v2, %v2887_v10  ;;  %v6539_v10 = vpop.permute.xlu1 %6538 }
 0x33e   : > { %v2892_v5 = vsel %vm1536_vm6, %v2504_v45, 0.0 }
 0x33f   : > { %v2893_v17 = vrot.slane %v2892_v5, 4  ;;  %v1911_v46 = vpop.f32.mrf.mxu3  ;;  %v2890_v20 = vrot.slane %v2889_v41, 1 }
 0x340   : > { %v1912_v35 = vadd.f32 %v7997_v27, %v1911_v46 }
 0x341   : > { %v2894_v51 = vadd.f32 %v2893_v17, %v2892_v5  ;;  %v2891_v49 = vadd.f32 %v2890_v20, %v2889_v41  ;;  %v6529_v5 = vpop.permute.xlu2 %6528  ;;  %v6540_v41 = vunpack.i.l.bf16 %v6539_v10 }
 0x342   : > { %v1993_v60 = vmax.f32 %v1912_v35, 0.0  ;;  %v6530_v33 = vunpack.i.l.bf16 %v6529_v5 }
 0x343   : > { %v2895_v19 = vrot.slane %v2894_v51, 2  ;;  %v3087_v24 = vsel %vm3042_vm11, %v2891_v49, %v3086_v58 }
 0x344   : > { %v2505_v22 = vmul.f32 %v6526_v26, %v1993_v60  ;;  %v6531_v26 = vunpack.i.h.bf16 %v6529_v5 }
 0x345   : > { %v2896_v36 = vadd.f32 %v2895_v19, %v2894_v51 }
 0x346   : > { %v2899_v21 = vsel %vm1536_vm6, %v2505_v22, 0.0  ;;  %v6536_v22 = vunpack.i.h.bf16 %v8063_v18 }
 0x347   : > { %v2900_v55 = vrot.slane %v2899_v21, 4  ;;  %v1914_v53 = vpop.f32.mrf.mxu3  ;;  %v2897_v59 = vrot.slane %v2896_v36, 1 }
 0x348   : > { %v1915_v37 = vadd.f32 %v7997_v27, %v1914_v53  ;;  %v6541_v53 = vunpack.i.h.bf16 %v6539_v10 }
 0x349   : > { %v2901_v16 = vadd.f32 %v2900_v55, %v2899_v21  ;;  %v2898_v9 = vadd.f32 %v2897_v59, %v2896_v36  ;;  %v8175_v12 = vpop.permute.xlu2 %6543 }
 0x34a   : > { %v1994_v60 = vmax.f32 %v1915_v37, 0.0  ;;  %v6545_v58 = vunpack.i.l.bf16 %v8175_v12 }
 0x34b   : > { %v2902_v0 = vrot.slane %v2901_v16, 2  ;;  %v3088_v47 = vsel %vm3044_vm12, %v2898_v9, %v3087_v24  ;;  %v8190_v9 = vld [vmem:[%s9395_s12] ss:$0 sm:$0xff] }
 0x34c   : > { %v2506_v21 = vmul.f32 %v6530_v33, %v1994_v60 }
 0x34d   : > { %v2903_v31 = vadd.f32 %v2902_v0, %v2901_v16  ;;  %v3142_v43 = vpop.f32.mrf.mxu0 }
 0x34e   : > { %v8159_v56 = vadd.f32 %v8075_v40, %v3142_v43  ;;  %v2906_v16 = vsel %vm1536_vm6, %v2506_v21, 0.0 }
 0x34f   : > { %v1917_v7 = vpop.f32.mrf.mxu3  ;;  %v2904_v34 = vrot.slane %v2903_v31, 1  ;;  %v2907_v57 = vrot.slane %v2906_v16, 4 }
 0x350   : > { %v3165_v45 = vmul.f32 %v8081_v44, %v8159_v56  ;;  %v1918_v63 = vadd.f32 %v7997_v27, %v1917_v7 }
 0x351   : > { %v2905_v42 = vadd.f32 %v2904_v34, %v2903_v31  ;;  %v2908_v24 = vadd.f32 %v2907_v57, %v2906_v16 }
 0x352   : > { %3334 = vrot.lane.b32.xlu0 %v3165_v45, %s9419_s25  ;;  %v1995_v2 = vmax.f32 %v1918_v63, 0.0 }
 0x353   : > { %v3089_v62 = vsel %vm3046_vm13, %v2905_v42, %v3088_v47  ;;  %v2909_v63 = vrot.slane %v2908_v24, 2 }
 0x354   : > { %6218 = vmatmul.msk.f32.gmra.mxu0 %vm1536_vm6, %v3089_v62  ;;  %v2507_v29 = vmul.f32 %v6531_v26, %v1995_v2  ;;  %v3181_v62 = vmul.f32 %v8190_v9, %v8084_v25 }
 0x355   : > { %v2910_v33 = vadd.f32 %v2909_v63, %v2908_v24 }
 0x356   : > { %v2913_v23 = vsel %vm1536_vm6, %v2507_v29, 0.0 }
 0x357   : > { %v1920_v50 = vpop.f32.mrf.mxu3  ;;  %v2914_v15 = vrot.slane %v2913_v23, 4 }
 0x358   : > { %v1921_v17 = vadd.f32 %v7997_v27, %v1920_v50 }
 0x359   : > { %v2915_v34 = vadd.f32 %v2914_v15, %v2913_v23 }
 0x35a   : > { %v1996_v51 = vmax.f32 %v1921_v17, 0.0 }
 0x35b   : > { %v2916_v10 = vrot.slane %v2915_v34, 2 }
 0x35c   : > { %v2508_v28 = vmul.f32 %v6535_v61, %v1996_v51 }
 0x35d   : > { %v3223_v54 = vpop.permute.xlu1 %3222  ;;  %v2917_v51 = vadd.f32 %v2916_v10, %v2915_v34 }
 0x35e   : > { %6220 = vmatpush.xpose.msk.msra.mxu1 %vm1536_vm6, %v3223_v54  ;;  %v2920_v20 = vsel %vm1536_vm6, %v2508_v28, 0.0 }
 0x35f   : > { %v1923_v11 = vpop.f32.mrf.mxu3  ;;  %v2921_v0 = vrot.slane %v2920_v20, 4  ;;  %v2918_v21 = vrot.slane %v2917_v51, 1 }
 0x360   : > { %v1924_v35 = vadd.f32 %v7997_v27, %v1923_v11 }
 0x361   : > { %6221 = vmatmul.msk.f32.vlgmr.msra.gmra.mxu1 %vm1536_vm6, %v8084_v25  ;;  %v2922_v43 = vadd.f32 %v2921_v0, %v2920_v20  ;;  %v2919_v16 = vadd.f32 %v2918_v21, %v2917_v51 }
 0x362   : > { %v1997_v38 = vmax.f32 %v1924_v35, 0.0  ;;  %v3189_v35 = vsel %vm1536_vm6, %v3181_v62, 0.0 }
 0x363   : > { %v2923_v5 = vrot.slane %v2922_v43, 2 }
 0x364   : > { %v2509_v8 = vmul.f32 %v6536_v22, %v1997_v38  ;;  %v6546_v38 = vunpack.i.h.bf16 %v8175_v12 }
 0x365   : > { %v2924_v61 = vadd.f32 %v2923_v5, %v2922_v43 }
 0x366   : > { %v2927_v14 = vsel %vm1536_vm6, %v2509_v8, 0.0 }
 0x367   : > { %v1926_v46 = vpop.f32.mrf.mxu3  ;;  %v2928_v49 = vrot.slane %v2927_v14, 4 }
 0x368   : > { %v1927_v13 = vadd.f32 %v7997_v27, %v1926_v46 }
 0x369   : > { %v2929_v47 = vadd.f32 %v2928_v49, %v2927_v14 }
 0x36a   : > { %v1998_v19 = vmax.f32 %v1927_v13, 0.0 }
 0x36b   : > { %v2930_v17 = vrot.slane %v2929_v47, 2 }
 0x36c   : > { %v2510_v55 = vmul.f32 %v6540_v41, %v1998_v19  ;;  %v3185_v41 = vmul.f32 %v8190_v9, %v8159_v56 }
 0x36d   : > { %v2931_v22 = vadd.f32 %v2930_v17, %v2929_v47 }
 0x36e   : > { %v2934_v1 = vsel %vm1536_vm6, %v2510_v55, 0.0  ;;  %v3201_v12 = vsel %vm1536_vm6, %v3185_v41, 0.0 }
 0x36f   : > { %v1929_v36 = vpop.f32.mrf.mxu3  ;;  %v2935_v30 = vrot.slane %v2934_v1, 4  ;;  %v2932_v23 = vrot.slane %v2931_v22, 1 }
 0x370   : > { %v1930_v4 = vadd.f32 %v7997_v27, %v1929_v36 }
 0x371   : > { %v2936_v45 = vadd.f32 %v2935_v30, %v2934_v1  ;;  %v2933_v0 = vadd.f32 %v2932_v23, %v2931_v22 }
 0x372   : > { %v1999_v39 = vmax.f32 %v1930_v4, 0.0  ;;  %v3251_v59 = vpop.permute.xlu2 %3250  ;;  %v2925_v4 = vrot.slane %v2924_v61, 1 }
 0x373   : > { %6222 = vmatpush.xpose.msk.msrb.mxu0 %vm1536_vm6, %v3251_v59  ;;  %v2937_v13 = vrot.slane %v2936_v45, 2 }
 0x374   : > { %v2511_v18 = vmul.f32 %v6541_v53, %v1999_v39  ;;  %v2911_v53 = vrot.slane %v2910_v33, 1  ;;  %v2926_v59 = vadd.f32 %v2925_v4, %v2924_v61 }
 0x375   : > { %v2938_v28 = vadd.f32 %v2937_v13, %v2936_v45 }
 0x376   : > { %v2941_v52 = vsel %vm1536_vm6, %v2511_v18, 0.0  ;;  %v2912_v1 = vadd.f32 %v2911_v53, %v2910_v33 }
 0x377   : > { %v1932_v31 = vpop.f32.mrf.mxu3  ;;  %v2942_v32 = vrot.slane %v2941_v52, 4  ;;  %v2939_v20 = vrot.slane %v2938_v28, 1 }
 0x378   : > { %v1933_v7 = vadd.f32 %v7997_v27, %v1932_v31  ;;  %v3090_v49 = vsel %vm3034_vm7, %v2919_v16, %v2912_v1  ;;  %v8287_v1 = vld [vmem:[%s7024_s26 + $0x18] sm:$0xff] }
 0x379   : > { %v2943_v11 = vadd.f32 %v2942_v32, %v2941_v52  ;;  %v2940_v57 = vadd.f32 %v2939_v20, %v2938_v28  ;;  %v3091_v34 = vsel %vm3036_vm8, %v2926_v59, %v3090_v49 }
 0x37a   : > { %v2000_v42 = vmax.f32 %v1933_v7, 0.0 }
 0x37b   : > { %v2944_v26 = vrot.slane %v2943_v11, 2 }
 0x37c   : > { %v2512_v50 = vmul.f32 %v6545_v58, %v2000_v42  ;;  %3190 = vadd.xlane.f32.xlu0 %v3189_v35  ;;  %v3092_v58 = vsel %vm3038_vm9, %v2933_v0, %v3091_v34  ;;  %v3183_v35 = vmul.f32 %v8190_v9, %v8124_v6 }
 0x37d   : > { %v2945_v8 = vadd.f32 %v2944_v26, %v2943_v11  ;;  %v3093_v43 = vsel %vm3040_vm10, %v2940_v57, %v3092_v58 }
 0x37e   : > { %v2948_v54 = vsel %vm1536_vm6, %v2512_v50, 0.0  ;;  %v3195_v13 = vsel %vm1536_vm6, %v3183_v35, 0.0 }
 0x37f   : > { %v2949_v46 = vrot.slane %v2948_v54, 4  ;;  %v1935_v37 = vpop.f32.mrf.mxu3  ;;  %v2946_v14 = vrot.slane %v2945_v8, 1 }
 0x380   : > { %v1936_v2 = vadd.f32 %v7997_v27, %v1935_v37 }
 0x381   : > { %v2950_v60 = vadd.f32 %v2949_v46, %v2948_v54  ;;  %v2947_v31 = vadd.f32 %v2946_v14, %v2945_v8 }
 0x382   : > { %v2001_v19 = vmax.f32 %v1936_v2, 0.0  ;;  %v3184_v2 = vmul.f32 %v8190_v9, %v8131_v3 }
 0x383   : > { %v2951_v29 = vrot.slane %v2950_v60, 2  ;;  %v3094_v47 = vsel %vm3042_vm11, %v2947_v31, %v3093_v43 }
 0x384   : > { %v2513_v36 = vmul.f32 %v6546_v38, %v2001_v19  ;;  %3202 = vadd.xlane.f32.xlu0 %v3201_v12  ;;  %v3198_v51 = vsel %vm1536_vm6, %v3184_v2, 0.0 }
 0x385   : > { %v2952_v27 = vadd.f32 %v2951_v29, %v2950_v60  ;;  %v8259_v29 = vld [vmem:[%s9462_s2 + $0x1] ss:$0 sm:$0xff] }
 0x386   : > { %v2955_v55 = vsel %vm1536_vm6, %v2513_v36, 0.0  ;;  %v8270_v36 = vld [vmem:[%s7024_s26] sm:$0xff] }
 0x387   : > { %v2956_v39 = vrot.slane %v2955_v55, 4  ;;  %v2953_v15 = vrot.slane %v2952_v27, 1 }
 0x389   : > { %v2957_v18 = vadd.f32 %v2956_v39, %v2955_v55  ;;  %v2954_v7 = vadd.f32 %v2953_v15, %v2952_v27  ;;  %v6772_v39 = vld [vmem:[%s9462_s2] ss:$0 sm:$0xff] }
 0x38b   : > { %v2958_v52 = vrot.slane %v2957_v18, 2  ;;  %v3095_v45 = vsel %vm3044_vm12, %v2954_v7, %v3094_v47 }
 0x38d   : > { %v2959_v30 = vadd.f32 %v2958_v52, %v2957_v18 }
 0x38e   : > { %v3145_v42 = vpop.f32.mrf.mxu0 }
 0x38f   : > { %v2960_v32 = vrot.slane %v2959_v30, 1  ;;  %v8210_v62 = vadd.f32 %v8075_v40, %v3145_v42  ;;  %v8298_v42 = vld [vmem:[%s7024_s26 + $0x28] sm:$0xff] }
 0x391   : > { %v2961_v24 = vadd.f32 %v2960_v32, %v2959_v30  ;;  %v3166_v11 = vmul.f32 %v8081_v44, %v8210_v62  ;;  %v3186_v8 = vmul.f32 %v8190_v9, %v8210_v62 }
 0x392   : > { %v3279_v10 = vpop.permute.xlu1 %3278 }
 0x393   : > { %v3096_v50 = vsel %vm3046_vm13, %v2961_v24, %v3095_v45  ;;  %6224 = vmatpush.xpose.msk.msrb.mxu1 %vm1536_vm6, %v3279_v10  ;;  %3362 = vrot.lane.b32.xlu2 %v3166_v11, %s9419_s25  ;;  %v3204_v27 = vsel %vm1536_vm6, %v3186_v8, 0.0  ;;  %v9505_v45 = vld [vmem:[#allocation6_spill] sm:$0xff] }
 0x394   : > { %6219 = vmatmul.msk.f32.gmra.mxu0 %vm1536_vm6, %v3096_v50 }
 0x396   : > { %6225 = vmatmul.msk.f32.vlgmr.msrb.gmra.mxu1 %vm1536_vm6, %v8124_v6 }
 0x39a   : > { %v3307_v5 = vpop.permute.xlu0 %3306 }
 0x39b   : > { %6226 = vmatpush.xpose.msk.msra.mxu2 %vm1536_vm6, %v3307_v5 }
 0x39c   : > { %6223 = vmatmul.msk.f32.vlgmr.msrb.gmra.mxu0 %vm1536_vm6, %v8118_v48 }
 0x39e   : > { %6227 = vmatmul.msk.f32.vlgmr.msra.gmra.mxu2 %vm1536_vm6, %v8131_v3 }
 0x3c4   : > { %v3335_v54 = vpop.permute.xlu0 %3334 }
 0x3c5   : > { %6228 = vmatpush.xpose.msk.msra.mxu1 %vm1536_vm6, %v3335_v54 }
 0x3c8   : > { %6229 = vmatmul.msk.f32.vlgmr.msra.gmra.mxu1 %vm1536_vm6, %v8159_v56 }
 0x3d1   : > { %v3148_v63 = vpop.f32.mrf.mxu0 }
 0x3d2   : > { %v8230_v17 = vadd.f32 %v8075_v40, %v3148_v63 }
 0x3d4   : > { %v3167_v46 = vmul.f32 %v8081_v44, %v8230_v17  ;;  %v3187_v26 = vmul.f32 %v8190_v9, %v8230_v17 }
 0x3d6   : > { %3390 = vrot.lane.b32.xlu2 %v3167_v46, %s9419_s25  ;;  %v3207_v60 = vsel %vm1536_vm6, %v3187_v26, 0.0 }
 0x3de   : > { %v3246_v4 = vpop.f32.mrf.mxu1 }
 0x3ed   : > { %v3363_v37 = vpop.permute.xlu2 %3362 }
 0x3ee   : > { %6230 = vmatpush.xpose.msk.msrb.mxu2 %vm1536_vm6, %v3363_v37 }
 0x3ef   : > { %v3191_v28 = vpop.xlane.xlu0 %3190 }
 0x3f0   : > { %v3213_v21 = vmul.f32 %v8270_v36, %v3191_v28 }
 0x3f1   : > { %6231 = vmatmul.msk.f32.vlgmr.msrb.gmra.mxu2 %vm1536_vm6, %v8210_v62 }
 0x3f2   : > { %v3247_v55 = vadd.f32 %v3246_v4, %v3213_v21 }
 0x3f4   : > { %v3445_v53 = vmul.f32 0.25, %v3247_v55 }
 0x3f6   : > { %v3454_v23 = vsel %vm3453_vm14, %v3445_v53, -inf }
 0x3ff   : > { %3196 = vadd.xlane.f32.xlu2 %v3195_v13  ;;  %v3203_v13 = vpop.xlane.xlu0 %3202 }
 0x407   : > { %3199 = vadd.xlane.f32.xlu2 %v3198_v51 }
 0x40f   : > { %3208 = vadd.xlane.f32.xlu2 %v3207_v60 }
 0x411   : > { %v3151_v38 = vpop.f32.mrf.mxu0 }
 0x412   : > { %v8248_v61 = vadd.f32 %v8075_v40, %v3151_v38 }
 0x413   : > { %v3302_v16 = vpop.f32.mrf.mxu1 }
 0x414   : > { %v3168_v19 = vmul.f32 %v8081_v44, %v8248_v61  ;;  %v3188_v33 = vmul.f32 %v8190_v9, %v8248_v61  ;;  %v3182_v44 = vmul.f32 %v8190_v9, %v8118_v48  ;;  %v8282_v9 = vld [vmem:[%s7024_s26 + $0x10] sm:$0xff] }
 0x416   : > { %3418 = vrot.lane.b32.xlu1 %v3168_v19, %s9419_s25  ;;  %v3210_v22 = vsel %vm1536_vm6, %v3188_v33, 0.0  ;;  %v3192_v41 = vsel %vm1536_vm6, %v3182_v44, 0.0  ;;  %v9506_v33 = vld [vmem:[#allocation8_spill] sm:$0xff]  ;;  %v8325_v44 = vld [vmem:[%s7024_s26 + $0x8] sm:$0xff] }
 0x417   : > { %3211 = vadd.xlane.f32.xlu0 %v3210_v22 }
 0x419   : > { %v3274_v28 = vpop.f32.mrf.mxu0 }
 0x421   : > { %v3330_v57 = vpop.f32.mrf.mxu2 }
 0x427   : > { %3818 = vrot.lane.b32.xlu2 %v8259_v29, %s9421_s30 }
 0x430   : > { %v3391_v40 = vpop.permute.xlu2 %3390 }
 0x431   : > { %6232 = vmatpush.xpose.msk.msrb.mxu1 %vm1536_vm6, %v3391_v40 }
 0x434   : > { %6233 = vmatmul.msk.f32.vlgmr.msrb.gmra.mxu1 %vm1536_vm6, %v8230_v17 }
 0x440   : > { %3193 = vadd.xlane.f32.xlu1 %v3192_v41 }
 0x445   : > { %v3358_v4 = vpop.f32.mrf.mxu1 }
 0x448   : > { %3205 = vadd.xlane.f32.xlu1 %v3204_v27  ;;  %v8329_v27 = vld [vmem:[%s7024_s26 + $0x20] sm:$0xff] }
 0x449   : > { %v3217_v55 = vmul.f32 %v8329_v27, %v3203_v13 }
 0x450   : > { %3455 = vmax.xlane.f32.xlu1 %v3454_v23 }
 0x469   : > { %3169 = vrot.lane.b32.xlu1 %v6772_v39, %s9417_s28 }
 0x472   : > { %v3197_v12 = vpop.xlane.xlu2 %3196 }
 0x473   : > { %v3215_v20 = vmul.f32 %v8282_v9, %v3197_v12 }
 0x474   : > { %v3386_v10 = vpop.f32.mrf.mxu2 }
 0x475   : > { %v3303_v14 = vadd.f32 %v3302_v16, %v3215_v20  ;;  %v8334_v16 = vld [vmem:[%s7024_s26 + $0x30] sm:$0xff] }
 0x477   : > { %v3447_v18 = vmul.f32 0.25, %v3303_v14 }
 0x479   : > { %v3460_v59 = vsel %vm3453_vm14, %v3447_v18, -inf }
 0x47a   : > { %3461 = vmax.xlane.f32.xlu0 %v3460_v59  ;;  %v3200_v15 = vpop.xlane.xlu2 %3199 }
 0x47b   : > { %v3216_v0 = vmul.f32 %v8287_v1, %v3200_v15 }
 0x47d   : > { %v3331_v49 = vadd.f32 %v3330_v57, %v3216_v0 }
 0x47f   : > { %v8293_v31 = vmul.f32 0.25, %v3331_v49 }
 0x481   : > { %v3463_v30 = vsel %vm3453_vm14, %v8293_v31, -inf }
 0x482   : > { %v3209_v39 = vpop.xlane.xlu2 %3208 }
 0x483   : > { %v3219_v14 = vmul.f32 %v8334_v16, %v3209_v39 }
 0x488   : > { %v3419_v52 = vpop.permute.xlu1 %3418 }
 0x489   : > { %6234 = vmatpush.xpose.msk.msra.mxu2 %vm1536_vm6, %v3419_v52 }
 0x48a   : > { %v8317_v51 = vpop.xlane.xlu0 %3211 }
 0x48c   : > { %6235 = vmatmul.msk.f32.vlgmr.msra.gmra.mxu2 %vm1536_vm6, %v8248_v61 }
 0x493   : > { %3464 = vmax.xlane.f32.xlu1 %v3463_v30 }
 0x4b1   : > { %v3414_v20 = vpop.f32.mrf.mxu1 }
 0x4b2   : > { %v3415_v15 = vadd.f32 %v3414_v20, %v3219_v14  ;;  %v9508_v14 = vld [vmem:[#allocation7_spill] sm:$0xff] }
 0x4b3   : > { %v3194_v7 = vpop.xlane.xlu1 %3193 }
 0x4b4   : > { %v3214_v41 = vmul.f32 %v8325_v44, %v3194_v7  ;;  %v3451_v57 = vmul.f32 0.25, %v3415_v15 }
 0x4b6   : > { %v3275_v21 = vadd.f32 %v3274_v28, %v3214_v41  ;;  %v3472_v7 = vsel %vm3453_vm14, %v3451_v57, -inf }
 0x4b8   : > { %v3446_v8 = vmul.f32 0.25, %v3275_v21 }
 0x4ba   : > { %v3457_v23 = vsel %vm3453_vm14, %v3446_v8, -inf }
 0x4bb   : > { %v3206_v34 = vpop.xlane.xlu1 %3205 }
 0x4bc   : > { %v3218_v24 = vmul.f32 %v8298_v42, %v3206_v34 }
 0x4be   : > { %v3387_v5 = vadd.f32 %v3386_v10, %v3218_v24 }
 0x4c0   : > { %v8306_v54 = vmul.f32 0.25, %v3387_v5 }
 0x4c2   : > { %v3469_v63 = vsel %vm3453_vm14, %v8306_v54, -inf }
 0x4c3   : > { %v3456_v32 = vpop.xlane.xlu1 %3455 }
 0x4c4   : > { %v3478_v58 = vsub.f32 %v3445_v53, %v3456_v32  ;;  %v3359_v53 = vadd.f32 %v3358_v4, %v3217_v55  ;;  %v8349_v32 = vpop.permute.xlu2 %3818 }
 0x4c6   : > { %v3486_v43 = vmul.f32 1.442695, %v3478_v58  ;;  %v3449_v12 = vmul.f32 0.25, %v3359_v53  ;;  %v3822_v58 = vmul.f32 %v8349_v32, %v8118_v48  ;;  %v3828_v53 = vmul.f32 %v8349_v32, %v8248_v61 }
 0x4c8   : > { %6640 = vpow2.f32 %v3486_v43  ;;  %v3466_v0 = vsel %vm3453_vm14, %v3449_v12, -inf  ;;  %v3821_v43 = vmul.f32 %v8349_v32, %v8084_v25 }
 0x4ce   : > { %v6641_v47 = vpop.eup %6640 }
 0x4cf   : > { %v8302_v50 = vmul.f32 %v6641_v47, %v9505_v45 }
 0x4d1   : > { %v3510_v11 = vsel %vm3453_vm14, %v8302_v50, 0.0 }
 0x4d2   : > { %3511 = vadd.xlane.f32.xlu0 %v3510_v11 }
 0x4da   : > { %3470 = vmax.xlane.f32.xlu0 %v3469_v63 }
 0x4db   : > { %v8310_v46 = vpop.permute.xlu1 %3169 }
 0x4dc   : > { %v3172_v37 = vmul.f32 %v8310_v46, %v8084_v25  ;;  %v3173_v35 = vmul.f32 %v8310_v46, %v8118_v48  ;;  %v3177_v59 = vmul.f32 %v8310_v46, %v8210_v62  ;;  %v3178_v49 = vmul.f32 %v8310_v46, %v8230_v17 }
 0x4dd   : > { %v3179_v30 = vmul.f32 %v8310_v46, %v8248_v61 }
 0x4de   : > { %v6547_v2 = vpack.i.bf16 %v3173_v35, %v3172_v37 }
 0x4df   : > { %v6562_v34 = vpack.i.bf16 %v3179_v30, %v3178_v49 }
 0x4e0   : > { %6548 = vrot.lane.b32.xlu2 %v6547_v2, %s9417_s28 }
 0x4ed   : > { %v3462_v26 = vpop.xlane.xlu0 %3461 }
 0x4ee   : > { %v3480_v60 = vsub.f32 %v3447_v18, %v3462_v26  ;;  %v3176_v18 = vmul.f32 %v8310_v46, %v8159_v56 }
 0x4f0   : > { %v3490_v38 = vmul.f32 1.442695, %v3480_v60  ;;  %v6557_v52 = vpack.i.bf16 %v3177_v59, %v3176_v18  ;;  %v9507_v60 = vld [vmem:[#allocation11_spill] sm:$0xff] }
 0x4f2   : > { %6642 = vpow2.f32 %v3490_v38 }
 0x4f8   : > { %v6643_v19 = vpop.eup %6642 }
 0x4f9   : > { %v8320_v22 = vmul.f32 %v6643_v19, %v9506_v33 }
 0x4fb   : > { %v3516_v40 = vsel %vm3453_vm14, %v8320_v22, 0.0 }
 0x4fc   : > { %3517 = vadd.xlane.f32.xlu1 %v3516_v40  ;;  %v3824_v40 = vmul.f32 %v8349_v32, %v8131_v3 }
 0x509   : > { %3458 = vmax.xlane.f32.xlu2 %v3457_v23 }
 0x511   : > { %3467 = vmax.xlane.f32.xlu2 %v3466_v0 }
 0x515   : > { %6558 = vrot.lane.b32.xlu1 %v6557_v52, %s9417_s28  ;;  %v9509_v52 = vld [vmem:[#allocation9_spill] sm:$0xff] }
 0x519   : > { %3473 = vmax.xlane.f32.xlu2 %v3472_v7 }
 0x51d   : > { %6563 = vrot.lane.b32.xlu1 %v6562_v34, %s9417_s28 }
 0x525   : > { %3907 = vrot.lane.b32.xlu1 %v3822_v58, %s9419_s25  ;;  %v9510_v58 = vld [vmem:[#allocation10_spill] sm:$0xff] }
 0x531   : > { %3882 = vrot.lane.b32.xlu2 %v3821_v43, %s9419_s25 }
 0x53a   : > { %v6549_v24 = vpop.permute.xlu2 %6548 }
 0x53b   : > { %v6551_v47 = vunpack.i.h.bf16 %v6549_v24  ;;  %v6550_v10 = vunpack.i.l.bf16 %v6549_v24 }
 0x53d   : > { %3620 = vmatpush.msra.mxu1 %v6550_v10  ;;  %3647 = vmatpush.msrb.mxu2 %v6551_v47  ;;  %v3442_v47 = vpop.f32.mrf.mxu2  ;;  %v8393_v10 = vld [vmem:[%s7024_s26 + $0x38] sm:$0xff] }
 0x545   : > { %v3512_v11 = vpop.xlane.xlu0 %3511 }
 0x546   : > { %v3534_v5 = vmax.f32 %v3512_v11, 1e-20  ;;  %v9511_v11 = vld [vmem:[#allocation12_spill] sm:$0xff] }
 0x548   : > { %6644 = vrcp.f32 %v3534_v5 }
 0x54d   : > { %v3471_v63 = vpop.xlane.xlu0 %3470 }
 0x54e   : > { %v6645_v37 = vpop.eup %6644  ;;  %v3483_v35 = vsub.f32 %v8306_v54, %v3471_v63  ;;  %v3826_v54 = vmul.f32 %v8349_v32, %v8210_v62 }
 0x54f   : > { %v8359_v13 = vmul.f32 %v6645_v37, %v8302_v50  ;;  %v3465_v50 = vpop.xlane.xlu1 %3464 }
 0x550   : > { %v3496_v2 = vmul.f32 1.442695, %v3483_v35  ;;  %v3481_v28 = vsub.f32 %v8293_v31, %v3465_v50 }
 0x551   : > { %6236 = vmatmul.msk.f32.vlgmr.msra.gmra.mxu1 %vm3453_vm14, %v8359_v13 }
 0x552   : > { %6646 = vpow2.f32 %v3496_v2  ;;  %v3492_v55 = vmul.f32 1.442695, %v3481_v28  ;;  %v3825_v28 = vmul.f32 %v8349_v32, %v8159_v56 }
 0x558   : > { %v6647_v26 = vpop.eup %6646 }
 0x559   : > { %v8364_v38 = vmul.f32 %v6647_v26, %v9507_v60 }
 0x55b   : > { %v3525_v19 = vsel %vm3453_vm14, %v8364_v38, 0.0 }
 0x55c   : > { %3526 = vadd.xlane.f32.xlu2 %v3525_v19 }
 0x574   : > { %3957 = vrot.lane.b32.xlu2 %v3824_v40, %s9419_s25 }
 0x57c   : > { %4007 = vrot.lane.b32.xlu2 %v3826_v54, %s9419_s25  ;;  %v3459_v41 = vpop.xlane.xlu2 %3458  ;;  %v3174_v54 = vmul.f32 %v8310_v46, %v8124_v6 }
 0x57d   : > { %v3479_v21 = vsub.f32 %v3446_v8, %v3459_v41  ;;  %v3175_v41 = vmul.f32 %v8310_v46, %v8131_v3 }
 0x57f   : > { %v3488_v4 = vmul.f32 1.442695, %v3479_v21 }
 0x581   : > { %6648 = vpow2.f32 %v3488_v4  ;;  %v6552_v4 = vpack.i.bf16 %v3175_v41, %v3174_v54  ;;  %v9512_v41 = vld [vmem:[#allocation13_spill] sm:$0xff] }
 0x582   : > { %6650 = vpow2.f32 %v3492_v55  ;;  %v3827_v55 = vmul.f32 %v8349_v32, %v8230_v17 }
 0x584   : > { %4057 = vrot.lane.b32.xlu2 %v3828_v53, %s9419_s25  ;;  %v3468_v23 = vpop.xlane.xlu2 %3467 }
 0x585   : > { %v3482_v39 = vsub.f32 %v3449_v12, %v3468_v23 }
 0x587   : > { %v6649_v20 = vpop.eup %6648  ;;  %v3494_v59 = vmul.f32 1.442695, %v3482_v39 }
 0x588   : > { %v8379_v18 = vmul.f32 %v6649_v20, %v9508_v14  ;;  %v6651_v8 = vpop.eup %6650 }
 0x589   : > { %6652 = vpow2.f32 %v3494_v59  ;;  %v8384_v49 = vmul.f32 %v6651_v8, %v9509_v52 }
 0x58a   : > { %v3513_v31 = vsel %vm3453_vm14, %v8379_v18, 0.0 }
 0x58b   : > { %3514 = vadd.xlane.f32.xlu0 %v3513_v31  ;;  %v3519_v12 = vsel %vm3453_vm14, %v8384_v49, 0.0 }
 0x58c   : > { %v3474_v15 = vpop.xlane.xlu2 %3473 }
 0x58d   : > { %v3484_v0 = vsub.f32 %v3451_v57, %v3474_v15  ;;  %v3220_v57 = vmul.f32 %v8393_v10, %v8317_v51  ;;  %v8410_v51 = vld [vmem:[%s9395_s12 + $0x1] ss:$0 sm:$0xff]  ;;  %v3518_v15 = vpop.xlane.xlu1 %3517 }
 0x58e   : > { %v3843_v19 = vmul.f32 %v8410_v51, %v8124_v6  ;;  %v3846_v50 = vmul.f32 %v8410_v51, %v8210_v62  ;;  %v3842_v46 = vmul.f32 %v8410_v51, %v8118_v48  ;;  %v3845_v20 = vmul.f32 %v8410_v51, %v8159_v56 }
 0x58f   : > { %v3498_v30 = vmul.f32 1.442695, %v3484_v0  ;;  %v6653_v7 = vpop.eup %6652  ;;  %v3443_v63 = vadd.f32 %v3442_v47, %v3220_v57  ;;  %v3847_v31 = vmul.f32 %v8410_v51, %v8230_v17 }
 0x590   : > { %v8390_v43 = vmul.f32 %v6653_v7, %v9510_v58  ;;  %v3855_v40 = vsel %vm1536_vm6, %v3843_v19, 0.0  ;;  %v3864_v21 = vsel %vm1536_vm6, %v3846_v50, 0.0  ;;  %v3852_v39 = vsel %vm1536_vm6, %v3842_v46, 0.0 }
 0x591   : > { %6654 = vpow2.f32 %v3498_v30  ;;  %v3452_v2 = vmul.f32 0.25, %v3443_v63  ;;  %v3861_v59 = vsel %vm1536_vm6, %v3845_v20, 0.0  ;;  %v3867_v8 = vsel %vm1536_vm6, %v3847_v31, 0.0 }
 0x592   : > { %v3522_v35 = vsel %vm3453_vm14, %v8390_v43, 0.0  ;;  %v3536_v19 = vmax.f32 %v3518_v15, 1e-20 }
 0x593   : > { %3520 = vadd.xlane.f32.xlu0 %v3519_v12  ;;  %v3475_v26 = vsel %vm3453_vm14, %v3452_v2, -inf }
 0x594   : > { %v3883_v34 = vpop.permute.xlu2 %3882 }
 0x595   : > { %6244 = vmatpush.xpose.msk.msra.mxu0 %vm1536_vm6, %v3883_v34  ;;  %v6559_v12 = vpop.permute.xlu1 %6558 }
 0x596   : > { %v6560_v15 = vunpack.i.l.bf16 %v6559_v12 }
 0x597   : > { %v6655_v24 = vpop.eup %6654 }
 0x598   : > { %6245 = vmatmul.msk.f32.vlgmr.msra.gmra.mxu0 %vm1536_vm6, %v8084_v25  ;;  %v8400_v5 = vmul.f32 %v6655_v24, %v9511_v11 }
 0x59a   : > { %v3528_v37 = vsel %vm3453_vm14, %v8400_v5, 0.0 }
 0x59b   : > { %3529 = vadd.xlane.f32.xlu1 %v3528_v37  ;;  %3523 = vadd.xlane.f32.xlu0 %v3522_v35 }
 0x59d   : > { %v6564_v47 = vpop.permute.xlu1 %6563 }
 0x5a3   : > { %3476 = vmax.xlane.f32.xlu0 %v3475_v26 }
 0x5a5   : > { %v3908_v63 = vpop.permute.xlu1 %3907 }
 0x5ad   : > { %3856 = vadd.xlane.f32.xlu2 %v3855_v40 }
 0x5b4   : > { %3982 = vrot.lane.b32.xlu1 %v3825_v28, %s9419_s25 }
 0x5b5   : > { %3865 = vadd.xlane.f32.xlu2 %v3864_v21 }
 0x5b7   : > { %6553 = vrot.lane.b32.xlu0 %v6552_v4, %s9417_s28 }
 0x5bc   : > { %4032 = vrot.lane.b32.xlu1 %v3827_v55, %s9419_s25 }
 0x5cf   : > { %v3527_v53 = vpop.xlane.xlu2 %3526 }
 0x5d0   : > { %v3539_v21 = vmax.f32 %v3527_v53, 1e-20  ;;  %v6566_v53 = vunpack.i.h.bf16 %v6564_v47 }
 0x5d7   : > { %v3958_v23 = vpop.permute.xlu2 %3957 }
 0x5d8   : > { %6250 = vmatpush.xpose.msk.msrb.mxu0 %vm1536_vm6, %v3958_v23 }
 0x5db   : > { %6251 = vmatmul.msk.f32.vlgmr.msrb.gmra.mxu0 %vm1536_vm6, %v8131_v3 }
 0x5e6   : > { %3853 = vadd.xlane.f32.xlu1 %v3852_v39 }
 0x5ee   : > { %3862 = vadd.xlane.f32.xlu1 %v3861_v59 }
 0x5f6   : > { %3868 = vadd.xlane.f32.xlu1 %v3867_v8  ;;  %v6561_v8 = vunpack.i.h.bf16 %v6559_v12 }
 0x5fe   : > { %v3515_v0 = vpop.xlane.xlu0 %3514 }
 0x5ff   : > { %v3535_v30 = vmax.f32 %v3515_v0, 1e-20  ;;  %v6565_v0 = vunpack.i.l.bf16 %v6564_v47  ;;  %v3823_v47 = vmul.f32 %v8349_v32, %v8124_v6  ;;  %v3841_v32 = vmul.f32 %v8410_v51, %v8084_v25 }
 0x601   : > { %6656 = vrcp.f32 %v3535_v30 }
 0x606   : > { %v3521_v7 = vpop.xlane.xlu0 %3520 }
 0x607   : > { %v6657_v34 = vpop.eup %6656  ;;  %v3537_v40 = vmax.f32 %v3521_v7, 1e-20 }
 0x608   : > { %v8442_v24 = vmul.f32 %v6657_v34, %v8379_v18 }
 0x60a   : > { %6237 = vmatmul.msk.f32.vlgmr.msrb.gmra.mxu2 %vm3453_vm14, %v8442_v24 }
 0x60e   : > { %v3524_v57 = vpop.xlane.xlu0 %3523  ;;  %v3530_v50 = vpop.xlane.xlu1 %3529 }
 0x60f   : > { %v3538_v4 = vmax.f32 %v3524_v57, 1e-20  ;;  %v3540_v30 = vmax.f32 %v3530_v50, 1e-20 }
 0x615   : > { %v3903_v50 = vpop.f32.mrf.mxu0 }
 0x616   : > { %v3477_v37 = vpop.xlane.xlu0 %3476 }
 0x617   : > { %v3485_v35 = vsub.f32 %v3452_v2, %v3477_v37 }
 0x619   : > { %v3500_v26 = vmul.f32 1.442695, %v3485_v35 }
 0x61b   : > { %6658 = vpow2.f32 %v3500_v26 }
 0x61c   : > { %6660 = vrcp.f32 %v3536_v19 }
 0x61d   : > { %6662 = vrcp.f32 %v3537_v40 }
 0x61e   : > { %6664 = vrcp.f32 %v3539_v21 }
 0x61f   : > { %6666 = vrcp.f32 %v3538_v4 }
 0x620   : > { %6668 = vrcp.f32 %v3540_v30 }
 0x621   : > { %v6659_v54 = vpop.eup %6658 }
 0x622   : > { %v8447_v28 = vmul.f32 %v6659_v54, %v9512_v41  ;;  %v6661_v23 = vpop.eup %6660 }
 0x623   : > { %v6663_v2 = vpop.eup %6662  ;;  %v8452_v59 = vmul.f32 %v6661_v23, %v8320_v22 }
 0x624   : > { %v3531_v18 = vsel %vm3453_vm14, %v8447_v28, 0.0  ;;  %v8455_v31 = vmul.f32 %v6663_v2, %v8384_v49  ;;  %v6665_v7 = vpop.eup %6664 }
 0x625   : > { %3532 = vadd.xlane.f32.xlu0 %v3531_v18  ;;  %v6667_v49 = vpop.eup %6666  ;;  %v8463_v12 = vmul.f32 %v6665_v7, %v8364_v38  ;;  %v4008_v38 = vpop.permute.xlu2 %4007 }
 0x626   : > { %v3983_v55 = vpop.permute.xlu1 %3982  ;;  %v8466_v34 = vmul.f32 %v6667_v49, %v8390_v43  ;;  %v6669_v57 = vpop.eup %6668 }
 0x627   : > { %v8479_v43 = vmul.f32 %v6669_v57, %v8400_v5  ;;  %v3849_v5 = vsel %vm1536_vm6, %v3841_v32, 0.0  ;;  %v8497_v18 = vpop.f32.mrf.mxu1 }
 0x629   : > { %v6554_v46 = vpop.permute.xlu0 %6553 }
 0x62a   : > { %v6556_v39 = vunpack.i.h.bf16 %v6554_v46  ;;  %v6555_v20 = vunpack.i.l.bf16 %v6554_v46 }
 0x62c   : > { %3674 = vmatpush.msrb.mxu1 %v6555_v20  ;;  %3701 = vmatpush.msra.mxu2 %v6556_v39 }
 0x62d   : > { %6238 = vmatmul.msk.f32.vlgmr.msrb.gmra.mxu1 %vm3453_vm14, %v8452_v59  ;;  %6239 = vmatmul.msk.f32.vlgmr.msra.gmra.mxu2 %vm3453_vm14, %v8455_v31  ;;  %v4058_v37 = vpop.permute.xlu2 %4057 }
 0x62e   : > { %3728 = vmatpush.msra.mxu1 %v6560_v15  ;;  %3755 = vmatpush.msrb.mxu2 %v6561_v8  ;;  %v4033_v22 = vpop.permute.xlu1 %4032 }
 0x62f   : > { %6256 = vmatpush.xpose.msk.msra.mxu0 %vm1536_vm6, %v4033_v22 }
 0x630   : > { %3782 = vmatpush.msrb.mxu1 %v6565_v0  ;;  %3809 = vmatpush.msra.mxu2 %v6566_v53 }
 0x632   : > { %6257 = vmatmul.msk.f32.vlgmr.msra.gmra.mxu0 %vm1536_vm6, %v8230_v17 }
 0x635   : > { %6240 = vmatmul.msk.f32.vlgmr.msra.gmra.mxu1 %vm3453_vm14, %v8466_v34  ;;  %6241 = vmatmul.msk.f32.vlgmr.msrb.gmra.mxu2 %vm3453_vm14, %v8463_v12 }
 0x636   : > { %6246 = vmatpush.xpose.msk.msra.mxu1 %vm1536_vm6, %v3908_v63  ;;  %v3844_v63 = vmul.f32 %v8410_v51, %v8131_v3 }
 0x638   : > { %v3858_v35 = vsel %vm1536_vm6, %v3844_v63, 0.0 }
 0x639   : > { %3932 = vrot.lane.b32.xlu0 %v3823_v47, %s9419_s25 }
 0x63d   : > { %6242 = vmatmul.msk.f32.vlgmr.msrb.gmra.mxu1 %vm3453_vm14, %v8479_v43 }
 0x63e   : > { %6252 = vmatpush.xpose.msk.msrb.mxu1 %vm1536_vm6, %v3983_v55 }
 0x645   : > { %6247 = vmatmul.msk.f32.vlgmr.msra.gmra.mxu1 %vm1536_vm6, %v8118_v48 }
 0x646   : > { %6258 = vmatpush.xpose.msk.msra.mxu1 %vm1536_vm6, %v4058_v37 }
 0x64d   : > { %6253 = vmatmul.msk.f32.vlgmr.msrb.gmra.mxu1 %vm1536_vm6, %v8159_v56 }
 0x655   : > { %6259 = vmatmul.msk.f32.vlgmr.msra.gmra.mxu1 %vm1536_vm6, %v8248_v61 }
 0x658   : > { %v3978_v55 = vpop.f32.mrf.mxu0 }
 0x659   : > { %v3854_v26 = vpop.xlane.xlu1 %3853 }
 0x65a   : > { %v3874_v30 = vmul.f32 %v8325_v44, %v3854_v26  ;;  %v3848_v26 = vmul.f32 %v8410_v51, %v8248_v61 }
 0x661   : > { %v8499_v21 = vpop.xlane.xlu1 %3862 }
 0x663   : > { %3850 = vadd.xlane.f32.xlu0 %v3849_v5 }
 0x669   : > { %v3869_v46 = vpop.xlane.xlu1 %3868 }
 0x66a   : > { %v3879_v39 = vmul.f32 %v8334_v16, %v3869_v46 }
 0x66b   : > { %3859 = vadd.xlane.f32.xlu0 %v3858_v35 }
 0x698   : > { %v3533_v19 = vpop.xlane.xlu0 %3532 }
 0x699   : > { %v3541_v40 = vmax.f32 %v3533_v19, 1e-20 }
 0x69b   : > { %6670 = vrcp.f32 %v3541_v40  ;;  %v3870_v40 = vsel %vm1536_vm6, %v3848_v26, 0.0 }
 0x6a1   : > { %v6671_v54 = vpop.eup %6670 }
 0x6a2   : > { %v8502_v4 = vmul.f32 %v6671_v54, %v8447_v28 }
 0x6a4   : > { %6243 = vmatmul.msk.f32.vlgmr.msra.gmra.mxu2 %vm3453_vm14, %v8502_v4 }
 0x6aa   : > { %v8506_v23 = vpop.f32.mrf.mxu1 }
 0x6ab   : > { %v3933_v2 = vpop.permute.xlu0 %3932 }
 0x6ac   : > { %6248 = vmatpush.xpose.msk.msrb.mxu2 %vm1536_vm6, %v3933_v2  ;;  %v3857_v2 = vpop.xlane.xlu2 %3856 }
 0x6af   : > { %6249 = vmatmul.msk.f32.vlgmr.msrb.gmra.mxu2 %vm1536_vm6, %v8124_v6  ;;  %v4053_v20 = vpop.f32.mrf.mxu0 }
 0x6b0   : > { %6254 = vmatpush.xpose.msk.msra.mxu2 %vm1536_vm6, %v4008_v38  ;;  %v4054_v28 = vadd.f32 %v4053_v20, %v3879_v39 }
 0x6b2   : > { %v8513_v8 = vpop.f32.mrf.mxu1  ;;  %v4087_v15 = vmul.f32 0.25, %v4054_v28 }
 0x6b4   : > { %v4107_v53 = vsel %vm3453_vm14, %v4087_v15, -inf  ;;  %v3866_v46 = vpop.xlane.xlu2 %3865 }
 0x6b5   : > { %4108 = vmax.xlane.f32.xlu1 %v4107_v53 }
 0x6b7   : > { %6255 = vmatmul.msk.f32.vlgmr.msra.gmra.mxu2 %vm1536_vm6, %v8210_v62 }
 0x6ba   : > { %v8518_v0 = vpop.f32.mrf.mxu1 }
 0x6c2   : > { %v3928_v22 = vpop.f32.mrf.mxu1 }
 0x6c3   : > { %v3929_v7 = vadd.f32 %v3928_v22, %v3874_v30 }
 0x6c5   : > { %v8521_v49 = vmul.f32 0.25, %v3929_v7 }
 0x6c7   : > { %v4092_v47 = vsel %vm3453_vm14, %v8521_v49, -inf }
 0x6c8   : > { %4093 = vmax.xlane.f32.xlu2 %v4092_v47 }
 0x6ca   : > { %v4003_v22 = vpop.f32.mrf.mxu1 }
 0x6d6   : > { %v3851_v57 = vpop.xlane.xlu0 %3850 }
 0x6d7   : > { %v3873_v38 = vmul.f32 %v8270_v36, %v3851_v57 }
 0x6d9   : > { %v3904_v37 = vadd.f32 %v3903_v50, %v3873_v38 }
 0x6db   : > { %v4081_v32 = vmul.f32 0.25, %v3904_v37 }
 0x6dd   : > { %v4089_v5 = vsel %vm3453_vm14, %v4081_v32, -inf }
 0x6de   : > { %4090 = vmax.xlane.f32.xlu0 %v4089_v5  ;;  %v3860_v63 = vpop.xlane.xlu0 %3859 }
 0x6df   : > { %v3876_v35 = vmul.f32 %v8287_v1, %v3860_v63  ;;  %v4078_v63 = vpop.f32.mrf.mxu1 }
 0x6e0   : > { %3829 = vrot.lane.b32.xlu2 %v8259_v29, %s9417_s28 }
 0x6e1   : > { %v3979_v19 = vadd.f32 %v3978_v55, %v3876_v35  ;;  %v8540_v55 = vpop.f32.mrf.mxu2 }
 0x6e3   : > { %v4084_v54 = vmul.f32 0.25, %v3979_v19 }
 0x6e5   : > { %v4098_v50 = vsel %vm3453_vm14, %v4084_v54, -inf }
 0x6e6   : > { %3871 = vadd.xlane.f32.xlu0 %v3870_v40 }
 0x6e9   : > { %v8543_v30 = vpop.f32.mrf.mxu2 }
 0x6ee   : > { %4099 = vmax.xlane.f32.xlu0 %v4098_v50 }
 0x6f1   : > { %v8545_v37 = vpop.f32.mrf.mxu2 }
 0x728   : > { %v4109_v50 = vpop.xlane.xlu1 %4108 }
 0x73b   : > { %v4094_v39 = vpop.xlane.xlu2 %4093 }
 0x743   : > { %v8534_v20 = vpop.permute.xlu2 %3829 }
 0x744   : > { %v3832_v29 = vmul.f32 %v8534_v20, %v8084_v25  ;;  %v3833_v28 = vmul.f32 %v8534_v20, %v8118_v48 }
 0x746   : > { %v6567_v53 = vpack.i.bf16 %v3833_v28, %v3832_v29 }
 0x748   : > { %6568 = vrot.lane.b32.xlu1 %v6567_v53, %s9417_s28  ;;  %v8557_v53 = vpop.f32.mrf.mxu2 }
 0x751   : > { %v4091_v7 = vpop.xlane.xlu0 %4090 }
 0x752   : > { %v4113_v47 = vsub.f32 %v4081_v32, %v4091_v7  ;;  %v4119_v7 = vsub.f32 %v4087_v15, %v4109_v50 }
 0x754   : > { %v4121_v57 = vmul.f32 1.442695, %v4113_v47 }
 0x756   : > { %6672 = vpow2.f32 %v4121_v57 }
 0x759   : > { %v3872_v38 = vpop.xlane.xlu0 %3871 }
 0x75a   : > { %v3880_v5 = vmul.f32 %v8393_v10, %v3872_v38  ;;  %v4133_v38 = vmul.f32 1.442695, %v4119_v7  ;;  %v3836_v7 = vmul.f32 %v8534_v20, %v8159_v56 }
 0x75c   : > { %v6673_v35 = vpop.eup %6672  ;;  %v4079_v26 = vadd.f32 %v4078_v63, %v3880_v5  ;;  %v3877_v5 = vmul.f32 %v8329_v27, %v8499_v21 }
 0x75d   : > { %v8549_v19 = vmul.f32 %v6673_v35, %v9505_v45  ;;  %v3953_v35 = vpop.f32.mrf.mxu2 }
 0x75e   : > { %v8551_v40 = vmul.f32 0.25, %v4079_v26  ;;  %v4004_v63 = vadd.f32 %v4003_v22, %v3877_v5  ;;  %v4114_v22 = vsub.f32 %v8521_v49, %v4094_v39 }
 0x75f   : > { %v4145_v29 = vsel %vm3453_vm14, %v8549_v19, 0.0 }
 0x760   : > { %4146 = vadd.xlane.f32.xlu0 %v4145_v29  ;;  %v4110_v32 = vsel %vm3453_vm14, %v8551_v40, -inf  ;;  %v8561_v29 = vmul.f32 0.25, %v4004_v63  ;;  %v4123_v5 = vmul.f32 1.442695, %v4114_v22 }
 0x761   : > { %v4100_v28 = vpop.xlane.xlu0 %4099  ;;  %4111 = vmax.xlane.f32.xlu2 %v4110_v32  ;;  %v3875_v32 = vmul.f32 %v8282_v9, %v3857_v2  ;;  %v3837_v2 = vmul.f32 %v8534_v20, %v8210_v62 }
 0x762   : > { %v4116_v47 = vsub.f32 %v4084_v54, %v4100_v28  ;;  %v4101_v21 = vsel %vm3453_vm14, %v8561_v29, -inf }
 0x763   : > { %v3954_v50 = vadd.f32 %v3953_v35, %v3875_v32  ;;  %v6577_v39 = vpack.i.bf16 %v3837_v2, %v3836_v7  ;;  %v3558_v7 = vmul.f32 %v8270_v36, %v8359_v13 }
 0x764   : > { %v4127_v57 = vmul.f32 1.442695, %v4116_v47 }
 0x765   : > { %v4028_v47 = vpop.f32.mrf.mxu2  ;;  %v3566_v2 = vsel %vm3453_vm14, %v3558_v7, 0.0 }
 0x766   : > { %6674 = vpow2.f32 %v4127_v57  ;;  %v3878_v57 = vmul.f32 %v8298_v42, %v3866_v46 }
 0x767   : > { %6676 = vpow2.f32 %v4133_v38  ;;  %v8580_v38 = vmul.f32 0.25, %v3954_v50  ;;  %v3834_v50 = vmul.f32 %v8534_v20, %v8124_v6 }
 0x768   : > { %v4029_v63 = vadd.f32 %v4028_v47, %v3878_v57  ;;  %6678 = vpow2.f32 %v4123_v5  ;;  %v3560_v47 = vmul.f32 %v8282_v9, %v8452_v59  ;;  %v3561_v5 = vmul.f32 %v8287_v1, %v8455_v31 }
 0x769   : > { %v4095_v35 = vsel %vm3453_vm14, %v8580_v38, -inf }
 0x76a   : > { %v3572_v57 = vsel %vm3453_vm14, %v3560_v47, 0.0 }
 0x76c   : > { %v6675_v26 = vpop.eup %6674 }
 0x76d   : > { %v8564_v45 = vmul.f32 %v6675_v26, %v9509_v52  ;;  %v6677_v54 = vpop.eup %6676  ;;  %v8587_v26 = vmul.f32 0.25, %v4029_v63  ;;  %v3575_v63 = vsel %vm3453_vm14, %v3561_v5, 0.0 }
 0x76e   : > { %v8573_v28 = vmul.f32 %v6677_v54, %v9511_v11  ;;  %v6679_v32 = vpop.eup %6678 }
 0x76f   : > { %v4154_v15 = vsel %vm3453_vm14, %v8564_v45, 0.0  ;;  %v4104_v46 = vsel %vm3453_vm14, %v8587_v26, -inf }
 0x770   : > { %4155 = vadd.xlane.f32.xlu0 %v4154_v15  ;;  %v4163_v49 = vsel %vm3453_vm14, %v8573_v28, 0.0  ;;  %v8592_v15 = vmul.f32 %v6679_v32, %v9508_v14 }
 0x772   : > { %4102 = vmax.xlane.f32.xlu1 %v4101_v21  ;;  %v4148_v54 = vsel %vm3453_vm14, %v8592_v15, 0.0  ;;  %v3835_v21 = vmul.f32 %v8534_v20, %v8131_v3 }
 0x774   : > { %v6572_v22 = vpack.i.bf16 %v3835_v21, %v3834_v50 }
 0x778   : > { %4164 = vadd.xlane.f32.xlu0 %v4163_v49 }
 0x779   : > { %6578 = vrot.lane.b32.xlu2 %v6577_v39, %s9417_s28 }
 0x77a   : > { %4096 = vmax.xlane.f32.xlu1 %v4095_v35 }
 0x780   : > { %4105 = vmax.xlane.f32.xlu0 %v4104_v46 }
 0x788   : > { %4149 = vadd.xlane.f32.xlu0 %v4148_v54 }
 0x793   : > { %6573 = vrot.lane.b32.xlu1 %v6572_v22, %s9417_s28 }
 0x7a2   : > { %3567 = vadd.xlane.f32.xlu2 %v3566_v2  ;;  %v3559_v2 = vmul.f32 %v8325_v44, %v8442_v24 }
 0x7aa   : > { %3573 = vadd.xlane.f32.xlu2 %v3572_v57 }
 0x7b2   : > { %3576 = vadd.xlane.f32.xlu2 %v3575_v63 }
 0x7ba   : > { %v6569_v49 = vpop.permute.xlu1 %6568 }
 0x7bb   : > { %v6571_v39 = vunpack.i.h.bf16 %v6569_v49  ;;  %v6570_v35 = vunpack.i.l.bf16 %v6569_v49 }
 0x7bd   : > { %4215 = vmatpush.msrb.mxu2 %v6570_v35  ;;  %4242 = vmatpush.msrb.mxu0 %v6571_v39  ;;  %v3562_v39 = vmul.f32 %v8329_v27, %v8466_v34  ;;  %v3564_v34 = vmul.f32 %v8334_v16, %v8479_v43 }
 0x7ca   : > { %4469 = vrot.lane.b32.xlu2 %v8124_v6, %s9421_s30 }
 0x7d3   : > { %v4147_v13 = vpop.xlane.xlu0 %4146 }
 0x7d4   : > { %v4169_v46 = vmax.f32 %v4147_v13, 1e-20  ;;  %v8612_v59 = vpop.xlane.xlu2 %4111 }
 0x7d6   : > { %6680 = vrcp.f32 %v4169_v46 }
 0x7dc   : > { %v6681_v32 = vpop.eup %6680  ;;  %v8614_v54 = vpop.permute.xlu2 %6578 }
 0x7dd   : > { %v4185_v31 = vmul.f32 %v6681_v32, %v8549_v19  ;;  %v6580_v50 = vunpack.i.l.bf16 %v8614_v54  ;;  %v3569_v19 = vsel %vm3453_vm14, %v3559_v2, 0.0  ;;  %v3584_v2 = vsel %vm3453_vm14, %v3564_v34, 0.0 }
 0x7df   : > { %6260 = vmatmul.msk.f32.vlgmr.msrb.gmra.mxu2 %vm3453_vm14, %v4185_v31  ;;  %4323 = vmatpush.msra.mxu0 %v6580_v50  ;;  %v4409_v21 = vmul.f32 %v8270_v36, %v4185_v31 }
 0x7e1   : > { %v4417_v22 = vsel %vm3453_vm14, %v4409_v21, 0.0 }
 0x7e2   : > { %4418 = vadd.xlane.f32.xlu1 %v4417_v22 }
 0x7e3   : > { %v4156_v6 = vpop.xlane.xlu0 %4155 }
 0x7e4   : > { %v4172_v22 = vmax.f32 %v4156_v6, 1e-20 }
 0x7e5   : > { %v4103_v7 = vpop.xlane.xlu1 %4102 }
 0x7e6   : > { %v4117_v47 = vsub.f32 %v8561_v29, %v4103_v7  ;;  %v3578_v29 = vsel %vm3453_vm14, %v3562_v39, 0.0 }
 0x7e8   : > { %v4129_v57 = vmul.f32 1.442695, %v4117_v47 }
 0x7ea   : > { %6682 = vpow2.f32 %v4129_v57  ;;  %3570 = vadd.xlane.f32.xlu1 %v3569_v19 }
 0x7eb   : > { %v4165_v5 = vpop.xlane.xlu0 %4164 }
 0x7ec   : > { %v4175_v63 = vmax.f32 %v4165_v5, 1e-20 }
 0x7ed   : > { %v4097_v49 = vpop.xlane.xlu1 %4096 }
 0x7ee   : > { %v4115_v36 = vsub.f32 %v8580_v38, %v4097_v49  ;;  %6684 = vrcp.f32 %v4175_v63 }
 0x7f0   : > { %v6683_v35 = vpop.eup %6682  ;;  %v4125_v13 = vmul.f32 1.442695, %v4115_v36 }
 0x7f1   : > { %v8629_v24 = vmul.f32 %v6683_v35, %v9510_v58 }
 0x7f2   : > { %6686 = vpow2.f32 %v4125_v13 }
 0x7f3   : > { %v4106_v46 = vpop.xlane.xlu0 %4105  ;;  %3579 = vadd.xlane.f32.xlu2 %v3578_v29  ;;  %v4157_v32 = vsel %vm3453_vm14, %v8629_v24, 0.0 }
 0x7f4   : > { %v4118_v31 = vsub.f32 %v8587_v26, %v4106_v46  ;;  %4158 = vadd.xlane.f32.xlu0 %v4157_v32  ;;  %v6685_v50 = vpop.eup %6684  ;;  %v6581_v46 = vunpack.i.h.bf16 %v8614_v54 }
 0x7f5   : > { %v8642_v47 = vmul.f32 %v6685_v50, %v8573_v28 }
 0x7f6   : > { %v4131_v38 = vmul.f32 1.442695, %v4118_v31 }
 0x7f7   : > { %v4415_v6 = vmul.f32 %v8334_v16, %v8642_v47  ;;  %v3565_v16 = vmul.f32 %v8393_v10, %v8502_v4 }
 0x7f8   : > { %v6687_v21 = vpop.eup %6686  ;;  %6688 = vpow2.f32 %v4131_v38  ;;  %v3839_v38 = vmul.f32 %v8534_v20, %v8248_v61 }
 0x7f9   : > { %v8638_v7 = vmul.f32 %v6687_v21, %v9506_v33  ;;  %6690 = vrcp.f32 %v4172_v22  ;;  %v4435_v63 = vsel %vm3453_vm14, %v4415_v6, 0.0  ;;  %v3587_v31 = vsel %vm3453_vm14, %v3565_v16, 0.0 }
 0x7fb   : > { %v4150_v57 = vpop.xlane.xlu0 %4149  ;;  %3585 = vadd.xlane.f32.xlu2 %v3584_v2  ;;  %v4151_v26 = vsel %vm3453_vm14, %v8638_v7, 0.0 }
 0x7fc   : > { %v4170_v19 = vmax.f32 %v4150_v57, 1e-20  ;;  %4152 = vadd.xlane.f32.xlu0 %v4151_v26 }
 0x7fe   : > { %v6689_v43 = vpop.eup %6688  ;;  %6692 = vrcp.f32 %v4170_v19 }
 0x7ff   : > { %v8649_v5 = vmul.f32 %v6689_v43, %v9507_v60  ;;  %v6691_v49 = vpop.eup %6690 }
 0x800   : > { %v4188_v32 = vmul.f32 %v6691_v49, %v8564_v45  ;;  %v4120_v45 = vsub.f32 %v8551_v40, %v8612_v59  ;;  %v4508_v49 = vld [vmem:[%s9396_s13 + $0x18] sm:$0xff] }
 0x801   : > { %v4160_v28 = vsel %vm3453_vm14, %v8649_v5, 0.0 }
 0x802   : > { %4161 = vadd.xlane.f32.xlu1 %v4160_v28  ;;  %v4135_v54 = vmul.f32 1.442695, %v4120_v45  ;;  %v4412_v19 = vmul.f32 %v8287_v1, %v4188_v32  ;;  %v4507_v1 = vld [vmem:[%s9396_s13 + $0x10] sm:$0xff] }
 0x803   : > { %4436 = vadd.xlane.f32.xlu2 %v4435_v63 }
 0x804   : > { %v6693_v36 = vpop.eup %6692  ;;  %6694 = vpow2.f32 %v4135_v54 }
 0x805   : > { %v4186_v39 = vmul.f32 %v6693_v36, %v8592_v15  ;;  %v6574_v35 = vpop.permute.xlu1 %6573  ;;  %v3838_v15 = vmul.f32 %v8534_v20, %v8230_v17 }
 0x806   : > { %v6576_v13 = vunpack.i.h.bf16 %v6574_v35  ;;  %v6575_v29 = vunpack.i.l.bf16 %v6574_v35 }
 0x807   : > { %6261 = vmatmul.msk.f32.vlgmr.msrb.gmra.mxu0 %vm3453_vm14, %v4186_v39  ;;  %v6582_v4 = vpack.i.bf16 %v3839_v38, %v3838_v15  ;;  %v4410_v36 = vmul.f32 %v8325_v44, %v4186_v39  ;;  %v4505_v44 = vld [vmem:[%s9396_s13] sm:$0xff] }
 0x808   : > { %4269 = vmatpush.msrb.mxu1 %v6575_v29  ;;  %4296 = vmatpush.msra.mxu2 %v6576_v13 }
 0x809   : > { %6263 = vmatmul.msk.f32.vlgmr.msra.gmra.mxu2 %vm3453_vm14, %v4188_v32 }
 0x80a   : > { %4350 = vmatpush.msra.mxu1 %v6581_v46  ;;  %v6695_v34 = vpop.eup %6694  ;;  %v8707_v46 = vld [vmem:[%s9395_s12] ss:$0 sm:$0xff] }
 0x80b   : > { %3588 = vadd.xlane.f32.xlu2 %v3587_v31  ;;  %v8672_v50 = vmul.f32 %v6695_v34, %v9512_v41 }
 0x80d   : > { %v4166_v21 = vsel %vm3453_vm14, %v8672_v50, 0.0 }
 0x810   : > { %6583 = vrot.lane.b32.xlu0 %v6582_v4, %s9417_s28  ;;  %s6020_s28 = scalar_lea.hbm %s9399_s16, %s6990_s18  ;;  %s9517_s18 = sand.u32 1, %s6845_s22  }
 0x811   : > { %s6010_s25 = scalar_lea.sflag [#allocation3], %s9517_s18 }
 0x815   : > { %v3568_v29 = vpop.xlane.xlu2 %3567 }
 0x816   : > { %v3590_v32 = vmul.f32 %v8707_v46, %v3568_v29 }
 0x81b   : > { %4465 = vrot.lane.b32.xlu1 %v8084_v25, %s9421_s30 }
 0x83a   : > { %4167 = vadd.xlane.f32.xlu0 %v4166_v21 }
 0x84e   : > { %4467 = vrot.lane.b32.xlu0 %v8118_v48, %s9421_s30  ;;  %v4426_v48 = vsel %vm3453_vm14, %v4412_v19, 0.0  ;;  %s9513_s30 = smov 32  }
 0x855   : > { %v4419_v20 = vpop.xlane.xlu1 %4418 }
 0x856   : > { %v4449_v21 = vmul.f32 %v8410_v51, %v4419_v20 }
 0x85d   : > { %v8678_v25 = vpop.xlane.xlu1 %3570 }
 0x862   : > { %v4217_v45 = vpop.f32.mrf.mxu2 }
 0x867   : > { %v4159_v22 = vpop.xlane.xlu0 %4158 }
 0x868   : > { %v4173_v2 = vmax.f32 %v4159_v22, 1e-20 }
 0x86a   : > { %6696 = vrcp.f32 %v4173_v2 }
 0x86f   : > { %v4153_v40 = vpop.xlane.xlu0 %4152 }
 0x870   : > { %v6697_v59 = vpop.eup %6696  ;;  %v4171_v57 = vmax.f32 %v4153_v40, 1e-20 }
 0x871   : > { %v4189_v26 = vmul.f32 %v6697_v59, %v8629_v24 }
 0x872   : > { %6698 = vrcp.f32 %v4171_v57  ;;  %v8742_v57 = vld [vmem:[%s9462_s2] ss:$0 sm:$0xff] }
 0x873   : > { %6264 = vmatmul.msk.f32.vlgmr.msra.gmra.mxu0 %vm3453_vm14, %v4189_v26  ;;  %v4413_v4 = vmul.f32 %v8329_v27, %v4189_v26  ;;  %v3574_v26 = vpop.xlane.xlu2 %3573 }
 0x875   : > { %v4162_v43 = vpop.xlane.xlu1 %4161  ;;  %v4429_v54 = vsel %vm3453_vm14, %v4413_v4, 0.0 }
 0x876   : > { %v4174_v6 = vmax.f32 %v4162_v43, 1e-20 }
 0x878   : > { %v6699_v28 = vpop.eup %6698  ;;  %6700 = vrcp.f32 %v4174_v6  ;;  %4427 = vadd.xlane.f32.xlu0 %v4426_v48  ;;  %v3592_v48 = vmul.f32 %v8707_v46, %v3574_v26 }
 0x879   : > { %v4187_v63 = vmul.f32 %v6699_v28, %v8638_v7  ;;  %v4506_v7 = vld [vmem:[%s9396_s13 + $0x8] sm:$0xff] }
 0x87b   : > { %6262 = vmatmul.msk.f32.vlgmr.msrb.gmra.mxu1 %vm3453_vm14, %v4187_v63  ;;  %v4411_v24 = vmul.f32 %v8282_v9, %v4187_v63  ;;  %v4420_v9 = vsel %vm3453_vm14, %v4410_v36, 0.0  ;;  %v3577_v43 = vpop.xlane.xlu2 %3576 }
 0x87c   : > { %4549 = vmatpush.msrb.mxu1 %v4508_v49 }
 0x87d   : > { %v4423_v35 = vsel %vm3453_vm14, %v4411_v24, 0.0 }
 0x87e   : > { %v6701_v13 = vpop.eup %6700  ;;  %4424 = vadd.xlane.f32.xlu1 %v4423_v35  ;;  %4550 = vmatpush.msrb.mxu1 %v4507_v1  ;;  %v3677_v1 = vadd.f32 %v8506_v23, %v3592_v48 }
 0x87f   : > { %v4190_v16 = vmul.f32 %v6701_v13, %v8649_v5 }
 0x880   : > { %4421 = vadd.xlane.f32.xlu0 %v4420_v9  ;;  %4551 = vmatpush.msrb.mxu1 %v4506_v7 }
 0x881   : > { %v4414_v39 = vmul.f32 %v8298_v42, %v4190_v16  ;;  %v3623_v42 = vadd.f32 %v8497_v18, %v3590_v32 }
 0x882   : > { %v6584_v31 = vpop.permute.xlu0 %6583  ;;  %4552 = vmatpush.msrb.mxu1 %v4505_v44  ;;  %v3593_v44 = vmul.f32 %v8707_v46, %v3577_v43 }
 0x883   : > { %v6586_v5 = vunpack.i.h.bf16 %v6584_v31  ;;  %v6585_v15 = vunpack.i.l.bf16 %v6584_v31  ;;  %6265 = vmatmul.msk.f32.vlgmr.msra.gmra.mxu1 %vm3453_vm14, %v4190_v16  ;;  %v4432_v38 = vsel %vm3453_vm14, %v4414_v39, 0.0  ;;  %v4441_v34 = vadd.f32 %v4217_v45, %v3623_v42  ;;  %v4470_v16 = vpop.permute.xlu2 %4469 }
 0x884   : > { %4433 = vadd.xlane.f32.xlu2 %v4432_v38  ;;  %v4244_v6 = vpop.f32.mrf.mxu0 }
 0x885   : > { %4377 = vmatpush.msrb.mxu2 %v6585_v15  ;;  %4404 = vmatpush.msrb.mxu0 %v6586_v5  ;;  %v4457_v22 = vadd.f32 %v4449_v21, %v4441_v34  ;;  %v3704_v5 = vadd.f32 %v8543_v30, %v3593_v44 }
 0x886   : > { %6266 = vmatmul.msk.f32.vlgmr.msrb.gmra.mxu2 %vm3453_vm14, %v8642_v47 }
 0x888   : > { %4430 = vadd.xlane.f32.xlu0 %v4429_v54 }
 0x88b   : > { %v3580_v32 = vpop.xlane.xlu2 %3579 }
 0x88c   : > { %v4298_v31 = vpop.f32.mrf.mxu2  ;;  %v3594_v15 = vmul.f32 %v8707_v46, %v3580_v32 }
 0x88d   : > { %v4466_v2 = vpop.permute.xlu1 %4465  ;;  %v4444_v38 = vadd.f32 %v4298_v31, %v3704_v5 }
 0x88e   : > { %v4489_v40 = vadd.f32 %v4466_v2, %v4457_v22  ;;  %v3731_v34 = vadd.f32 %v8513_v8, %v3594_v15 }
 0x890   : > { %v4497_v27 = vmax.f32 %v4489_v40, 0.0 }
 0x892   : > { %6268 = vmatmul.msk.f32.vlgmr.msrb.gmra.mxu1 %vm1536_vm6, %v4497_v27 }
 0x897   : > { %4471 = vrot.lane.b32.xlu1 %v8131_v3, %s9513_s30  ;;  %v8732_v3 = vld [vmem:[%s7024_s26 + $0x28] sm:$0xff] }
 0x89c   : > { %4479 = vrot.lane.b32.xlu2 %v8248_v61, %s9513_s30  ;;  %4473 = vrot.lane.b32.xlu0 %v8159_v56, %s9513_s30  ;;  %v3563_v61 = vmul.f32 %v8732_v3, %v8463_v12  ;;  %v3591_v12 = vmul.f32 %v8707_v46, %v8678_v25 }
 0x89e   : > { %v3581_v56 = vsel %vm3453_vm14, %v3563_v61, 0.0 }
 0x8a4   : > { %4475 = vrot.lane.b32.xlu0 %v8210_v62, %s9513_s30 }
 0x8ac   : > { %4477 = vrot.lane.b32.xlu0 %v8230_v17, %s9513_s30 }
 0x8ad   : > { %v4168_v18 = vpop.xlane.xlu0 %4167 }
 0x8ae   : > { %v4176_v47 = vmax.f32 %v4168_v18, 1e-20 }
 0x8b0   : > { %6702 = vrcp.f32 %v4176_v47 }
 0x8b6   : > { %v6703_v20 = vpop.eup %6702 }
 0x8b7   : > { %v4192_v59 = vmul.f32 %v6703_v20, %v8672_v50  ;;  %v3586_v20 = vpop.xlane.xlu2 %3585 }
 0x8b9   : > { %6267 = vmatmul.msk.f32.vlgmr.msrb.gmra.mxu0 %vm3453_vm14, %v4192_v59  ;;  %v4416_v62 = vmul.f32 %v8393_v10, %v4192_v59  ;;  %v3650_v10 = vadd.f32 %v8540_v55, %v3591_v12 }
 0x8bb   : > { %v4438_v17 = vsel %vm3453_vm14, %v4416_v62, 0.0  ;;  %v4442_v63 = vadd.f32 %v4244_v6, %v3650_v10 }
 0x8bf   : > { %v4437_v59 = vpop.xlane.xlu2 %4436 }
 0x8c0   : > { %v4468_v50 = vpop.permute.xlu0 %4467 }
 0x8c1   : > { %3582 = vadd.xlane.f32.xlu1 %v3581_v56 }
 0x8c7   : > { %v3589_v61 = vpop.xlane.xlu2 %3588 }
 0x8d6   : > { %4439 = vadd.xlane.f32.xlu0 %v4438_v17 }
 0x8da   : > { %4582 = vrot.lane.b32.xlu1 %v8742_v57, %s9513_s30 }
 0x8eb   : > { %v4428_v19 = vpop.xlane.xlu0 %4427 }
 0x8ec   : > { %v4452_v23 = vmul.f32 %v8410_v51, %v4428_v19 }
 0x8ee   : > { %v4460_v45 = vadd.f32 %v4452_v23, %v4444_v38 }
 0x8f0   : > { %v4325_v42 = vpop.f32.mrf.mxu0 }
 0x8f1   : > { %v4425_v24 = vpop.xlane.xlu1 %4424  ;;  %v4445_v2 = vadd.f32 %v4325_v42, %v3731_v34 }
 0x8f2   : > { %v4451_v13 = vmul.f32 %v8410_v51, %v4425_v24 }
 0x8f3   : > { %v4422_v28 = vpop.xlane.xlu0 %4421 }
 0x8f4   : > { %v4450_v49 = vmul.f32 %v8410_v51, %v4422_v28 }
 0x8f6   : > { %v4458_v36 = vadd.f32 %v4450_v49, %v4442_v63  ;;  %v4455_v49 = vmul.f32 %v8410_v51, %v4437_v59 }
 0x8f7   : > { %v4434_v8 = vpop.xlane.xlu2 %4433 }
 0x8f8   : > { %v4490_v35 = vadd.f32 %v4468_v50, %v4458_v36  ;;  %v4271_v7 = vpop.f32.mrf.mxu1  ;;  %v3596_v50 = vmul.f32 %v8707_v46, %v3586_v20  ;;  %v4454_v12 = vmul.f32 %v8410_v51, %v4434_v8 }
 0x8f9   : > { %v4443_v29 = vadd.f32 %v4271_v7, %v3677_v1  ;;  %v6636_v7 = vld [vmem:[%s9397_s14] ss:$0 sm:$0xff] }
 0x8fa   : > { %v4498_v25 = vmax.f32 %v4490_v35, 0.0  ;;  %v3785_v10 = vadd.f32 %v8518_v0, %v3596_v50 }
 0x8fb   : > { %v4459_v9 = vadd.f32 %v4451_v13, %v4443_v29  ;;  %v4431_v4 = vpop.xlane.xlu0 %4430 }
 0x8fc   : > { %6269 = vmatmul.msk.f32.gmra.mxu1 %vm1536_vm6, %v4498_v25  ;;  %v4453_v21 = vmul.f32 %v8410_v51, %v4431_v4 }
 0x8fd   : > { %v4491_v55 = vadd.f32 %v4470_v16, %v4459_v9 }
 0x8fe   : > { %v4461_v30 = vadd.f32 %v4453_v21, %v4445_v2 }
 0x8ff   : > { %v4499_v39 = vmax.f32 %v4491_v55, 0.0 }
 0x900   : > { %v4352_v19 = vpop.f32.mrf.mxu1 }
 0x904   : > { %6270 = vmatmul.msk.f32.gmra.mxu1 %vm1536_vm6, %v4499_v39 }
 0x909   : > { %v4472_v54 = vpop.permute.xlu1 %4471  ;;  %v4379_v6 = vpop.f32.mrf.mxu2 }
 0x90a   : > { %v4492_v22 = vadd.f32 %v4472_v54, %v4460_v45  ;;  %v4447_v28 = vadd.f32 %v4379_v6, %v3785_v10 }
 0x90c   : > { %v4500_v40 = vmax.f32 %v4492_v22, 0.0  ;;  %v4463_v1 = vadd.f32 %v4455_v49, %v4447_v28 }
 0x90e   : > { %v4474_v27 = vpop.permute.xlu0 %4473  ;;  %6271 = vmatmul.msk.f32.gmra.mxu1 %vm1536_vm6, %v4500_v40 }
 0x90f   : > { %v4493_v18 = vadd.f32 %v4474_v27, %v4461_v30  ;;  %v4554_v0 = vpop.f32.mrf.mxu1 }
 0x910   : > { %v8777_v44 = vadd.f32 %v6636_v7, %v4554_v0 }
 0x911   : > { %v4501_v47 = vmax.f32 %v4493_v18, 0.0 }
 0x916   : > { %6272 = vmatmul.msk.f32.gmra.mxu1 %vm1536_vm6, %v4501_v47  ;;  %v4476_v17 = vpop.permute.xlu0 %4475 }
 0x91e   : > { %v4478_v36 = vpop.permute.xlu0 %4477 }
 0x91f   : > { %v4495_v35 = vadd.f32 %v4478_v36, %v4463_v1 }
 0x921   : > { %v4503_v13 = vmax.f32 %v4495_v35, 0.0 }
 0x934   : > { %v3583_v56 = vpop.xlane.xlu1 %3582 }
 0x935   : > { %v3595_v62 = vmul.f32 %v8707_v46, %v3583_v56 }
 0x936   : > { %v4406_v29 = vpop.f32.mrf.mxu0 }
 0x937   : > { %v3758_v26 = vadd.f32 %v8545_v37, %v3595_v62  ;;  %v3597_v37 = vmul.f32 %v8707_v46, %v3589_v61  ;;  %v4480_v46 = vpop.permute.xlu2 %4479 }
 0x939   : > { %v4446_v43 = vadd.f32 %v4352_v19, %v3758_v26  ;;  %v3812_v25 = vadd.f32 %v8557_v53, %v3597_v37 }
 0x93b   : > { %v4462_v48 = vadd.f32 %v4454_v12, %v4446_v43  ;;  %v4448_v9 = vadd.f32 %v4406_v29, %v3812_v25 }
 0x93d   : > { %v4494_v63 = vadd.f32 %v4476_v17, %v4462_v48  ;;  %v6637_v17 = vld [vmem:[%s9398_s15] ss:$0 sm:$0xff] }
 0x93e   : > { %v4605_v50 = vmul.f32 %v6637_v17, %v8777_v44 }
 0x93f   : > { %v4502_v24 = vmax.f32 %v4494_v63, 0.0 }
 0x940   : > { %v4613_v19 = vsel %vm1536_vm6, %v4605_v50, 0.0 }
 0x941   : > { %6273 = vmatmul.msk.f32.gmra.mxu1 %vm1536_vm6, %v4502_v24 }
 0x949   : > { %v4440_v16 = vpop.xlane.xlu0 %4439  ;;  %6274 = vmatmul.msk.f32.gmra.mxu1 %vm1536_vm6, %v4503_v13  ;;  %v8847_v13 = vld [vmem:[%s9462_s2 + $0x1] ss:$0 sm:$0xff]  ;;  %s6811_s2 = scalar_lea.hbm %s9399_s16, 16 }
 0x94a   : > { %v4456_v55 = vmul.f32 %v8410_v51, %v4440_v16 }
 0x94c   : > { %v4464_v39 = vadd.f32 %v4456_v55, %v4448_v9  ;;  %v4583_v32 = vpop.permute.xlu1 %4582  ;;  %v8863_v55 = vld [vmem:[%s7024_s26] sm:$0xff] }
 0x94d   : > { %v4585_v31 = vmul.f32 %v4583_v32, %v8777_v44 }
 0x94e   : > { %v4496_v5 = vadd.f32 %v4480_v46, %v4464_v39 }
 0x94f   : > { %4646 = vrot.lane.b32.xlu2 %v4585_v31, %s9514_s19 }
 0x950   : > { %v4504_v23 = vmax.f32 %v4496_v5, 0.0 }
 0x952   : > { %6275 = vmatmul.msk.f32.gmra.mxu1 %vm1536_vm6, %v4504_v23 }
 0x979   : > { %v4557_v53 = vpop.f32.mrf.mxu1 }
 0x97a   : > { %v8782_v15 = vadd.f32 %v6636_v7, %v4557_v53 }
 0x97c   : > { %v4586_v38 = vmul.f32 %v4583_v32, %v8782_v15  ;;  %v4606_v49 = vmul.f32 %v6637_v17, %v8782_v15 }
 0x97e   : > { %4674 = vrot.lane.b32.xlu2 %v4586_v38, %s9514_s19  ;;  %v4616_v1 = vsel %vm1536_vm6, %v4606_v49, 0.0  ;;  %v8868_v38 = vld [vmem:[%s7024_s26 + $0x18] sm:$0xff] }
 0x981   : > { %v4560_v51 = vpop.f32.mrf.mxu1 }
 0x982   : > { %v8786_v4 = vadd.f32 %v6636_v7, %v4560_v51 }
 0x984   : > { %v4587_v45 = vmul.f32 %v4583_v32, %v8786_v4  ;;  %v4607_v12 = vmul.f32 %v6637_v17, %v8786_v4 }
 0x986   : > { %4702 = vrot.lane.b32.xlu1 %v4587_v45, %s9514_s19  ;;  %v4619_v6 = vsel %vm1536_vm6, %v4607_v12, 0.0 }
 0x98b   : > { %v4563_v42 = vpop.f32.mrf.mxu1 }
 0x98c   : > { %v8790_v54 = vadd.f32 %v6636_v7, %v4563_v42 }
 0x98e   : > { %v4588_v34 = vmul.f32 %v4583_v32, %v8790_v54  ;;  %v4608_v43 = vmul.f32 %v6637_v17, %v8790_v54 }
 0x990   : > { %4730 = vrot.lane.b32.xlu2 %v4588_v34, %s9514_s19  ;;  %v4622_v10 = vsel %vm1536_vm6, %v4608_v43, 0.0  ;;  %v8891_v43 = vld [vmem:[%s7024_s26 + $0x8] sm:$0xff] }
 0x993   : > { %v4566_v21 = vpop.f32.mrf.mxu1 }
 0x994   : > { %v8794_v22 = vadd.f32 %v6636_v7, %v4566_v21 }
 0x996   : > { %v4589_v2 = vmul.f32 %v4583_v32, %v8794_v22  ;;  %v4609_v35 = vmul.f32 %v6637_v17, %v8794_v22 }
 0x998   : > { %4758 = vrot.lane.b32.xlu1 %v4589_v2, %s9514_s19  ;;  %v4625_v37 = vsel %vm1536_vm6, %v4609_v35, 0.0 }
 0x9a9   : > { %v4647_v40 = vpop.permute.xlu2 %4646 }
 0x9aa   : > { %6276 = vmatpush.xpose.msk.msra.mxu2 %vm1536_vm6, %v4647_v40  ;;  %v8876_v40 = vld [vmem:[%s7024_s26 + $0x10] sm:$0xff] }
 0x9ad   : > { %6277 = vmatmul.msk.f32.vlgmr.msra.gmra.mxu2 %vm1536_vm6, %v8777_v44 }
 0x9be   : > { %v4569_v27 = vpop.f32.mrf.mxu1 }
 0x9bf   : > { %v8801_v30 = vadd.f32 %v6636_v7, %v4569_v27 }
 0x9c1   : > { %v4590_v18 = vmul.f32 %v4583_v32, %v8801_v30  ;;  %v4610_v63 = vmul.f32 %v6637_v17, %v8801_v30 }
 0x9c3   : > { %4786 = vrot.lane.b32.xlu1 %v4590_v18, %s9514_s19  ;;  %v4628_v36 = vsel %vm1536_vm6, %v4610_v63, 0.0 }
 0x9c6   : > { %v4572_v47 = vpop.f32.mrf.mxu1 }
 0x9c7   : > { %v8805_v20 = vadd.f32 %v6636_v7, %v4572_v47 }
 0x9c9   : > { %v4591_v59 = vmul.f32 %v4583_v32, %v8805_v20  ;;  %v4611_v28 = vmul.f32 %v6637_v17, %v8805_v20 }
 0x9cb   : > { %4814 = vrot.lane.b32.xlu0 %v4591_v59, %s9514_s19  ;;  %v4631_v24 = vsel %vm1536_vm6, %v4611_v28, 0.0 }
 0x9cf   : > { %v4575_v61 = vpop.f32.mrf.mxu1 }
 0x9d0   : > { %v8809_v56 = vadd.f32 %v6636_v7, %v4575_v61 }
 0x9d2   : > { %v4592_v62 = vmul.f32 %v4583_v32, %v8809_v56 }
 0x9d4   : > { %4842 = vrot.lane.b32.xlu2 %v4592_v62, %s9514_s19 }
 0x9d8   : > { %v4675_v8 = vpop.permute.xlu2 %4674 }
 0x9d9   : > { %6278 = vmatpush.xpose.msk.msra.mxu0 %vm1536_vm6, %v4675_v8 }
 0x9dc   : > { %6279 = vmatmul.msk.f32.vlgmr.msra.gmra.mxu0 %vm1536_vm6, %v8782_v15 }
 0x9ea   : > { %v4731_v26 = vpop.permute.xlu2 %4730 }
 0x9eb   : > { %6282 = vmatpush.xpose.msk.msrb.mxu0 %vm1536_vm6, %v4731_v26 }
 0x9ed   : > { %4614 = vadd.xlane.f32.xlu1 %v4613_v19 }
 0x9ee   : > { %6283 = vmatmul.msk.f32.vlgmr.msrb.gmra.mxu0 %vm1536_vm6, %v8790_v54 }
 0x9f5   : > { %4620 = vadd.xlane.f32.xlu0 %v4619_v6  ;;  %4623 = vadd.xlane.f32.xlu1 %v4622_v10 }
 0x9f8   : > { %v4703_v48 = vpop.permute.xlu1 %4702 }
 0x9f9   : > { %6280 = vmatpush.xpose.msk.msrb.mxu2 %vm1536_vm6, %v4703_v48 }
 0x9fc   : > { %6281 = vmatmul.msk.f32.vlgmr.msrb.gmra.mxu2 %vm1536_vm6, %v8786_v4 }
 0x9fd   : > { %4632 = vadd.xlane.f32.xlu0 %v4631_v24  ;;  %4629 = vadd.xlane.f32.xlu1 %v4628_v36 }
 0x9fe   : > { %4617 = vadd.xlane.f32.xlu2 %v4616_v1 }
 0xa06   : > { %4626 = vadd.xlane.f32.xlu2 %v4625_v37 }
 0xa0a   : > { %v4759_v7 = vpop.permute.xlu1 %4758 }
 0xa0b   : > { %6284 = vmatpush.xpose.msk.msra.mxu2 %vm1536_vm6, %v4759_v7  ;;  %v8906_v7 = vld [vmem:[%s7024_s26 + $0x38] sm:$0xff] }
 0xa0e   : > { %6285 = vmatmul.msk.f32.vlgmr.msra.gmra.mxu2 %vm1536_vm6, %v8794_v22 }
 0xa16   : > { %4593 = vrot.lane.b32.xlu1 %v8742_v57, %s9515_s29  ;;  %v4612_v57 = vmul.f32 %v6637_v17, %v8809_v56 }
 0xa18   : > { %v4634_v16 = vsel %vm1536_vm6, %v4612_v57, 0.0 }
 0xa1e   : > { %5241 = vrot.lane.b32.xlu2 %v8847_v13, %s9513_s30 }
 0xa2e   : > { %v4843_v0 = vpop.permute.xlu2 %4842 }
 0xa30   : > { %v4670_v32 = vpop.f32.mrf.mxu2 }
 0xa35   : > { %v4787_v29 = vpop.permute.xlu1 %4786 }
 0xa36   : > { %6286 = vmatpush.xpose.msk.msra.mxu0 %vm1536_vm6, %v4787_v29 }
 0xa39   : > { %6287 = vmatmul.msk.f32.vlgmr.msra.gmra.mxu0 %vm1536_vm6, %v8801_v30 }
 0xa3a   : > { %6290 = vmatpush.xpose.msk.msrb.mxu0 %vm1536_vm6, %v4843_v0 }
 0xa3d   : > { %v4815_v25 = vpop.permute.xlu0 %4814 }
 0xa3e   : > { %6288 = vmatpush.xpose.msk.msrb.mxu2 %vm1536_vm6, %v4815_v25 }
 0xa41   : > { %6289 = vmatmul.msk.f32.vlgmr.msrb.gmra.mxu2 %vm1536_vm6, %v8805_v20  ;;  %6291 = vmatmul.msk.f32.vlgmr.msrb.gmra.mxu0 %vm1536_vm6, %v8809_v56 }
 0xa47   : > { %4635 = vadd.xlane.f32.xlu2 %v4634_v16 }
 0xa59   : > { %v4698_v46 = vpop.f32.mrf.mxu0 }
 0xa60   : > { %v4615_v9 = vpop.xlane.xlu1 %4614 }
 0xa61   : > { %v4637_v39 = vmul.f32 %v8863_v55, %v4615_v9 }
 0xa63   : > { %v4671_v31 = vadd.f32 %v4670_v32, %v4637_v39 }
 0xa65   : > { %v4869_v5 = vmul.f32 0.25, %v4671_v31 }
 0xa67   : > { %v4877_v23 = vsel %vm3453_vm14, %v4869_v5, -inf }
 0xa68   : > { %4878 = vmax.xlane.f32.xlu1 %v4877_v23  ;;  %v4624_v53 = vpop.xlane.xlu1 %4623  ;;  %v4621_v2 = vpop.xlane.xlu0 %4620 }
 0xa69   : > { %v4640_v51 = vmul.f32 %v8868_v38, %v4624_v53  ;;  %v4639_v27 = vmul.f32 %v8876_v40, %v4621_v2  ;;  %v9516_v2 = vld [vmem:[#allocation6_spill] sm:$0xff] }
 0xa6b   : > { %v4754_v45 = vpop.f32.mrf.mxu0 }
 0xa6c   : > { %v4755_v42 = vadd.f32 %v4754_v45, %v4640_v51 }
 0xa6e   : > { %v8871_v34 = vmul.f32 0.25, %v4755_v42  ;;  %v8922_v42 = vld [vmem:[%s7024_s26 + $0x20] sm:$0xff] }
 0xa70   : > { %v4886_v21 = vsel %vm3453_vm14, %v8871_v34, -inf  ;;  %v4630_v47 = vpop.xlane.xlu1 %4629 }
 0xa71   : > { %4887 = vmax.xlane.f32.xlu1 %v4886_v21  ;;  %v4618_v19 = vpop.xlane.xlu2 %4617  ;;  %v4642_v63 = vmul.f32 %v8732_v3, %v4630_v47 }
 0xa72   : > { %v4638_v6 = vmul.f32 %v8891_v43, %v4618_v19 }
 0xa74   : > { %v4699_v10 = vadd.f32 %v4698_v46, %v4638_v6 }
 0xa76   : > { %v8894_v48 = vmul.f32 0.25, %v4699_v10 }
 0xa78   : > { %v4880_v24 = vsel %vm3453_vm14, %v8894_v48, -inf }
 0xa79   : > { %v4627_v12 = vpop.xlane.xlu2 %4626 }
 0xa7a   : > { %v4641_v21 = vmul.f32 %v8922_v42, %v4627_v12 }
 0xa7f   : > { %v4726_v18 = vpop.f32.mrf.mxu2 }
 0xa80   : > { %v4727_v59 = vadd.f32 %v4726_v18, %v4639_v27 }
 0xa81   : > { %v8896_v28 = vpop.permute.xlu2 %5241 }
 0xa82   : > { %v8879_v61 = vmul.f32 0.25, %v4727_v59  ;;  %v5246_v53 = vmul.f32 %v8896_v28, %v8786_v4  ;;  %v5247_v47 = vmul.f32 %v8896_v28, %v8790_v54  ;;  %v4633_v59 = vpop.xlane.xlu0 %4632 }
 0xa84   : > { %v4883_v62 = vsel %vm3453_vm14, %v8879_v61, -inf }
 0xa85   : > { %4884 = vmax.xlane.f32.xlu2 %v4883_v62 }
 0xa88   : > { %v8883_v8 = vpop.permute.xlu1 %4593 }
 0xa89   : > { %v4596_v17 = vmul.f32 %v8883_v8, %v8777_v44  ;;  %v4597_v50 = vmul.f32 %v8883_v8, %v8782_v15  ;;  %v4602_v9 = vmul.f32 %v8883_v8, %v8805_v20  ;;  %v4603_v39 = vmul.f32 %v8883_v8, %v8809_v56 }
 0xa8b   : > { %v6587_v26 = vpack.i.bf16 %v4597_v50, %v4596_v17  ;;  %v6602_v32 = vpack.i.bf16 %v4603_v39, %v4602_v9  ;;  %v8936_v50 = vld [vmem:[%s7024_s26 + $0x30] sm:$0xff] }
 0xa8d   : > { %6588 = vrot.lane.b32.xlu0 %v6587_v26, %s9515_s29  ;;  %v4643_v26 = vmul.f32 %v8936_v50, %v4633_v59 }
 0xa91   : > { %v4782_v45 = vpop.f32.mrf.mxu2 }
 0xab6   : > { %v4810_v49 = vpop.f32.mrf.mxu0 }
 0xab7   : > { %v4811_v36 = vadd.f32 %v4810_v49, %v4642_v63  ;;  %4881 = vmax.xlane.f32.xlu0 %v4880_v24 }
 0xab9   : > { %v8901_v1 = vmul.f32 0.25, %v4811_v36 }
 0xaba   : > { %v4636_v35 = vpop.xlane.xlu2 %4635 }
 0xabb   : > { %v4892_v37 = vsel %vm3453_vm14, %v8901_v1, -inf  ;;  %v4644_v29 = vmul.f32 %v8906_v7, %v4636_v35 }
 0xabc   : > { %4893 = vmax.xlane.f32.xlu2 %v4892_v37 }
 0xabe   : > { %v4866_v0 = vpop.f32.mrf.mxu0 }
 0xabf   : > { %v4867_v25 = vadd.f32 %v4866_v0, %v4644_v29 }
 0xac1   : > { %v8909_v57 = vmul.f32 0.25, %v4867_v25 }
 0xac3   : > { %v4898_v16 = vsel %vm3453_vm14, %v8909_v57, -inf }
 0xac4   : > { %4899 = vmax.xlane.f32.xlu2 %v4898_v16  ;;  %v4838_v17 = vpop.f32.mrf.mxu2 }
 0xac5   : > { %v4839_v19 = vadd.f32 %v4838_v17, %v4643_v26 }
 0xac7   : > { %v8941_v6 = vmul.f32 0.25, %v4839_v19 }
 0xac9   : > { %v4895_v49 = vsel %vm3453_vm14, %v8941_v6, -inf }
 0xadb   : > { %v4879_v46 = vpop.xlane.xlu1 %4878 }
 0xadc   : > { %v4901_v31 = vsub.f32 %v4869_v5, %v4879_v46  ;;  %6603 = vrot.lane.b32.xlu2 %v6602_v32, %s9515_s29  ;;  %v4783_v5 = vadd.f32 %v4782_v45, %v4641_v21  ;;  %v4598_v46 = vmul.f32 %v8883_v8, %v8786_v4 }
 0xade   : > { %v4909_v23 = vmul.f32 1.442695, %v4901_v31  ;;  %v8933_v62 = vmul.f32 0.25, %v4783_v5  ;;  %v4599_v31 = vmul.f32 %v8883_v8, %v8790_v54 }
 0xae0   : > { %6704 = vpow2.f32 %v4909_v23  ;;  %v4889_v12 = vsel %vm3453_vm14, %v8933_v62, -inf  ;;  %v6592_v23 = vpack.i.bf16 %v4599_v31, %v4598_v46 }
 0xae4   : > { %5355 = vrot.lane.b32.xlu2 %v5246_v53, %s9514_s19  ;;  %v4888_v36 = vpop.xlane.xlu1 %4887 }
 0xae5   : > { %v4904_v35 = vsub.f32 %v8871_v34, %v4888_v36 }
 0xae6   : > { %v6705_v51 = vpop.eup %6704 }
 0xae7   : > { %v8926_v27 = vmul.f32 %v6705_v51, %v9516_v2  ;;  %v4915_v16 = vmul.f32 1.442695, %v4904_v35 }
 0xae9   : > { %v4933_v18 = vsel %vm3453_vm14, %v8926_v27, 0.0 }
 0xaea   : > { %4934 = vadd.xlane.f32.xlu0 %v4933_v18 }
 0xaec   : > { %5380 = vrot.lane.b32.xlu2 %v5247_v47, %s9514_s19 }
 0xaf2   : > { %4890 = vmax.xlane.f32.xlu0 %v4889_v12 }
 0xaf8   : > { %v4885_v10 = vpop.xlane.xlu2 %4884 }
 0xaf9   : > { %v4903_v63 = vsub.f32 %v8879_v61, %v4885_v10 }
 0xafa   : > { %4896 = vmax.xlane.f32.xlu0 %v4895_v49 }
 0xafb   : > { %v4913_v24 = vmul.f32 1.442695, %v4903_v63 }
 0xafd   : > { %6706 = vpow2.f32 %v4913_v24  ;;  %v4601_v24 = vmul.f32 %v8883_v8, %v8801_v30 }
 0xafe   : > { %6708 = vpow2.f32 %v4915_v16  ;;  %v5248_v16 = vmul.f32 %v8896_v28, %v8794_v22 }
 0xaff   : > { %v6589_v37 = vpop.permute.xlu0 %6588 }
 0xb00   : > { %v6591_v29 = vunpack.i.h.bf16 %v6589_v37  ;;  %v6590_v0 = vunpack.i.l.bf16 %v6589_v37  ;;  %v5245_v37 = vmul.f32 %v8896_v28, %v8782_v15 }
 0xb02   : > { %5043 = vmatpush.msra.mxu2 %v6590_v0  ;;  %5070 = vmatpush.msra.mxu0 %v6591_v29  ;;  %v5244_v29 = vmul.f32 %v8896_v28, %v8777_v44 }
 0xb03   : > { %v6707_v25 = vpop.eup %6706 }
 0xb04   : > { %v8948_v9 = vmul.f32 %v6707_v25, %v9506_v33  ;;  %v6709_v39 = vpop.eup %6708 }
 0xb05   : > { %v8953_v32 = vmul.f32 %v6709_v39, %v9509_v52 }
 0xb06   : > { %v4939_v61 = vsel %vm3453_vm14, %v8948_v9, 0.0 }
 0xb07   : > { %4940 = vadd.xlane.f32.xlu1 %v4939_v61  ;;  %v4942_v34 = vsel %vm3453_vm14, %v8953_v32, 0.0 }
 0xb15   : > { %4943 = vadd.xlane.f32.xlu2 %v4942_v34 }
 0xb20   : > { %6593 = vrot.lane.b32.xlu1 %v6592_v23, %s9515_s29 }
 0xb2a   : > { %v4882_v53 = vpop.xlane.xlu0 %4881 }
 0xb2b   : > { %v4902_v51 = vsub.f32 %v8894_v48, %v4882_v53 }
 0xb2d   : > { %v4911_v45 = vmul.f32 1.442695, %v4902_v51 }
 0xb2f   : > { %6710 = vpow2.f32 %v4911_v45  ;;  %v4894_v21 = vpop.xlane.xlu2 %4893 }
 0xb30   : > { %v4906_v5 = vsub.f32 %v8901_v1, %v4894_v21 }
 0xb32   : > { %v4919_v18 = vmul.f32 1.442695, %v4906_v5 }
 0xb34   : > { %6712 = vpow2.f32 %v4919_v18  ;;  %v9012_v18 = vld [vmem:[%s9398_s15 + $0x1] ss:$0 sm:$0xff] }
 0xb35   : > { %v6711_v47 = vpop.eup %6710 }
 0xb36   : > { %v8965_v59 = vmul.f32 %v6711_v47, %v9508_v14 }
 0xb37   : > { %v4900_v17 = vpop.xlane.xlu2 %4899 }
 0xb38   : > { %v4908_v26 = vsub.f32 %v8909_v57, %v4900_v17  ;;  %v4936_v19 = vsel %vm3453_vm14, %v8965_v59, 0.0  ;;  %v4600_v57 = vmul.f32 %v8883_v8, %v8794_v22  ;;  %v5250_v8 = vmul.f32 %v8896_v28, %v8805_v20 }
 0xb39   : > { %4937 = vadd.xlane.f32.xlu0 %v4936_v19 }
 0xb3a   : > { %v6713_v12 = vpop.eup %6712  ;;  %v4923_v48 = vmul.f32 1.442695, %v4908_v26  ;;  %v6597_v35 = vpack.i.bf16 %v4601_v24, %v4600_v57 }
 0xb3b   : > { %v8971_v10 = vmul.f32 %v6713_v12, %v9507_v60 }
 0xb3c   : > { %6714 = vpow2.f32 %v4923_v48 }
 0xb3d   : > { %v4948_v1 = vsel %vm3453_vm14, %v8971_v10, 0.0 }
 0xb3e   : > { %4949 = vadd.xlane.f32.xlu2 %v4948_v1 }
 0xb3f   : > { %v6604_v48 = vpop.permute.xlu2 %6603 }
 0xb42   : > { %v6715_v63 = vpop.eup %6714 }
 0xb43   : > { %v8976_v49 = vmul.f32 %v6715_v63, %v9512_v41  ;;  %v5251_v63 = vmul.f32 %v8896_v28, %v8809_v56 }
 0xb45   : > { %v4954_v36 = vsel %vm3453_vm14, %v8976_v49, 0.0 }
 0xb4a   : > { %4955 = vadd.xlane.f32.xlu1 %v4954_v36 }
 0xb4d   : > { %6598 = vrot.lane.b32.xlu0 %v6597_v35, %s9515_s29  ;;  %v5356_v35 = vpop.permute.xlu2 %5355 }
 0xb55   : > { %5330 = vrot.lane.b32.xlu0 %v5245_v37, %s9514_s19  ;;  %v5249_v37 = vmul.f32 %v8896_v28, %v8801_v30  ;;  %v5265_v28 = vmul.f32 %v9012_v18, %v8782_v15 }
 0xb5d   : > { %v4935_v0 = vpop.xlane.xlu0 %4934  ;;  %5305 = vrot.lane.b32.xlu0 %v5244_v29, %s9514_s19  ;;  %v5381_v29 = vpop.permute.xlu2 %5380 }
 0xb5e   : > { %v4957_v25 = vmax.f32 %v4935_v0, 1e-20 }
 0xb60   : > { %6716 = vrcp.f32 %v4957_v25 }
 0xb63   : > { %5455 = vrot.lane.b32.xlu1 %v5250_v8, %s9514_s19 }
 0xb65   : > { %v4891_v61 = vpop.xlane.xlu0 %4890  ;;  %5405 = vrot.lane.b32.xlu0 %v5248_v16, %s9514_s19 }
 0xb66   : > { %v6717_v39 = vpop.eup %6716  ;;  %v4905_v51 = vsub.f32 %v8933_v62, %v4891_v61  ;;  %v5266_v62 = vmul.f32 %v9012_v18, %v8786_v4 }
 0xb67   : > { %v8998_v34 = vmul.f32 %v6717_v39, %v8926_v27 }
 0xb68   : > { %v4917_v27 = vmul.f32 1.442695, %v4905_v51  ;;  %v5278_v26 = vsel %vm1536_vm6, %v5266_v62, 0.0 }
 0xb69   : > { %6292 = vmatmul.msk.f32.vlgmr.msra.gmra.mxu2 %vm3453_vm14, %v8998_v34 }
 0xb6d   : > { %v4897_v46 = vpop.xlane.xlu0 %4896 }
 0xb6e   : > { %v4907_v31 = vsub.f32 %v8941_v6, %v4897_v46 }
 0xb70   : > { %v4921_v23 = vmul.f32 1.442695, %v4907_v31 }
 0xb72   : > { %6718 = vpow2.f32 %v4921_v23  ;;  %v5275_v23 = vsel %vm1536_vm6, %v5265_v28, 0.0 }
 0xb73   : > { %6720 = vpow2.f32 %v4917_v27 }
 0xb78   : > { %v6719_v53 = vpop.eup %6718 }
 0xb79   : > { %v9005_v45 = vmul.f32 %v6719_v53, %v9511_v11  ;;  %v6721_v6 = vpop.eup %6720 }
 0xb7a   : > { %v4941_v5 = vpop.xlane.xlu1 %4940  ;;  %v9017_v17 = vmul.f32 %v6721_v6, %v9510_v58  ;;  %v6606_v6 = vunpack.i.h.bf16 %v6604_v48 }
 0xb7b   : > { %v4951_v21 = vsel %vm3453_vm14, %v9005_v45, 0.0  ;;  %v4959_v47 = vmax.f32 %v4941_v5, 1e-20  ;;  %v5267_v5 = vmul.f32 %v9012_v18, %v8790_v54 }
 0xb7c   : > { %4952 = vadd.xlane.f32.xlu2 %v4951_v21  ;;  %v4945_v19 = vsel %vm3453_vm14, %v9017_v17, 0.0 }
 0xb7d   : > { %6722 = vrcp.f32 %v4959_v47  ;;  %v6605_v47 = vunpack.i.l.bf16 %v6604_v48  ;;  %v5264_v48 = vmul.f32 %v9012_v18, %v8777_v44 }
 0xb83   : > { %v6723_v12 = vpop.eup %6722 }
 0xb84   : > { %v9025_v36 = vmul.f32 %v6723_v12, %v8948_v9 }
 0xb88   : > { %v4944_v8 = vpop.xlane.xlu2 %4943 }
 0xb89   : > { %v4960_v9 = vmax.f32 %v4944_v8, 1e-20 }
 0xb8d   : > { %5279 = vadd.xlane.f32.xlu1 %v5278_v26 }
 0xb8f   : > { %4946 = vadd.xlane.f32.xlu0 %v4945_v19 }
 0xb92   : > { %v6594_v1 = vpop.permute.xlu1 %6593 }
 0xb93   : > { %v6596_v57 = vunpack.i.h.bf16 %v6594_v1  ;;  %v6595_v24 = vunpack.i.l.bf16 %v6594_v1  ;;  %v5269_v1 = vmul.f32 %v9012_v18, %v8801_v30 }
 0xb94   : > { %5480 = vrot.lane.b32.xlu2 %v5251_v63, %s9514_s19 }
 0xb95   : > { %5097 = vmatpush.msrb.mxu2 %v6595_v24  ;;  %5124 = vmatpush.msrb.mxu0 %v6596_v57  ;;  %v5272_v57 = vsel %vm1536_vm6, %v5264_v48, 0.0  ;;  %v5287_v24 = vsel %vm1536_vm6, %v5269_v1, 0.0 }
 0xb96   : > { %6294 = vmatmul.msk.f32.vlgmr.msrb.gmra.mxu2 %vm3453_vm14, %v9025_v36 }
 0xba3   : > { %5430 = vrot.lane.b32.xlu0 %v5249_v37, %s9514_s19 }
 0xbac   : > { %v4938_v0 = vpop.xlane.xlu0 %4937 }
 0xbad   : > { %v4958_v25 = vmax.f32 %v4938_v0, 1e-20  ;;  %v5268_v0 = vmul.f32 %v9012_v18, %v8794_v22 }
 0xbaf   : > { %6724 = vrcp.f32 %v4958_v25 }
 0xbb0   : > { %6726 = vrcp.f32 %v4960_v9  ;;  %v5270_v9 = vmul.f32 %v9012_v18, %v8805_v20 }
 0xbb1   : > { %v4950_v39 = vpop.xlane.xlu2 %4949 }
 0xbb2   : > { %v4962_v46 = vmax.f32 %v4950_v39, 1e-20 }
 0xbb4   : > { %6728 = vrcp.f32 %v4962_v46 }
 0xbb5   : > { %v6725_v16 = vpop.eup %6724 }
 0xbb6   : > { %v9034_v61 = vmul.f32 %v6725_v16, %v8965_v59  ;;  %v6727_v31 = vpop.eup %6726 }
 0xbb7   : > { %v9042_v53 = vmul.f32 %v6727_v31, %v8953_v32  ;;  %v5281_v32 = vsel %vm1536_vm6, %v5267_v5, 0.0 }
 0xbb8   : > { %6293 = vmatmul.msk.f32.vlgmr.msra.gmra.mxu0 %vm3453_vm14, %v9034_v61 }
 0xbba   : > { %v6729_v26 = vpop.eup %6728 }
 0xbbb   : > { %v9050_v19 = vmul.f32 %v6729_v26, %v8971_v10 }
 0xbbd   : > { %5276 = vadd.xlane.f32.xlu2 %v5275_v23  ;;  %v4956_v51 = vpop.xlane.xlu1 %4955 }
 0xbbe   : > { %v4964_v62 = vmax.f32 %v4956_v51, 1e-20 }
 0xbbf   : > { %v6599_v21 = vpop.permute.xlu0 %6598 }
 0xbc0   : > { %v6601_v59 = vunpack.i.h.bf16 %v6599_v21  ;;  %v6600_v27 = vunpack.i.l.bf16 %v6599_v21  ;;  %6295 = vmatmul.msk.f32.vlgmr.msrb.gmra.mxu0 %vm3453_vm14, %v9042_v53  ;;  %6730 = vrcp.f32 %v4964_v62 }
 0xbc2   : > { %5151 = vmatpush.msra.mxu2 %v6600_v27  ;;  %5178 = vmatpush.msra.mxu0 %v6601_v59 }
 0xbc4   : > { %5205 = vmatpush.msrb.mxu2 %v6605_v47  ;;  %5232 = vmatpush.msrb.mxu0 %v6606_v6 }
 0xbc5   : > { %5282 = vadd.xlane.f32.xlu2 %v5281_v32 }
 0xbc6   : > { %v6731_v63 = vpop.eup %6730 }
 0xbc7   : > { %v5331_v12 = vpop.permute.xlu0 %5330  ;;  %v9062_v10 = vmul.f32 %v6731_v63, %v8976_v49  ;;  %v5284_v49 = vsel %vm1536_vm6, %v5268_v0, 0.0 }
 0xbc8   : > { %6297 = vmatmul.msk.f32.vlgmr.msra.gmra.mxu0 %vm3453_vm14, %v9050_v19 }
 0xbc9   : > { %6304 = vmatpush.xpose.msk.msra.mxu0 %vm1536_vm6, %v5356_v35  ;;  %v5271_v35 = vmul.f32 %v9012_v18, %v8809_v56 }
 0xbcb   : > { %v5293_v25 = vsel %vm1536_vm6, %v5271_v35, 0.0 }
 0xbcd   : > { %5273 = vadd.xlane.f32.xlu0 %v5272_v57  ;;  %5288 = vadd.xlane.f32.xlu2 %v5287_v24 }
 0xbcf   : > { %v5306_v37 = vpop.permute.xlu0 %5305 }
 0xbd0   : > { %6299 = vmatmul.msk.f32.vlgmr.msrb.gmra.mxu0 %vm3453_vm14, %v9062_v10  ;;  %6300 = vmatpush.xpose.msk.msra.mxu1 %vm1536_vm6, %v5306_v37 }
 0xbd3   : > { %6301 = vmatmul.msk.f32.vlgmr.msra.gmra.mxu1 %vm1536_vm6, %v8777_v44 }
 0xbd4   : > { %6306 = vmatpush.xpose.msk.msrb.mxu1 %vm1536_vm6, %v5381_v29  ;;  %v5290_v29 = vsel %vm1536_vm6, %v5270_v9, 0.0 }
 0xbd5   : > { %5285 = vadd.xlane.f32.xlu0 %v5284_v49  ;;  %5294 = vadd.xlane.f32.xlu2 %v5293_v25  ;;  %v5456_v8 = vpop.permute.xlu1 %5455 }
 0xbd7   : > { %v5406_v16 = vpop.permute.xlu0 %5405 }
 0xbd8   : > { %6312 = vmatpush.xpose.msk.msra.mxu1 %vm1536_vm6, %v5456_v8  ;;  %6305 = vmatmul.msk.f32.vlgmr.msra.gmra.mxu0 %vm1536_vm6, %v8786_v4 }
 0xbdb   : > { %6307 = vmatmul.msk.f32.vlgmr.msrb.gmra.mxu1 %vm1536_vm6, %v8790_v54 }
 0xbdd   : > { %5291 = vadd.xlane.f32.xlu0 %v5290_v29 }
 0xbe3   : > { %6313 = vmatmul.msk.f32.vlgmr.msra.gmra.mxu1 %vm1536_vm6, %v8805_v20 }
 0xbed   : > { %5252 = vrot.lane.b32.xlu2 %v8847_v13, %s9515_s29 }
 0xbef   : > { %v4953_v46 = vpop.xlane.xlu2 %4952 }
 0xbf0   : > { %v4963_v31 = vmax.f32 %v4953_v46, 1e-20 }
 0xc02   : > { %v4947_v39 = vpop.xlane.xlu0 %4946 }
 0xc03   : > { %v4961_v28 = vmax.f32 %v4947_v39, 1e-20 }
 0xc05   : > { %6732 = vrcp.f32 %v4961_v28 }
 0xc06   : > { %6734 = vrcp.f32 %v4963_v31 }
 0xc0b   : > { %v6733_v23 = vpop.eup %6732 }
 0xc0c   : > { %v9089_v51 = vmul.f32 %v6733_v23, %v9017_v17  ;;  %v6735_v21 = vpop.eup %6734  ;;  %v5481_v17 = vpop.permute.xlu2 %5480 }
 0xc0d   : > { %v9095_v59 = vmul.f32 %v6735_v21, %v9005_v45 }
 0xc0e   : > { %6296 = vmatmul.msk.f32.vlgmr.msra.gmra.mxu2 %vm3453_vm14, %v9089_v51 }
 0xc0f   : > { %6302 = vmatpush.xpose.msk.msra.mxu2 %vm1536_vm6, %v5331_v12  ;;  %v5280_v12 = vpop.xlane.xlu1 %5279 }
 0xc10   : > { %v5298_v57 = vmul.f32 %v8876_v40, %v5280_v12 }
 0xc15   : > { %v5431_v13 = vpop.permute.xlu0 %5430 }
 0xc16   : > { %6298 = vmatmul.msk.f32.vlgmr.msrb.gmra.mxu2 %vm3453_vm14, %v9095_v59  ;;  %6310 = vmatpush.xpose.msk.msrb.mxu0 %vm1536_vm6, %v5431_v13 }
 0xc17   : > { %6308 = vmatpush.xpose.msk.msrb.mxu2 %vm1536_vm6, %v5406_v16 }
 0xc19   : > { %6311 = vmatmul.msk.f32.vlgmr.msrb.gmra.mxu0 %vm1536_vm6, %v8801_v30 }
 0xc1e   : > { %6303 = vmatmul.msk.f32.vlgmr.msra.gmra.mxu2 %vm1536_vm6, %v8782_v15 }
 0xc1f   : > { %6314 = vmatpush.xpose.msk.msra.mxu2 %vm1536_vm6, %v5481_v17 }
 0xc26   : > { %6309 = vmatmul.msk.f32.vlgmr.msrb.gmra.mxu2 %vm1536_vm6, %v8794_v22 }
 0xc2e   : > { %6315 = vmatmul.msk.f32.vlgmr.msra.gmra.mxu2 %vm1536_vm6, %v8809_v56 }
 0xc30   : > { %v9116_v47 = vpop.xlane.xlu2 %5276 }
 0xc35   : > { %v9110_v45 = vpop.f32.mrf.mxu0 }
 0xc38   : > { %v5283_v24 = vpop.xlane.xlu2 %5282 }
 0xc39   : > { %v5299_v49 = vmul.f32 %v8868_v38, %v5283_v24 }
 0xc3d   : > { %v9112_v27 = vpop.f32.mrf.mxu0 }
 0xc40   : > { %v5274_v6 = vpop.xlane.xlu0 %5273  ;;  %v5289_v17 = vpop.xlane.xlu2 %5288 }
 0xc41   : > { %v5296_v26 = vmul.f32 %v8863_v55, %v5274_v6  ;;  %v5301_v6 = vmul.f32 %v8732_v3, %v5289_v17  ;;  %v9145_v3 = vpop.f32.mrf.mxu2 }
 0xc45   : > { %v9114_v5 = vpop.f32.mrf.mxu0 }
 0xc48   : > { %v9121_v1 = vpop.xlane.xlu0 %5285 }
 0xc4d   : > { %v9118_v62 = vpop.f32.mrf.mxu0 }
 0xc50   : > { %v5326_v32 = vpop.f32.mrf.mxu1  ;;  %v5292_v39 = vpop.xlane.xlu0 %5291 }
 0xc51   : > { %v5327_v48 = vadd.f32 %v5326_v32, %v5296_v26  ;;  %v5302_v46 = vmul.f32 %v8936_v50, %v5292_v39 }
 0xc53   : > { %v5504_v63 = vmul.f32 0.25, %v5327_v48 }
 0xc55   : > { %v5376_v37 = vpop.f32.mrf.mxu0  ;;  %v5512_v0 = vsel %vm3453_vm14, %v5504_v63, -inf }
 0xc56   : > { %v5377_v35 = vadd.f32 %v5376_v37, %v5298_v57  ;;  %5513 = vmax.xlane.f32.xlu0 %v5512_v0  ;;  %v5295_v57 = vpop.xlane.xlu2 %5294 }
 0xc58   : > { %v9126_v25 = vmul.f32 0.25, %v5377_v35  ;;  %v5401_v8 = vpop.f32.mrf.mxu1 }
 0xc59   : > { %v5402_v9 = vadd.f32 %v5401_v8, %v5299_v49  ;;  %v9147_v49 = vpop.f32.mrf.mxu2 }
 0xc5a   : > { %v5518_v29 = vsel %vm3453_vm14, %v9126_v25, -inf }
 0xc5b   : > { %v5507_v16 = vmul.f32 0.25, %v5402_v9  ;;  %5519 = vmax.xlane.f32.xlu2 %v5518_v29 }
 0xc5d   : > { %v5521_v28 = vsel %vm3453_vm14, %v5507_v16, -inf }
 0xc5e   : > { %5522 = vmax.xlane.f32.xlu0 %v5521_v28  ;;  %v9138_v24 = vpop.permute.xlu2 %5252 }
 0xc5f   : > { %v5255_v37 = vmul.f32 %v9138_v24, %v8777_v44  ;;  %v5256_v0 = vmul.f32 %v9138_v24, %v8782_v15 }
 0xc60   : > { %v5476_v31 = vpop.f32.mrf.mxu1 }
 0xc61   : > { %v5477_v23 = vadd.f32 %v5476_v31, %v5302_v46  ;;  %v6607_v35 = vpack.i.bf16 %v5256_v0, %v5255_v37 }
 0xc63   : > { %v5510_v21 = vmul.f32 0.25, %v5477_v23 }
 0xc65   : > { %v5530_v13 = vsel %vm3453_vm14, %v5510_v21, -inf }
 0xc66   : > { %5531 = vmax.xlane.f32.xlu0 %v5530_v13 }
 0xc91   : > { %v9149_v8 = vpop.f32.mrf.mxu2 }
 0xc96   : > { %v5451_v26 = vpop.f32.mrf.mxu0 }
 0xc97   : > { %v5452_v32 = vadd.f32 %v5451_v26, %v5301_v6  ;;  %v4983_v26 = vmul.f32 %v8876_v40, %v9025_v36  ;;  %v5257_v36 = vmul.f32 %v9138_v24, %v8786_v4 }
 0xc99   : > { %v9134_v12 = vmul.f32 0.25, %v5452_v32  ;;  %v9151_v46 = vpop.f32.mrf.mxu2  ;;  %v4995_v0 = vsel %vm3453_vm14, %v4983_v26, 0.0 }
 0xc9b   : > { %v5527_v48 = vsel %vm3453_vm14, %v9134_v12, -inf }
 0xc9c   : > { %5528 = vmax.xlane.f32.xlu2 %v5527_v48 }
 0xca1   : > { %v5351_v37 = vpop.f32.mrf.mxu2 }
 0xcb4   : > { %6608 = vrot.lane.b32.xlu2 %v6607_v35, %s9515_s29 }
 0xcc9   : > { %v5514_v9 = vpop.xlane.xlu0 %5513 }
 0xcca   : > { %v5536_v29 = vsub.f32 %v5504_v63, %v5514_v9 }
 0xccc   : > { %v5544_v39 = vmul.f32 1.442695, %v5536_v29 }
 0xcce   : > { %6736 = vpow2.f32 %v5544_v39 }
 0xcd1   : > { %v5523_v28 = vpop.xlane.xlu0 %5522 }
 0xcd2   : > { %v5539_v31 = vsub.f32 %v5507_v16, %v5523_v28  ;;  %v5297_v16 = vmul.f32 %v8891_v43, %v9116_v47  ;;  %v5426_v47 = vpop.f32.mrf.mxu2 }
 0xcd4   : > { %v6737_v23 = vpop.eup %6736  ;;  %v5550_v13 = vmul.f32 1.442695, %v5539_v31  ;;  %v5352_v9 = vadd.f32 %v5351_v37, %v5297_v16  ;;  %v5520_v16 = vpop.xlane.xlu2 %5519 }
 0xcd5   : > { %v5560_v17 = vmul.f32 %v6737_v23, %v9516_v2 }
 0xcd6   : > { %6738 = vpow2.f32 %v5550_v13  ;;  %v5505_v39 = vmul.f32 0.25, %v5352_v9  ;;  %v5300_v13 = vmul.f32 %v8922_v42, %v9121_v1  ;;  %v5538_v9 = vsub.f32 %v9126_v25, %v5520_v16 }
 0xcd7   : > { %v5568_v6 = vsel %vm3453_vm14, %v5560_v17, 0.0 }
 0xcd8   : > { %5569 = vadd.xlane.f32.xlu0 %v5568_v6  ;;  %v5515_v28 = vsel %vm3453_vm14, %v5505_v39, -inf  ;;  %v5427_v6 = vadd.f32 %v5426_v47, %v5300_v13  ;;  %v5548_v1 = vmul.f32 1.442695, %v5538_v9 }
 0xcd9   : > { %v5532_v32 = vpop.xlane.xlu0 %5531 }
 0xcda   : > { %v5542_v48 = vsub.f32 %v5510_v21, %v5532_v32  ;;  %v5258_v21 = vmul.f32 %v9138_v24, %v8790_v54  ;;  %v5508_v32 = vmul.f32 0.25, %v5427_v6 }
 0xcdc   : > { %v6739_v63 = vpop.eup %6738  ;;  %v5556_v2 = vmul.f32 1.442695, %v5542_v48  ;;  %v6612_v23 = vpack.i.bf16 %v5258_v21, %v5257_v36  ;;  %v5501_v48 = vpop.f32.mrf.mxu2 }
 0xcdd   : > { %4996 = vadd.xlane.f32.xlu2 %v4995_v0  ;;  %v5563_v35 = vmul.f32 %v6739_v63, %v9509_v52  ;;  %v5303_v63 = vmul.f32 %v8906_v7, %v5295_v57  ;;  %v5524_v0 = vsel %vm3453_vm14, %v5508_v32, -inf }
 0xcde   : > { %6740 = vpow2.f32 %v5556_v2 }
 0xcdf   : > { %v5577_v29 = vsel %vm3453_vm14, %v5563_v35, 0.0  ;;  %v5502_v37 = vadd.f32 %v5501_v48, %v5303_v63  ;;  %6742 = vpow2.f32 %v5548_v1 }
 0xce0   : > { %5578 = vadd.xlane.f32.xlu1 %v5577_v29 }
 0xce4   : > { %v6741_v31 = vpop.eup %6740 }
 0xce5   : > { %v9168_v52 = vmul.f32 %v6741_v31, %v9511_v11  ;;  %v5511_v11 = vmul.f32 0.25, %v5502_v37  ;;  %v6743_v29 = vpop.eup %6742 }
 0xce6   : > { %v9180_v21 = vmul.f32 %v6743_v29, %v9506_v33 }
 0xce7   : > { %v5586_v26 = vsel %vm3453_vm14, %v9168_v52, 0.0  ;;  %v5533_v2 = vsel %vm3453_vm14, %v5511_v11, -inf }
 0xce8   : > { %5516 = vmax.xlane.f32.xlu1 %v5515_v28  ;;  %v5574_v57 = vsel %vm3453_vm14, %v9180_v21, 0.0 }
 0xcec   : > { %6613 = vrot.lane.b32.xlu0 %v6612_v23, %s9515_s29 }
 0xcf0   : > { %5587 = vadd.xlane.f32.xlu1 %v5586_v26 }
 0xcf8   : > { %5525 = vmax.xlane.f32.xlu1 %v5524_v0 }
 0xd00   : > { %5534 = vmax.xlane.f32.xlu1 %v5533_v2 }
 0xd0f   : > { %v5529_v36 = vpop.xlane.xlu2 %5528 }
 0xd10   : > { %v5541_v63 = vsub.f32 %v9134_v12, %v5529_v36 }
 0xd12   : > { %v5554_v29 = vmul.f32 1.442695, %v5541_v63 }
 0xd16   : > { %5575 = vadd.xlane.f32.xlu0 %v5574_v57 }
 0xd17   : > { %v6609_v28 = vpop.permute.xlu2 %6608 }
 0xd18   : > { %v6611_v31 = vunpack.i.h.bf16 %v6609_v28  ;;  %v6610_v47 = vunpack.i.l.bf16 %v6609_v28 }
 0xd1a   : > { %5638 = vmatpush.msra.mxu0 %v6610_v47  ;;  %5665 = vmatpush.msrb.mxu1 %v6611_v31 }
 0xd4b   : > { %v5570_v23 = vpop.xlane.xlu0 %5569 }
 0xd4c   : > { %v5592_v13 = vmax.f32 %v5570_v23, 1e-20 }
 0xd4e   : > { %6744 = vrcp.f32 %v5592_v13 }
 0xd53   : > { %v5579_v25 = vpop.xlane.xlu1 %5578 }
 0xd54   : > { %v6745_v6 = vpop.eup %6744  ;;  %v5595_v26 = vmax.f32 %v5579_v25, 1e-20 }
 0xd55   : > { %v9184_v48 = vmul.f32 %v6745_v6, %v5560_v17 }
 0xd56   : > { %6746 = vrcp.f32 %v5595_v26 }
 0xd57   : > { %6316 = vmatmul.msk.f32.vlgmr.msra.gmra.mxu0 %vm3453_vm14, %v9184_v48 }
 0xd5b   : > { %v5517_v33 = vpop.xlane.xlu1 %5516 }
 0xd5c   : > { %v5537_v37 = vsub.f32 %v5505_v39, %v5517_v33  ;;  %v6747_v0 = vpop.eup %6746 }
 0xd5d   : > { %v9189_v57 = vmul.f32 %v6747_v0, %v5563_v35  ;;  %v5260_v0 = vmul.f32 %v9138_v24, %v8801_v30 }
 0xd5e   : > { %v5546_v16 = vmul.f32 1.442695, %v5537_v37  ;;  %v6614_v2 = vpop.permute.xlu0 %6613 }
 0xd5f   : > { %v6616_v9 = vunpack.i.h.bf16 %v6614_v2  ;;  %v6615_v1 = vunpack.i.l.bf16 %v6614_v2 }
 0xd60   : > { %6748 = vpow2.f32 %v5546_v16  ;;  %v5261_v16 = vmul.f32 %v9138_v24, %v8805_v20 }
 0xd61   : > { %5692 = vmatpush.msrb.mxu2 %v6615_v1  ;;  %5719 = vmatpush.msrb.mxu0 %v6616_v9  ;;  %6750 = vpow2.f32 %v5554_v29 }
 0xd62   : > { %6319 = vmatmul.msk.f32.vlgmr.msrb.gmra.mxu0 %vm3453_vm14, %v9189_v57 }
 0xd63   : > { %v5588_v17 = vpop.xlane.xlu1 %5587 }
 0xd66   : > { %v6749_v28 = vpop.eup %6748 }
 0xd67   : > { %v9194_v12 = vmul.f32 %v6749_v28, %v9508_v14  ;;  %v6751_v36 = vpop.eup %6750  ;;  %v4985_v28 = vmul.f32 %v8922_v42, %v9089_v51  ;;  %v4982_v51 = vmul.f32 %v8891_v43, %v9034_v61  ;;  %v9247_v61 = vld [vmem:[%s7024_s26 + $0x28] sm:$0xff] }
 0xd68   : > { %v9199_v47 = vmul.f32 %v6751_v36, %v9507_v60 }
 0xd69   : > { %v5571_v39 = vsel %vm3453_vm14, %v9194_v12, 0.0 }
 0xd6a   : > { %5572 = vadd.xlane.f32.xlu1 %v5571_v39  ;;  %v5583_v13 = vsel %vm3453_vm14, %v9199_v47, 0.0  ;;  %v5001_v39 = vsel %vm3453_vm14, %v4985_v28, 0.0 }
 0xd6b   : > { %v5526_v31 = vpop.xlane.xlu1 %5525 }
 0xd6c   : > { %v5540_v35 = vsub.f32 %v5508_v32, %v5526_v31  ;;  %v5832_v31 = vmul.f32 %v8863_v55, %v9184_v48  ;;  %v4987_v48 = vmul.f32 %v8936_v50, %v9095_v59  ;;  %v4988_v59 = vmul.f32 %v8906_v7, %v9062_v10 }
 0xd6e   : > { %v5552_v23 = vmul.f32 1.442695, %v5540_v35  ;;  %v5840_v35 = vsel %vm3453_vm14, %v5832_v31, 0.0 }
 0xd70   : > { %6752 = vpow2.f32 %v5552_v23  ;;  %v4981_v23 = vmul.f32 %v8863_v55, %v8998_v34  ;;  %v5007_v55 = vsel %vm3453_vm14, %v4987_v48, 0.0 }
 0xd72   : > { %5584 = vadd.xlane.f32.xlu1 %v5583_v13  ;;  %v5598_v13 = vmax.f32 %v5588_v17, 1e-20  ;;  %v5835_v17 = vmul.f32 %v8868_v38, %v9189_v57 }
 0xd73   : > { %v5535_v25 = vpop.xlane.xlu1 %5534 }
 0xd74   : > { %v5543_v6 = vsub.f32 %v5511_v11, %v5535_v25  ;;  %v4984_v11 = vmul.f32 %v8868_v38, %v9042_v53  ;;  %v4989_v25 = vsel %vm3453_vm14, %v4981_v23, 0.0 }
 0xd76   : > { %v6753_v14 = vpop.eup %6752  ;;  %v5558_v26 = vmul.f32 1.442695, %v5543_v6  ;;  %v4998_v9 = vsel %vm3453_vm14, %v4984_v11, 0.0  ;;  %v4997_v11 = vpop.xlane.xlu2 %4996 }
 0xd77   : > { %v9204_v33 = vmul.f32 %v6753_v14, %v9510_v58  ;;  %v5259_v58 = vmul.f32 %v9138_v24, %v8794_v22 }
 0xd78   : > { %6754 = vpow2.f32 %v5558_v26 }
 0xd79   : > { %v5580_v32 = vsel %vm3453_vm14, %v9204_v33, 0.0  ;;  %v6617_v1 = vpack.i.bf16 %v5260_v0, %v5259_v58 }
 0xd7a   : > { %5581 = vadd.xlane.f32.xlu0 %v5580_v32 }
 0xd7e   : > { %v6755_v60 = vpop.eup %6754 }
 0xd7f   : > { %v9209_v63 = vmul.f32 %v6755_v60, %v9512_v41  ;;  %v5262_v41 = vmul.f32 %v9138_v24, %v8809_v56 }
 0xd81   : > { %v5589_v37 = vsel %vm3453_vm14, %v9209_v63, 0.0  ;;  %v6622_v53 = vpack.i.bf16 %v5262_v41, %v5261_v16 }
 0xd82   : > { %5590 = vadd.xlane.f32.xlu2 %v5589_v37 }
 0xd89   : > { %v5576_v2 = vpop.xlane.xlu0 %5575 }
 0xd8a   : > { %v5594_v29 = vmax.f32 %v5576_v2, 1e-20  ;;  %4999 = vadd.xlane.f32.xlu2 %v4998_v9 }
 0xd8b   : > { %6618 = vrot.lane.b32.xlu1 %v6617_v1, %s9515_s29 }
 0xd8c   : > { %6756 = vrcp.f32 %v5594_v29 }
 0xd8d   : > { %6758 = vrcp.f32 %v5598_v13 }
 0xd8e   : > { %6623 = vrot.lane.b32.xlu0 %v6622_v53, %s9515_s29 }
 0xd92   : > { %v6757_v36 = vpop.eup %6756  ;;  %5002 = vadd.xlane.f32.xlu2 %v5001_v39 }
 0xd93   : > { %v5610_v24 = vmul.f32 %v6757_v36, %v9180_v21  ;;  %v4992_v21 = vsel %vm3453_vm14, %v4982_v51, 0.0  ;;  %v6759_v6 = vpop.eup %6758 }
 0xd94   : > { %v5614_v14 = vmul.f32 %v6759_v6, %v9168_v52 }
 0xd95   : > { %6318 = vmatmul.msk.f32.vlgmr.msrb.gmra.mxu2 %vm3453_vm14, %v5610_v24  ;;  %v5834_v10 = vmul.f32 %v8876_v40, %v5610_v24 }
 0xd96   : > { %v5838_v26 = vmul.f32 %v8936_v50, %v5614_v14 }
 0xd97   : > { %v5846_v60 = vsel %vm3453_vm14, %v5834_v10, 0.0 }
 0xd98   : > { %v5858_v32 = vsel %vm3453_vm14, %v5838_v26, 0.0 }
 0xd9a   : > { %5841 = vadd.xlane.f32.xlu2 %v5840_v35 }
 0xdb2   : > { %5888 = vrot.lane.b32.xlu2 %v8777_v44, %s9513_s30  ;;  %v4986_v44 = vmul.f32 %v9247_v61, %v9050_v19  ;;  %v5010_v19 = vsel %vm3453_vm14, %v4988_v59, 0.0 }
 0xdb4   : > { %v5004_v34 = vsel %vm3453_vm14, %v4986_v44, 0.0 }
 0xdb5   : > { %4993 = vadd.xlane.f32.xlu1 %v4992_v21 }
 0xdb8   : > { %4990 = vadd.xlane.f32.xlu0 %v4989_v25 }
 0xdba   : > { %5894 = vrot.lane.b32.xlu2 %v8790_v54, %s9513_s30  ;;  %v5849_v54 = vsel %vm3453_vm14, %v5835_v17, 0.0 }
 0xdbd   : > { %5008 = vadd.xlane.f32.xlu1 %v5007_v55 }
 0xdc0   : > { %5005 = vadd.xlane.f32.xlu0 %v5004_v34 }
 0xdc5   : > { %5850 = vadd.xlane.f32.xlu1 %v5849_v54 }
 0xdc8   : > { %5011 = vadd.xlane.f32.xlu0 %v5010_v19 }
 0xdcd   : > { %5859 = vadd.xlane.f32.xlu1 %v5858_v32 }
 0xdd4   : > { %v5640_v54 = vpop.f32.mrf.mxu0 }
 0xddc   : > { %5890 = vrot.lane.b32.xlu0 %v8782_v15, %s9513_s30 }
 0xddd   : > { %v5573_v38 = vpop.xlane.xlu1 %5572 }
 0xdde   : > { %v5593_v57 = vmax.f32 %v5573_v38, 1e-20 }
 0xde0   : > { %6760 = vrcp.f32 %v5593_v57 }
 0xde3   : > { %5847 = vadd.xlane.f32.xlu2 %v5846_v60 }
 0xde4   : > { %5896 = vrot.lane.b32.xlu0 %v8794_v22, %s9513_s30 }
 0xde5   : > { %v5585_v58 = vpop.xlane.xlu1 %5584 }
 0xde6   : > { %v6761_v52 = vpop.eup %6760  ;;  %5892 = vrot.lane.b32.xlu1 %v8786_v4, %s9513_s30  ;;  %v5597_v40 = vmax.f32 %v5585_v58, 1e-20 }
 0xde7   : > { %v5609_v50 = vmul.f32 %v6761_v52, %v9194_v12 }
 0xde9   : > { %6317 = vmatmul.msk.f32.vlgmr.msrb.gmra.mxu1 %vm3453_vm14, %v5609_v50 }
 0xded   : > { %v5582_v15 = vpop.xlane.xlu0 %5581 }
 0xdee   : > { %v5596_v37 = vmax.f32 %v5582_v15, 1e-20 }
 0xdf0   : > { %6762 = vrcp.f32 %v5596_v37 }
 0xdf1   : > { %6764 = vrcp.f32 %v5597_v40 }
 0xdf5   : > { %v5591_v16 = vpop.xlane.xlu2 %5590 }
 0xdf6   : > { %v6763_v0 = vpop.eup %6762  ;;  %v5599_v2 = vmax.f32 %v5591_v16, 1e-20 }
 0xdf7   : > { %v5612_v41 = vmul.f32 %v6763_v0, %v9204_v33  ;;  %v6765_v9 = vpop.eup %6764  ;;  %v5721_v0 = vpop.f32.mrf.mxu0 }
 0xdf8   : > { %6766 = vrcp.f32 %v5599_v2  ;;  %v5613_v53 = vmul.f32 %v6765_v9, %v9199_v47  ;;  %v5833_v47 = vmul.f32 %v8891_v43, %v5609_v50 }
 0xdf9   : > { %v5836_v22 = vmul.f32 %v8922_v42, %v5612_v41 }
 0xdfa   : > { %v5843_v31 = vsel %vm3453_vm14, %v5833_v47, 0.0  ;;  %v5837_v51 = vmul.f32 %v9247_v61, %v5613_v53 }
 0xdfb   : > { %v5852_v4 = vsel %vm3453_vm14, %v5836_v22, 0.0 }
 0xdfc   : > { %5853 = vadd.xlane.f32.xlu2 %v5852_v4  ;;  %v5855_v23 = vsel %vm3453_vm14, %v5837_v51, 0.0 }
 0xdfd   : > { %v6619_v12 = vpop.permute.xlu1 %6618  ;;  %v5000_v43 = vpop.xlane.xlu2 %4999 }
 0xdfe   : > { %v6621_v1 = vunpack.i.h.bf16 %v6619_v12  ;;  %v6620_v29 = vunpack.i.l.bf16 %v6619_v12  ;;  %v6767_v42 = vpop.eup %6766 }
 0xdff   : > { %v5615_v33 = vmul.f32 %v6767_v42, %v9209_v63 }
 0xe00   : > { %v6624_v28 = vpop.permute.xlu0 %6623  ;;  %5746 = vmatpush.msra.mxu1 %v6620_v29  ;;  %5773 = vmatpush.msra.mxu2 %v6621_v1 }
 0xe01   : > { %v6626_v39 = vunpack.i.h.bf16 %v6624_v28  ;;  %v6625_v36 = vunpack.i.l.bf16 %v6624_v28  ;;  %6320 = vmatmul.msk.f32.vlgmr.msra.gmra.mxu1 %vm3453_vm14, %v5612_v41  ;;  %6321 = vmatmul.msk.f32.vlgmr.msra.gmra.mxu2 %vm3453_vm14, %v5613_v53  ;;  %v5839_v24 = vmul.f32 %v8906_v7, %v5615_v33 }
 0xe03   : > { %5800 = vmatpush.msra.mxu0 %v6625_v36  ;;  %5827 = vmatpush.msrb.mxu1 %v6626_v39  ;;  %v5861_v35 = vsel %vm3453_vm14, %v5839_v24, 0.0 }
 0xe04   : > { %6322 = vmatmul.msk.f32.vlgmr.msra.gmra.mxu0 %vm3453_vm14, %v5614_v14 }
 0xe05   : > { %v5003_v7 = vpop.xlane.xlu2 %5002 }
 0xe09   : > { %6323 = vmatmul.msk.f32.vlgmr.msrb.gmra.mxu1 %vm3453_vm14, %v5615_v33 }
 0xe0d   : > { %v5842_v21 = vpop.xlane.xlu2 %5841 }
 0xe0e   : > { %5844 = vadd.xlane.f32.xlu0 %v5843_v31  ;;  %v5872_v38 = vmul.f32 %v9012_v18, %v5842_v21 }
 0xe10   : > { %5862 = vadd.xlane.f32.xlu1 %v5861_v35 }
 0xe14   : > { %5898 = vrot.lane.b32.xlu2 %v8801_v30, %s9513_s30 }
 0xe15   : > { %v5889_v48 = vpop.permute.xlu2 %5888 }
 0xe16   : > { %5856 = vadd.xlane.f32.xlu0 %v5855_v23 }
 0xe18   : > { %v5694_v57 = vpop.f32.mrf.mxu2 }
 0xe1d   : > { %v5895_v55 = vpop.permute.xlu2 %5894 }
 0xe28   : > { %v4994_v13 = vpop.xlane.xlu1 %4993 }
 0xe29   : > { %5902 = vrot.lane.b32.xlu1 %v8809_v56, %s9513_s30  ;;  %v9300_v56 = vld [vmem:[%s9398_s15] ss:$0 sm:$0xff] }
 0xe2a   : > { %5900 = vrot.lane.b32.xlu0 %v8805_v20, %s9513_s30  ;;  %v5015_v59 = vmul.f32 %v9300_v56, %v4997_v11  ;;  %v5016_v14 = vmul.f32 %v9300_v56, %v5000_v43  ;;  %v5017_v60 = vmul.f32 %v9300_v56, %v5003_v7  ;;  %v5014_v15 = vmul.f32 %v9300_v56, %v4994_v13  ;;  %s9423_s30 = sand.u32 1, %s6845_s22  }
 0xe2b   : > { %v4991_v63 = vpop.xlane.xlu0 %4990  ;;  %s6100_s29 = sshll.u32 %s9423_s30, 3  ;;  %s6024_s30 = sshll.u32 %s6020_s28, 4  ;;  %s6025_s30 = int_to_ptr.hbm [resolvable:$true] %s6024_s30 }
 0xe2c   : > { %v5013_v20 = vmul.f32 %v9300_v56, %v4991_v63  ;;  %v5100_v52 = vadd.f32 %v9147_v49, %v5015_v59  ;;  %v5127_v50 = vadd.f32 %v9112_v27, %v5016_v14  ;;  %v5154_v41 = vadd.f32 %v9149_v8, %v5017_v60  ;;  %s531_s26 = scalar_lea.vmem [#allocation2], %s6100_s29  ;;  %s6805_s29 = sshra.s32 %s6025_s30, 4  ;;  %s6806_s29 = int_to_ptr.hbm [resolvable:$true] %s6805_s29 }
 0xe2d   : > { %v5073_v4 = vadd.f32 %v9110_v45, %v5014_v15  ;;  %s6022_s19 = sshll.u32 %s531_s26, 4  ;;  %s6807_s20 = scalar_lea.hbm %s6806_s29, 8  ;;  %s6023_s19 = int_to_ptr.vmem [resolvable:$true] %s6022_s19 }
 0xe2e   : > { %v5046_v17 = vadd.f32 %v9145_v3, %v5013_v20  ;;  %v5866_v11 = vadd.f32 %v5694_v57, %v5100_v52  ;;  %v5867_v2 = vadd.f32 %v5721_v0, %v5127_v50  ;;  %p6808_p11 = scmp.ne.s32.totalorder %s6806_s29, %s6807_s20  ;;  %p6812_p0 = scmp.lt.s32.totalorder %s6806_s29, %s9399_s16 }
 0xe2f   : > { %p6813_p1 = scmp.lt.s32.totalorder %s6811_s2, %s6807_s20 }
 0xe30   : > { %v9293_v61 = vpop.xlane.xlu1 %5008  ;;  %v5864_v19 = vadd.f32 %v5640_v54, %v5046_v17  ;;  %p6809_p12 = pnand %p6808_p11, %p6980_p5 }
 0xe31   : > { %p6814_p2 = por %p6813_p1, %p6812_p0 }
 0xe32   : > { %v5880_v37 = vadd.f32 %v5872_v38, %v5864_v19  ;;  %p6810_p13 = pneg %p6809_p12 }
 0xe33   : > { %v5006_v25 = vpop.xlane.xlu0 %5005 }
 0xe34   : > { %v5912_v22 = vadd.f32 %v5889_v48, %v5880_v37  ;;  %v5018_v42 = vmul.f32 %v9300_v56, %v5006_v25  ;;  %p6815_p3 = pnand %p6814_p2, %p6810_p13 }
 0xe36   : > { %v5920_v36 = vmax.f32 %v5912_v22, 0.0  ;;  %v5181_v23 = vadd.f32 %v9114_v5, %v5018_v42 }
 0xe38   : > { %v5851_v34 = vpop.xlane.xlu1 %5850  ;;  %v5928_v35 = vsel %vm1536_vm6, %v5920_v36, 0.0 }
 0xe39   : > { %v5875_v58 = vmul.f32 %v9012_v18, %v5851_v34  ;;  %v5929_v25 = vrot.slane %v5928_v35, 4 }
 0xe3b   : > { %v9295_v44 = vpop.xlane.xlu0 %5011  ;;  %v5883_v1 = vadd.f32 %v5875_v58, %v5867_v2  ;;  %v5930_v14 = vadd.f32 %v5929_v25, %v5928_v35 }
 0xe3c   : > { %v5020_v19 = vmul.f32 %v9300_v56, %v9295_v44 }
 0xe3d   : > { %v5915_v47 = vadd.f32 %v5895_v55, %v5883_v1  ;;  %v5931_v50 = vrot.slane %v5930_v14, 2 }
 0xe3e   : > { %v5235_v0 = vadd.f32 %v9118_v62, %v5020_v19 }
 0xe3f   : > { %v5923_v63 = vmax.f32 %v5915_v47, 0.0  ;;  %v5932_v22 = vadd.f32 %v5931_v50, %v5930_v14 }
 0xe40   : > { %v9307_v10 = vpop.xlane.xlu1 %5859 }
 0xe41   : > { %v5949_v59 = vsel %vm1536_vm6, %v5923_v63, 0.0  ;;  %v5878_v1 = vmul.f32 %v9012_v18, %v9307_v10  ;;  %v5933_v62 = vrot.slane %v5932_v22, 1 }
 0xe42   : > { %v5950_v38 = vrot.slane %v5949_v59, 4 }
 0xe43   : > { %v5934_v35 = vadd.f32 %v5933_v62, %v5932_v22 }
 0xe44   : > { %v5951_v44 = vadd.f32 %v5950_v38, %v5949_v59 }
 0xe45   : > { %v5984_v25 = vmul.f32 0.125, %v5934_v35 }
 0xe4e   : > { %v5891_v30 = vpop.permute.xlu0 %5890 }
 0xe56   : > { %v5848_v26 = vpop.xlane.xlu2 %5847  ;;  %v5897_v32 = vpop.permute.xlu0 %5896 }
 0xe57   : > { %v5874_v3 = vmul.f32 %v9012_v18, %v5848_v26 }
 0xe58   : > { %v5893_v27 = vpop.permute.xlu1 %5892 }
 0xe59   : > { %v5882_v16 = vadd.f32 %v5874_v3, %v5866_v11 }
 0xe5b   : > { %v5914_v28 = vadd.f32 %v5893_v27, %v5882_v16 }
 0xe5d   : > { %v5922_v31 = vmax.f32 %v5914_v28, 0.0 }
 0xe5f   : > { %v5942_v20 = vsel %vm1536_vm6, %v5922_v31, 0.0 }
 0xe60   : > { %v5943_v54 = vrot.slane %v5942_v20, 4 }
 0xe62   : > { %v5944_v52 = vadd.f32 %v5943_v54, %v5942_v20 }
 0xe66   : > { %v5667_v6 = vpop.f32.mrf.mxu1 }
 0xe67   : > { %v5865_v29 = vadd.f32 %v5667_v6, %v5073_v4 }
 0xe6f   : > { %v5854_v49 = vpop.xlane.xlu2 %5853 }
 0xe70   : > { %v5876_v39 = vmul.f32 %v9012_v18, %v5854_v49 }
 0xe77   : > { %v5899_v34 = vpop.permute.xlu2 %5898 }
 0xe7e   : > { %v5748_v40 = vpop.f32.mrf.mxu1 }
 0xe7f   : > { %v5868_v9 = vadd.f32 %v5748_v40, %v5154_v41 }
 0xe81   : > { %v5845_v12 = vpop.xlane.xlu0 %5844  ;;  %v5884_v8 = vadd.f32 %v5876_v39, %v5868_v9  ;;  %v5802_v40 = vpop.f32.mrf.mxu0 }
 0xe82   : > { %v5873_v53 = vmul.f32 %v9012_v18, %v5845_v12  ;;  %v5952_v12 = vrot.slane %v5951_v44, 2 }
 0xe83   : > { %v5916_v43 = vadd.f32 %v5897_v32, %v5884_v8  ;;  %v5019_v32 = vmul.f32 %v9300_v56, %v9293_v61  ;;  %v5863_v15 = vpop.xlane.xlu1 %5862  ;;  %v5945_v61 = vrot.slane %v5944_v52, 2 }
 0xe84   : > { %v5881_v33 = vadd.f32 %v5873_v53, %v5865_v29  ;;  %v5775_v45 = vpop.f32.mrf.mxu2  ;;  %v5879_v9 = vmul.f32 %v9012_v18, %v5863_v15  ;;  %v5953_v8 = vadd.f32 %v5952_v12, %v5951_v44 }
 0xe85   : > { %v5869_v13 = vadd.f32 %v5775_v45, %v5181_v23  ;;  %v5924_v17 = vmax.f32 %v5916_v43, 0.0  ;;  %v5208_v16 = vadd.f32 %v9151_v46, %v5019_v32  ;;  %v5946_v29 = vadd.f32 %v5945_v61, %v5944_v52 }
 0xe86   : > { %v5913_v24 = vadd.f32 %v5891_v30, %v5881_v33  ;;  %v5829_v37 = vpop.f32.mrf.mxu1  ;;  %v5954_v43 = vrot.slane %v5953_v8, 1 }
 0xe87   : > { %v5956_v57 = vsel %vm1536_vm6, %v5924_v17, 0.0  ;;  %v5871_v56 = vadd.f32 %v5829_v37, %v5235_v0  ;;  %v5870_v2 = vadd.f32 %v5802_v40, %v5208_v16  ;;  %v5947_v31 = vrot.slane %v5946_v29, 1 }
 0xe88   : > { %v5921_v51 = vmax.f32 %v5913_v24, 0.0  ;;  %v5957_v58 = vrot.slane %v5956_v57, 4  ;;  %v5955_v17 = vadd.f32 %v5954_v43, %v5953_v8 }
 0xe89   : > { %v5857_v7 = vpop.xlane.xlu0 %5856  ;;  %v5887_v53 = vadd.f32 %v5879_v9, %v5871_v56  ;;  %v5886_v46 = vadd.f32 %v5878_v1, %v5870_v2 }
 0xe8a   : > { %v5935_v21 = vsel %vm1536_vm6, %v5921_v51, 0.0  ;;  %v5877_v48 = vmul.f32 %v9012_v18, %v5857_v7  ;;  %v5958_v49 = vadd.f32 %v5957_v58, %v5956_v57  ;;  %v5987_v57 = vmul.f32 0.125, %v5955_v17 }
 0xe8b   : > { %v5936_v55 = vrot.slane %v5935_v21, 4 }
 0xe8c   : > { %v5885_v30 = vadd.f32 %v5877_v48, %v5869_v13  ;;  %v5959_v36 = vrot.slane %v5958_v49, 2  ;;  %v5948_v13 = vadd.f32 %v5947_v31, %v5946_v29 }
 0xe8d   : > { %v5937_v6 = vadd.f32 %v5936_v55, %v5935_v21 }
 0xe8e   : > { %v5917_v5 = vadd.f32 %v5899_v34, %v5885_v30  ;;  %v5960_v18 = vadd.f32 %v5959_v36, %v5958_v49  ;;  %v5986_v54 = vmul.f32 0.125, %v5948_v13 }
 0xe8f   : > { %v5938_v60 = vrot.slane %v5937_v6, 2 }
 0xe90   : > { %v5925_v26 = vmax.f32 %v5917_v5, 0.0  ;;  %v5961_v30 = vrot.slane %v5960_v18, 1 }
 0xe91   : > { %v5939_v41 = vadd.f32 %v5938_v60, %v5937_v6 }
 0xe92   : > { %v5963_v3 = vsel %vm1536_vm6, %v5925_v26, 0.0  ;;  %v5962_v26 = vadd.f32 %v5961_v30, %v5960_v18 }
 0xe93   : > { %v5964_v11 = vrot.slane %v5963_v3, 4  ;;  %v5940_v27 = vrot.slane %v5939_v41, 1 }
 0xe94   : > { %v5988_v37 = vmul.f32 0.125, %v5962_v26 }
 0xe95   : > { %v5965_v4 = vadd.f32 %v5964_v11, %v5963_v3  ;;  %v5941_v47 = vadd.f32 %v5940_v27, %v5939_v41 }
 0xe97   : > { %v5966_v28 = vrot.slane %v5965_v4, 2  ;;  %v5985_v7 = vmul.f32 0.125, %v5941_v47 }
 0xe99   : > { %v5967_v51 = vadd.f32 %v5966_v28, %v5965_v4  ;;  %v6000_v6 = vsel %vm3034_vm7, %v5985_v7, %v5984_v25 }
 0xe9a   : > { %v6001_v38 = vsel %vm3036_vm8, %v5986_v54, %v6000_v6 }
 0xe9b   : > { %v5903_v39 = vpop.permute.xlu1 %5902  ;;  %v5968_v20 = vrot.slane %v5967_v51, 1  ;;  %v6002_v15 = vsel %vm3038_vm9, %v5987_v57, %v6001_v38 }
 0xe9c   : > { %v5919_v42 = vadd.f32 %v5903_v39, %v5887_v53  ;;  %v5901_v33 = vpop.permute.xlu0 %5900  ;;  %v6003_v40 = vsel %vm3040_vm10, %v5988_v37, %v6002_v15 }
 0xe9d   : > { %v5918_v24 = vadd.f32 %v5901_v33, %v5886_v46  ;;  %v5969_v14 = vadd.f32 %v5968_v20, %v5967_v51 }
 0xe9e   : > { %v5927_v45 = vmax.f32 %v5919_v42, 0.0 }
 0xe9f   : > { %v5926_v23 = vmax.f32 %v5918_v24, 0.0  ;;  %v5989_v3 = vmul.f32 0.125, %v5969_v14 }
 0xea0   : > { %v5977_v10 = vsel %vm1536_vm6, %v5927_v45, 0.0 }
 0xea1   : > { %v5978_v63 = vrot.slane %v5977_v10, 4  ;;  %v5970_v21 = vsel %vm1536_vm6, %v5926_v23, 0.0  ;;  %v6004_v44 = vsel %vm3042_vm11, %v5989_v3, %v6003_v40 }
 0xea2   : > { %v5971_v48 = vrot.slane %v5970_v21, 4 }
 0xea3   : > { %v5979_v55 = vadd.f32 %v5978_v63, %v5977_v10 }
 0xea4   : > { %v5972_v34 = vadd.f32 %v5971_v48, %v5970_v21 }
 0xea5   : > { %v5980_v59 = vrot.slane %v5979_v55, 2 }
 0xea6   : > { %v5973_v5 = vrot.slane %v5972_v34, 2 }
 0xea7   : > { %v5981_v19 = vadd.f32 %v5980_v59, %v5979_v55 }
 0xea8   : > { %v5974_v32 = vadd.f32 %v5973_v5, %v5972_v34 }
 0xea9   : > { %v5982_v60 = vrot.slane %v5981_v19, 1 }
 0xeaa   : > { %v5975_v52 = vrot.slane %v5974_v32, 1 }
 0xeab   : > { %v5983_v50 = vadd.f32 %v5982_v60, %v5981_v19 }
 0xeac   : > { %v5976_v11 = vadd.f32 %v5975_v52, %v5974_v32 }
 0xead   : > { %v5991_v0 = vmul.f32 0.125, %v5983_v50 }
 0xeae   : > { %v5990_v58 = vmul.f32 0.125, %v5976_v11 }
 0xeb0   : > { %v6005_v16 = vsel %vm3044_vm12, %v5990_v58, %v6004_v44 }
 0xeb1   : > { %v6006_v41 = vsel %vm3046_vm13, %v5991_v0, %v6005_v16 }
 0xeb2   : > { %6008 = vst.msk [vmem:[%s531_s26] sm:$0xff] %vm1536_vm6, %v6006_v41 }
 0xeb3   : > { %6818 = shalt.err (!%p6815_p3)
}
 0xeb4   : > { %6337 = dma.vmem_to_hbm [thread:$0]  (%p6980_p5), %s6023_s19, 128, %s6025_s30, %s6010_s25  }
 0xeb5 PF: > { %p6343_p4 = scmp.ge.s32.totalorder %s6853_s24, 2  ;;  %s6036_s26 = sand.u32 1, %s6841_s21  }
 0xeb6   : > { %s6037_s1 = scalar_lea.sflag [#allocation3], %s6036_s26 }
 0xeb7   : > { %p6340_p7 = pnand %p6343_p4, %p6984_p6 }
 0xeb9   : > { %p6341_p8 = pneg %p6340_p7 }
 0xebb   : > { %6836 = dma.done.wait (%p6341_p8), %s6037_s1, 128  }
 0xebc   : > { %6838 = vsyncadd (%p6341_p8), %s6037_s1, 4294967168  ;;  %s9518_s2 = sld [smem:[#allocation5_spill]]  ;;  %p26_p9 = scmp.ge.s32.totalorder %s6968_s27, 4  }
 0xebd   : > { %s9519_s21 = smov %s6845_s22  ;;  %s9520_s22 = smov %s6849_s23 }
 0xebe   : > { %s9522_s24 = smov %s6968_s27  ;;  %28 = sbr.rel (!%p26_p9) target bundleno = 9 (0x9), region = 122 }
 0xec2   : > { %s9521_s23 = smov %s9518_s2 }
 0xec3   :  { %6043 = vsyncpa [#allocation3], 1 }
 0xec4   :  { %6045 = vsyncpa [#allocation3 + $0x1], 1 }

</bundles_post_ra>
